<compile_context>
chip_gen: v7x
topology: tpu7x:2x2x1
jax: 0.10.0
libtpu: 0.0.40
codegen_flags: <defaults>
</compile_context>

<pallas_src>
import jax
import jax.numpy as jnp
import numpy as np
from jax import lax
from jax.experimental import pallas as pl
from jax.experimental.pallas import tpu as pltpu


# ----------------------------------------------------------------------------
# Fused per-image kernel: conv1 -> pool -> conv1 -> pool -> conv3 -> pool
# ----------------------------------------------------------------------------
def _vgg_kernel(x_ref, w1_ref, b1_ref, w3_ref, b3_ref, o_ref, pad_ref):
    H, W, C = x_ref.shape

    def conv3x3(rows, h, w, w_ref, b_ref):
        """3x3 / stride 1 / pad 1 conv on a list of h rows, each (w, C).

        Returns the conv output flattened with row pitch wp = w + 2: valid
        output row r occupies acc[r*wp : r*wp + w]; columns >= w are garbage
        (never read by the pooling step)."""
        wp = w + 2
        lo = h * wp
        lp = (h + 2) * wp + wp  # extra slack row for the (dy=2, dx=2) tap
        # Zero the padded plane (incl. slack) then write the interior rows.
        pad_ref[pl.ds(0, lp), :] = jnp.zeros((lp, C), jnp.float32)
        for r in range(h):
            pad_ref[pl.ds((r + 1) * wp + 1, w), :] = rows[r]
        acc = jnp.zeros((lo, C), jnp.float32)
        t = 0
        for dy in range(3):
            for dx in range(3):
                xs = pad_ref[pl.ds(dy * wp + dx, lo), :]
                acc = acc + jnp.dot(xs, w_ref[t],
                                    preferred_element_type=jnp.float32)
                t += 1
        return acc + b_ref[...]

    def maxpool3x3s2(acc, h, w):
        """MaxPool2d(kernel=3, stride=2, padding=0) on conv3x3's flattened
        output (row pitch w + 2). Returns (list of (wo, C) rows, ho, wo)."""
        wp = w + 2
        ho = (h - 3) // 2 + 1
        wo = (w - 3) // 2 + 1
        if w - 2 > 1:
            # 0/1 selection matrix picking column 2*j (stride-2 subsample done
            # as a tiny matmul -> no strided slicing needed).
            ri = lax.broadcasted_iota(jnp.int32, (wo, w - 2), 0)
            ci = lax.broadcasted_iota(jnp.int32, (wo, w - 2), 1)
            sel = (ci == 2 * ri).astype(jnp.float32)
        rows = []
        for i in range(ho):
            r0 = acc[(2 * i) * wp:(2 * i) * wp + w, :]
            r1 = acc[(2 * i + 1) * wp:(2 * i + 1) * wp + w, :]
            r2 = acc[(2 * i + 2) * wp:(2 * i + 2) * wp + w, :]
            v = jnp.maximum(jnp.maximum(r0, r1), r2)               # (w, C)
            hm = jnp.maximum(jnp.maximum(v[:w - 2, :], v[1:w - 1, :]),
                             v[2:, :])                             # (w-2, C)
            if w - 2 > 1:
                rows.append(jnp.dot(sel, hm,
                                    preferred_element_type=jnp.float32))
            else:
                rows.append(hm)                                    # (1, C)
        return rows, ho, wo

    # block 1: conv_block1 + maxpool
    rows = [x_ref[r] for r in range(H)]
    acc = conv3x3(rows, H, W, w1_ref, b1_ref)
    rows, h, w = maxpool3x3s2(acc, H, W)
    # block 2: conv_block1 again (weight reuse, as in the torch forward) + maxpool
    acc = conv3x3(rows, h, w, w1_ref, b1_ref)
    rows, h, w = maxpool3x3s2(acc, h, w)
    # block 3: conv_block3 + maxpool
    acc = conv3x3(rows, h, w, w3_ref, b3_ref)
    rows, h, w = maxpool3x3s2(acc, h, w)
    # final (h*w, C) pooled activation
    for r in range(h):
        o_ref[pl.ds(r * w, w), :] = rows[r].astype(o_ref.dtype)


def vggnet_forward(x_nchw, params):
    n, c, h, w = x_nchw.shape
    x = jnp.transpose(x_nchw, (0, 2, 3, 1)).astype(jnp.float32)  # NCHW -> NHWC

    def pool_out(s):
        return (s - 3) // 2 + 1

    h1, w1 = pool_out(h), pool_out(w)
    h2, w2 = pool_out(h1), pool_out(w1)
    h3, w3 = pool_out(h2), pool_out(w2)

    lp1 = (h + 2) * (w + 2) + (w + 2)  # largest padded plane (layer 1)

    w1_9 = params["w1"].reshape(9, c, c).astype(jnp.float32)  # HWIO -> (9, Cin, Cout)
    b1_2 = params["b1"].reshape(1, c).astype(jnp.float32)
    w3_9 = params["w3"].reshape(9, c, c).astype(jnp.float32)
    b3_2 = params["b3"].reshape(1, c).astype(jnp.float32)

    out = pl.pallas_call(
        _vgg_kernel,
        out_shape=jax.ShapeDtypeStruct((n, h3 * w3, c), jnp.float32),
        grid=(n,),
        in_specs=[
            pl.BlockSpec((None, h, w, c), lambda i: (i, 0, 0, 0)),
            pl.BlockSpec((9, c, c), lambda i: (0, 0, 0)),
            pl.BlockSpec((1, c), lambda i: (0, 0)),
            pl.BlockSpec((9, c, c), lambda i: (0, 0, 0)),
            pl.BlockSpec((1, c), lambda i: (0, 0)),
        ],
        out_specs=pl.BlockSpec((None, h3 * w3, c), lambda i: (i, 0, 0)),
        scratch_shapes=[pltpu.VMEM((lp1, c), jnp.float32)],
        compiler_params=pltpu.CompilerParams(
            dimension_semantics=("parallel",)),
    )(x, w1_9, b1_2, w3_9, b3_2)

    out = out.reshape(n, h3, w3, c)
    return jnp.transpose(out, (0, 3, 1, 2))  # NHWC -> NCHW


# ----------------------------------------------------------------------------
# Pure-JAX reference for correctness checking.
# ----------------------------------------------------------------------------
def _conv_ref(x, w, b):
    y = lax.conv_general_dilated(
        x, w, (1, 1), ((1, 1), (1, 1)),
        dimension_numbers=("NHWC", "HWIO", "NHWC"))
    return y + b


def _pool_ref(x):
    return lax.reduce_window(x, -jnp.inf, lax.max,
                             (1, 3, 3, 1), (1, 2, 2, 1), "VALID")


def vggnet_ref(x_nchw, params):
    x = jnp.transpose(x_nchw, (0, 2, 3, 1))
    out = _pool_ref(_conv_ref(x, params["w1"], params["b1"]))
    out = _pool_ref(_conv_ref(out, params["w1"], params["b1"]))
    out = _pool_ref(_conv_ref(out, params["w3"], params["b3"]))
    return jnp.transpose(out, (0, 3, 1, 2))


if __name__ == "__main__":
    key = jax.random.PRNGKey(0)
    k_x, k_w1, k_b1, k_w2, k_b2, k_w3, k_b3 = jax.random.split(key, 7)

    # Small shapes consistent with the module (batch=2, channels=4, spatial=16).
    N, C, H, W = 2, 4, 16, 16
    x = jax.random.normal(k_x, (N, C, H, W), jnp.float32)

    fan_in = C * 3 * 3
    bound = float(1.0 / np.sqrt(fan_in))
    params = {
        "w1": jax.random.uniform(k_w1, (3, 3, C, C), jnp.float32, -bound, bound),
        "b1": jax.random.uniform(k_b1, (C,), jnp.float32, -bound, bound),
        # conv_block2 exists in the torch module's __init__ but is unused in forward.
        "w2": jax.random.uniform(k_w2, (3, 3, C, C), jnp.float32, -bound, bound),
        "b2": jax.random.uniform(k_b2, (C,), jnp.float32, -bound, bound),
        "w3": jax.random.uniform(k_w3, (3, 3, C, C), jnp.float32, -bound, bound),
        "b3": jax.random.uniform(k_b3, (C,), jnp.float32, -bound, bound),
    }

    out = jax.block_until_ready(vggnet_forward(x, params))
    ref = jax.block_until_ready(vggnet_ref(x, params))

    assert out.shape == (N, C, 1, 1), out.shape
    np.testing.assert_allclose(np.asarray(out), np.asarray(ref),
                               rtol=1e-4, atol=1e-5)
    print("KERNEL_OK")
</pallas_src>

<mosaic_0001>
module attributes {stable_mosaic.version = 11 : i64} {
  func.func @_vgg_kernel(%arg0: i32, %arg1: memref<1x16x16x4xf32, #tpu.memory_space<vmem>>, %arg2: memref<9x4x4xf32, #tpu.memory_space<vmem>>, %arg3: memref<1x4xf32, #tpu.memory_space<vmem>>, %arg4: memref<9x4x4xf32, #tpu.memory_space<vmem>>, %arg5: memref<1x4xf32, #tpu.memory_space<vmem>>, %arg6: memref<1x1x4xf32, #tpu.memory_space<vmem>>, %arg7: memref<342x4xf32, #tpu.memory_space<vmem>>) attributes {dimension_semantics = [#tpu.dimension_semantics<parallel>], iteration_bounds = array<i64: 2>, scalar_prefetch = 0 : i64, scratch_operands = 1 : i64, tpu.core_type = #tpu.core_type<tc>, window_params = [{transform_indices = @transform_0, window_bounds = array<i64: 1, 16, 16, 4>}, {pipeline_mode = #tpu.pipeline_mode<synchronous>, transform_indices = @transform_1, window_bounds = array<i64: 9, 4, 4>}, {pipeline_mode = #tpu.pipeline_mode<synchronous>, transform_indices = @transform_2, window_bounds = array<i64: 1, 4>}, {pipeline_mode = #tpu.pipeline_mode<synchronous>, transform_indices = @transform_3, window_bounds = array<i64: 9, 4, 4>}, {pipeline_mode = #tpu.pipeline_mode<synchronous>, transform_indices = @transform_4, window_bounds = array<i64: 1, 4>}, {transform_indices = @transform_5, window_bounds = array<i64: 1, 1, 4>}]} {
    %c0 = arith.constant 0 : index
    %c0_0 = arith.constant 0 : index
    %c0_1 = arith.constant 0 : index
    %c0_2 = arith.constant 0 : index
    %0 = vector.load %arg1[%c0, %c0_0, %c0_1, %c0_2] : memref<1x16x16x4xf32, #tpu.memory_space<vmem>>, vector<1x1x16x4xf32>
    %1 = vector.shape_cast %0 : vector<1x1x16x4xf32> to vector<16x4xf32>
    %c0_3 = arith.constant 0 : index
    %c1 = arith.constant 1 : index
    %c0_4 = arith.constant 0 : index
    %c0_5 = arith.constant 0 : index
    %2 = vector.load %arg1[%c0_3, %c1, %c0_4, %c0_5] : memref<1x16x16x4xf32, #tpu.memory_space<vmem>>, vector<1x1x16x4xf32>
    %3 = vector.shape_cast %2 : vector<1x1x16x4xf32> to vector<16x4xf32>
    %c0_6 = arith.constant 0 : index
    %c2 = arith.constant 2 : index
    %c0_7 = arith.constant 0 : index
    %c0_8 = arith.constant 0 : index
    %4 = vector.load %arg1[%c0_6, %c2, %c0_7, %c0_8] : memref<1x16x16x4xf32, #tpu.memory_space<vmem>>, vector<1x1x16x4xf32>
    %5 = vector.shape_cast %4 : vector<1x1x16x4xf32> to vector<16x4xf32>
    %c0_9 = arith.constant 0 : index
    %c3 = arith.constant 3 : index
    %c0_10 = arith.constant 0 : index
    %c0_11 = arith.constant 0 : index
    %6 = vector.load %arg1[%c0_9, %c3, %c0_10, %c0_11] : memref<1x16x16x4xf32, #tpu.memory_space<vmem>>, vector<1x1x16x4xf32>
    %7 = vector.shape_cast %6 : vector<1x1x16x4xf32> to vector<16x4xf32>
    %c0_12 = arith.constant 0 : index
    %c4 = arith.constant 4 : index
    %c0_13 = arith.constant 0 : index
    %c0_14 = arith.constant 0 : index
    %8 = vector.load %arg1[%c0_12, %c4, %c0_13, %c0_14] : memref<1x16x16x4xf32, #tpu.memory_space<vmem>>, vector<1x1x16x4xf32>
    %9 = vector.shape_cast %8 : vector<1x1x16x4xf32> to vector<16x4xf32>
    %c0_15 = arith.constant 0 : index
    %c5 = arith.constant 5 : index
    %c0_16 = arith.constant 0 : index
    %c0_17 = arith.constant 0 : index
    %10 = vector.load %arg1[%c0_15, %c5, %c0_16, %c0_17] : memref<1x16x16x4xf32, #tpu.memory_space<vmem>>, vector<1x1x16x4xf32>
    %11 = vector.shape_cast %10 : vector<1x1x16x4xf32> to vector<16x4xf32>
    %c0_18 = arith.constant 0 : index
    %c6 = arith.constant 6 : index
    %c0_19 = arith.constant 0 : index
    %c0_20 = arith.constant 0 : index
    %12 = vector.load %arg1[%c0_18, %c6, %c0_19, %c0_20] : memref<1x16x16x4xf32, #tpu.memory_space<vmem>>, vector<1x1x16x4xf32>
    %13 = vector.shape_cast %12 : vector<1x1x16x4xf32> to vector<16x4xf32>
    %c0_21 = arith.constant 0 : index
    %c7 = arith.constant 7 : index
    %c0_22 = arith.constant 0 : index
    %c0_23 = arith.constant 0 : index
    %14 = vector.load %arg1[%c0_21, %c7, %c0_22, %c0_23] : memref<1x16x16x4xf32, #tpu.memory_space<vmem>>, vector<1x1x16x4xf32>
    %15 = vector.shape_cast %14 : vector<1x1x16x4xf32> to vector<16x4xf32>
    %c0_24 = arith.constant 0 : index
    %c8 = arith.constant 8 : index
    %c0_25 = arith.constant 0 : index
    %c0_26 = arith.constant 0 : index
    %16 = vector.load %arg1[%c0_24, %c8, %c0_25, %c0_26] : memref<1x16x16x4xf32, #tpu.memory_space<vmem>>, vector<1x1x16x4xf32>
    %17 = vector.shape_cast %16 : vector<1x1x16x4xf32> to vector<16x4xf32>
    %c0_27 = arith.constant 0 : index
    %c9 = arith.constant 9 : index
    %c0_28 = arith.constant 0 : index
    %c0_29 = arith.constant 0 : index
    %18 = vector.load %arg1[%c0_27, %c9, %c0_28, %c0_29] : memref<1x16x16x4xf32, #tpu.memory_space<vmem>>, vector<1x1x16x4xf32>
    %19 = vector.shape_cast %18 : vector<1x1x16x4xf32> to vector<16x4xf32>
    %c0_30 = arith.constant 0 : index
    %c10 = arith.constant 10 : index
    %c0_31 = arith.constant 0 : index
    %c0_32 = arith.constant 0 : index
    %20 = vector.load %arg1[%c0_30, %c10, %c0_31, %c0_32] : memref<1x16x16x4xf32, #tpu.memory_space<vmem>>, vector<1x1x16x4xf32>
    %21 = vector.shape_cast %20 : vector<1x1x16x4xf32> to vector<16x4xf32>
    %c0_33 = arith.constant 0 : index
    %c11 = arith.constant 11 : index
    %c0_34 = arith.constant 0 : index
    %c0_35 = arith.constant 0 : index
    %22 = vector.load %arg1[%c0_33, %c11, %c0_34, %c0_35] : memref<1x16x16x4xf32, #tpu.memory_space<vmem>>, vector<1x1x16x4xf32>
    %23 = vector.shape_cast %22 : vector<1x1x16x4xf32> to vector<16x4xf32>
    %c0_36 = arith.constant 0 : index
    %c12 = arith.constant 12 : index
    %c0_37 = arith.constant 0 : index
    %c0_38 = arith.constant 0 : index
    %24 = vector.load %arg1[%c0_36, %c12, %c0_37, %c0_38] : memref<1x16x16x4xf32, #tpu.memory_space<vmem>>, vector<1x1x16x4xf32>
    %25 = vector.shape_cast %24 : vector<1x1x16x4xf32> to vector<16x4xf32>
    %c0_39 = arith.constant 0 : index
    %c13 = arith.constant 13 : index
    %c0_40 = arith.constant 0 : index
    %c0_41 = arith.constant 0 : index
    %26 = vector.load %arg1[%c0_39, %c13, %c0_40, %c0_41] : memref<1x16x16x4xf32, #tpu.memory_space<vmem>>, vector<1x1x16x4xf32>
    %27 = vector.shape_cast %26 : vector<1x1x16x4xf32> to vector<16x4xf32>
    %c0_42 = arith.constant 0 : index
    %c14 = arith.constant 14 : index
    %c0_43 = arith.constant 0 : index
    %c0_44 = arith.constant 0 : index
    %28 = vector.load %arg1[%c0_42, %c14, %c0_43, %c0_44] : memref<1x16x16x4xf32, #tpu.memory_space<vmem>>, vector<1x1x16x4xf32>
    %29 = vector.shape_cast %28 : vector<1x1x16x4xf32> to vector<16x4xf32>
    %c0_45 = arith.constant 0 : index
    %c15 = arith.constant 15 : index
    %c0_46 = arith.constant 0 : index
    %c0_47 = arith.constant 0 : index
    %30 = vector.load %arg1[%c0_45, %c15, %c0_46, %c0_47] : memref<1x16x16x4xf32, #tpu.memory_space<vmem>>, vector<1x1x16x4xf32>
    %31 = vector.shape_cast %30 : vector<1x1x16x4xf32> to vector<16x4xf32>
    %cst = arith.constant 0.000000e+00 : f32
    %32 = vector.broadcast %cst : f32 to vector<342x4xf32>
    %c0_48 = arith.constant 0 : index
    %c0_49 = arith.constant 0 : index
    %33 = vector.load %arg7[%c0_48, %c0_49] : memref<342x4xf32, #tpu.memory_space<vmem>>, vector<342x4xf32>
    tpu.vector_store %arg7[%c0_48, %c0_49], %32 {strides = array<i32>} : memref<342x4xf32, #tpu.memory_space<vmem>>, vector<342x4xf32>,
    %c19 = arith.constant 19 : index
    %c0_50 = arith.constant 0 : index
    %34 = vector.load %arg7[%c19, %c0_50] : memref<342x4xf32, #tpu.memory_space<vmem>>, vector<16x4xf32>
    tpu.vector_store %arg7[%c19, %c0_50], %1 {strides = array<i32>} : memref<342x4xf32, #tpu.memory_space<vmem>>, vector<16x4xf32>,
    %c37 = arith.constant 37 : index
    %c0_51 = arith.constant 0 : index
    %35 = vector.load %arg7[%c37, %c0_51] : memref<342x4xf32, #tpu.memory_space<vmem>>, vector<16x4xf32>
    tpu.vector_store %arg7[%c37, %c0_51], %3 {strides = array<i32>} : memref<342x4xf32, #tpu.memory_space<vmem>>, vector<16x4xf32>,
    %c55 = arith.constant 55 : index
    %c0_52 = arith.constant 0 : index
    %36 = vector.load %arg7[%c55, %c0_52] : memref<342x4xf32, #tpu.memory_space<vmem>>, vector<16x4xf32>
    tpu.vector_store %arg7[%c55, %c0_52], %5 {strides = array<i32>} : memref<342x4xf32, #tpu.memory_space<vmem>>, vector<16x4xf32>,
    %c73 = arith.constant 73 : index
    %c0_53 = arith.constant 0 : index
    %37 = vector.load %arg7[%c73, %c0_53] : memref<342x4xf32, #tpu.memory_space<vmem>>, vector<16x4xf32>
    tpu.vector_store %arg7[%c73, %c0_53], %7 {strides = array<i32>} : memref<342x4xf32, #tpu.memory_space<vmem>>, vector<16x4xf32>,
    %c91 = arith.constant 91 : index
    %c0_54 = arith.constant 0 : index
    %38 = vector.load %arg7[%c91, %c0_54] : memref<342x4xf32, #tpu.memory_space<vmem>>, vector<16x4xf32>
    tpu.vector_store %arg7[%c91, %c0_54], %9 {strides = array<i32>} : memref<342x4xf32, #tpu.memory_space<vmem>>, vector<16x4xf32>,
    %c109 = arith.constant 109 : index
    %c0_55 = arith.constant 0 : index
    %39 = vector.load %arg7[%c109, %c0_55] : memref<342x4xf32, #tpu.memory_space<vmem>>, vector<16x4xf32>
    tpu.vector_store %arg7[%c109, %c0_55], %11 {strides = array<i32>} : memref<342x4xf32, #tpu.memory_space<vmem>>, vector<16x4xf32>,
    %c127 = arith.constant 127 : index
    %c0_56 = arith.constant 0 : index
    %40 = vector.load %arg7[%c127, %c0_56] : memref<342x4xf32, #tpu.memory_space<vmem>>, vector<16x4xf32>
    tpu.vector_store %arg7[%c127, %c0_56], %13 {strides = array<i32>} : memref<342x4xf32, #tpu.memory_space<vmem>>, vector<16x4xf32>,
    %c145 = arith.constant 145 : index
    %c0_57 = arith.constant 0 : index
    %41 = vector.load %arg7[%c145, %c0_57] : memref<342x4xf32, #tpu.memory_space<vmem>>, vector<16x4xf32>
    tpu.vector_store %arg7[%c145, %c0_57], %15 {strides = array<i32>} : memref<342x4xf32, #tpu.memory_space<vmem>>, vector<16x4xf32>,
    %c163 = arith.constant 163 : index
    %c0_58 = arith.constant 0 : index
    %42 = vector.load %arg7[%c163, %c0_58] : memref<342x4xf32, #tpu.memory_space<vmem>>, vector<16x4xf32>
    tpu.vector_store %arg7[%c163, %c0_58], %17 {strides = array<i32>} : memref<342x4xf32, #tpu.memory_space<vmem>>, vector<16x4xf32>,
    %c181 = arith.constant 181 : index
    %c0_59 = arith.constant 0 : index
    %43 = vector.load %arg7[%c181, %c0_59] : memref<342x4xf32, #tpu.memory_space<vmem>>, vector<16x4xf32>
    tpu.vector_store %arg7[%c181, %c0_59], %19 {strides = array<i32>} : memref<342x4xf32, #tpu.memory_space<vmem>>, vector<16x4xf32>,
    %c199 = arith.constant 199 : index
    %c0_60 = arith.constant 0 : index
    %44 = vector.load %arg7[%c199, %c0_60] : memref<342x4xf32, #tpu.memory_space<vmem>>, vector<16x4xf32>
    tpu.vector_store %arg7[%c199, %c0_60], %21 {strides = array<i32>} : memref<342x4xf32, #tpu.memory_space<vmem>>, vector<16x4xf32>,
    %c217 = arith.constant 217 : index
    %c0_61 = arith.constant 0 : index
    %45 = vector.load %arg7[%c217, %c0_61] : memref<342x4xf32, #tpu.memory_space<vmem>>, vector<16x4xf32>
    tpu.vector_store %arg7[%c217, %c0_61], %23 {strides = array<i32>} : memref<342x4xf32, #tpu.memory_space<vmem>>, vector<16x4xf32>,
    %c235 = arith.constant 235 : index
    %c0_62 = arith.constant 0 : index
    %46 = vector.load %arg7[%c235, %c0_62] : memref<342x4xf32, #tpu.memory_space<vmem>>, vector<16x4xf32>
    tpu.vector_store %arg7[%c235, %c0_62], %25 {strides = array<i32>} : memref<342x4xf32, #tpu.memory_space<vmem>>, vector<16x4xf32>,
    %c253 = arith.constant 253 : index
    %c0_63 = arith.constant 0 : index
    %47 = vector.load %arg7[%c253, %c0_63] : memref<342x4xf32, #tpu.memory_space<vmem>>, vector<16x4xf32>
    tpu.vector_store %arg7[%c253, %c0_63], %27 {strides = array<i32>} : memref<342x4xf32, #tpu.memory_space<vmem>>, vector<16x4xf32>,
    %c271 = arith.constant 271 : index
    %c0_64 = arith.constant 0 : index
    %48 = vector.load %arg7[%c271, %c0_64] : memref<342x4xf32, #tpu.memory_space<vmem>>, vector<16x4xf32>
    tpu.vector_store %arg7[%c271, %c0_64], %29 {strides = array<i32>} : memref<342x4xf32, #tpu.memory_space<vmem>>, vector<16x4xf32>,
    %c289 = arith.constant 289 : index
    %c0_65 = arith.constant 0 : index
    %49 = vector.load %arg7[%c289, %c0_65] : memref<342x4xf32, #tpu.memory_space<vmem>>, vector<16x4xf32>
    tpu.vector_store %arg7[%c289, %c0_65], %31 {strides = array<i32>} : memref<342x4xf32, #tpu.memory_space<vmem>>, vector<16x4xf32>,
    %cst_66 = arith.constant 0.000000e+00 : f32
    %50 = vector.broadcast %cst_66 : f32 to vector<288x4xf32>
    %c0_67 = arith.constant 0 : index
    %c0_68 = arith.constant 0 : index
    %51 = vector.load %arg7[%c0_67, %c0_68] : memref<342x4xf32, #tpu.memory_space<vmem>>, vector<288x4xf32>
    %c0_69 = arith.constant 0 : index
    %c0_70 = arith.constant 0 : index
    %c0_71 = arith.constant 0 : index
    %52 = vector.load %arg2[%c0_69, %c0_70, %c0_71] : memref<9x4x4xf32, #tpu.memory_space<vmem>>, vector<1x4x4xf32>
    %53 = vector.shape_cast %52 : vector<1x4x4xf32> to vector<4x4xf32>
    %cst_72 = arith.constant dense<0.000000e+00> : vector<288x4xf32>
    %54 = tpu.matmul %51, %53, %cst_72 {dimension_numbers = #tpu.dot_dimension_numbers<[1], [0], [0], [1], [0, 0, 1, 1], [], []>} : vector<288x4xf32>, vector<4x4xf32>, vector<288x4xf32> -> vector<288x4xf32>
    %55 = arith.addf %50, %54 : vector<288x4xf32>
    %c1_73 = arith.constant 1 : index
    %c0_74 = arith.constant 0 : index
    %56 = vector.load %arg7[%c1_73, %c0_74] : memref<342x4xf32, #tpu.memory_space<vmem>>, vector<288x4xf32>
    %c1_75 = arith.constant 1 : index
    %c0_76 = arith.constant 0 : index
    %c0_77 = arith.constant 0 : index
    %57 = vector.load %arg2[%c1_75, %c0_76, %c0_77] : memref<9x4x4xf32, #tpu.memory_space<vmem>>, vector<1x4x4xf32>
    %58 = vector.shape_cast %57 : vector<1x4x4xf32> to vector<4x4xf32>
    %cst_78 = arith.constant dense<0.000000e+00> : vector<288x4xf32>
    %59 = tpu.matmul %56, %58, %cst_78 {dimension_numbers = #tpu.dot_dimension_numbers<[1], [0], [0], [1], [0, 0, 1, 1], [], []>} : vector<288x4xf32>, vector<4x4xf32>, vector<288x4xf32> -> vector<288x4xf32>
    %60 = arith.addf %55, %59 : vector<288x4xf32>
    %c2_79 = arith.constant 2 : index
    %c0_80 = arith.constant 0 : index
    %61 = vector.load %arg7[%c2_79, %c0_80] : memref<342x4xf32, #tpu.memory_space<vmem>>, vector<288x4xf32>
    %c2_81 = arith.constant 2 : index
    %c0_82 = arith.constant 0 : index
    %c0_83 = arith.constant 0 : index
    %62 = vector.load %arg2[%c2_81, %c0_82, %c0_83] : memref<9x4x4xf32, #tpu.memory_space<vmem>>, vector<1x4x4xf32>
    %63 = vector.shape_cast %62 : vector<1x4x4xf32> to vector<4x4xf32>
    %cst_84 = arith.constant dense<0.000000e+00> : vector<288x4xf32>
    %64 = tpu.matmul %61, %63, %cst_84 {dimension_numbers = #tpu.dot_dimension_numbers<[1], [0], [0], [1], [0, 0, 1, 1], [], []>} : vector<288x4xf32>, vector<4x4xf32>, vector<288x4xf32> -> vector<288x4xf32>
    %65 = arith.addf %60, %64 : vector<288x4xf32>
    %c18 = arith.constant 18 : index
    %c0_85 = arith.constant 0 : index
    %66 = vector.load %arg7[%c18, %c0_85] : memref<342x4xf32, #tpu.memory_space<vmem>>, vector<288x4xf32>
    %c3_86 = arith.constant 3 : index
    %c0_87 = arith.constant 0 : index
    %c0_88 = arith.constant 0 : index
    %67 = vector.load %arg2[%c3_86, %c0_87, %c0_88] : memref<9x4x4xf32, #tpu.memory_space<vmem>>, vector<1x4x4xf32>
    %68 = vector.shape_cast %67 : vector<1x4x4xf32> to vector<4x4xf32>
    %cst_89 = arith.constant dense<0.000000e+00> : vector<288x4xf32>
    %69 = tpu.matmul %66, %68, %cst_89 {dimension_numbers = #tpu.dot_dimension_numbers<[1], [0], [0], [1], [0, 0, 1, 1], [], []>} : vector<288x4xf32>, vector<4x4xf32>, vector<288x4xf32> -> vector<288x4xf32>
    %70 = arith.addf %65, %69 : vector<288x4xf32>
    %c19_90 = arith.constant 19 : index
    %c0_91 = arith.constant 0 : index
    %71 = vector.load %arg7[%c19_90, %c0_91] : memref<342x4xf32, #tpu.memory_space<vmem>>, vector<288x4xf32>
    %c4_92 = arith.constant 4 : index
    %c0_93 = arith.constant 0 : index
    %c0_94 = arith.constant 0 : index
    %72 = vector.load %arg2[%c4_92, %c0_93, %c0_94] : memref<9x4x4xf32, #tpu.memory_space<vmem>>, vector<1x4x4xf32>
    %73 = vector.shape_cast %72 : vector<1x4x4xf32> to vector<4x4xf32>
    %cst_95 = arith.constant dense<0.000000e+00> : vector<288x4xf32>
    %74 = tpu.matmul %71, %73, %cst_95 {dimension_numbers = #tpu.dot_dimension_numbers<[1], [0], [0], [1], [0, 0, 1, 1], [], []>} : vector<288x4xf32>, vector<4x4xf32>, vector<288x4xf32> -> vector<288x4xf32>
    %75 = arith.addf %70, %74 : vector<288x4xf32>
    %c20 = arith.constant 20 : index
    %c0_96 = arith.constant 0 : index
    %76 = vector.load %arg7[%c20, %c0_96] : memref<342x4xf32, #tpu.memory_space<vmem>>, vector<288x4xf32>
    %c5_97 = arith.constant 5 : index
    %c0_98 = arith.constant 0 : index
    %c0_99 = arith.constant 0 : index
    %77 = vector.load %arg2[%c5_97, %c0_98, %c0_99] : memref<9x4x4xf32, #tpu.memory_space<vmem>>, vector<1x4x4xf32>
    %78 = vector.shape_cast %77 : vector<1x4x4xf32> to vector<4x4xf32>
    %cst_100 = arith.constant dense<0.000000e+00> : vector<288x4xf32>
    %79 = tpu.matmul %76, %78, %cst_100 {dimension_numbers = #tpu.dot_dimension_numbers<[1], [0], [0], [1], [0, 0, 1, 1], [], []>} : vector<288x4xf32>, vector<4x4xf32>, vector<288x4xf32> -> vector<288x4xf32>
    %80 = arith.addf %75, %79 : vector<288x4xf32>
    %c36 = arith.constant 36 : index
    %c0_101 = arith.constant 0 : index
    %81 = vector.load %arg7[%c36, %c0_101] : memref<342x4xf32, #tpu.memory_space<vmem>>, vector<288x4xf32>
    %c6_102 = arith.constant 6 : index
    %c0_103 = arith.constant 0 : index
    %c0_104 = arith.constant 0 : index
    %82 = vector.load %arg2[%c6_102, %c0_103, %c0_104] : memref<9x4x4xf32, #tpu.memory_space<vmem>>, vector<1x4x4xf32>
    %83 = vector.shape_cast %82 : vector<1x4x4xf32> to vector<4x4xf32>
    %cst_105 = arith.constant dense<0.000000e+00> : vector<288x4xf32>
    %84 = tpu.matmul %81, %83, %cst_105 {dimension_numbers = #tpu.dot_dimension_numbers<[1], [0], [0], [1], [0, 0, 1, 1], [], []>} : vector<288x4xf32>, vector<4x4xf32>, vector<288x4xf32> -> vector<288x4xf32>
    %85 = arith.addf %80, %84 : vector<288x4xf32>
    %c37_106 = arith.constant 37 : index
    %c0_107 = arith.constant 0 : index
    %86 = vector.load %arg7[%c37_106, %c0_107] : memref<342x4xf32, #tpu.memory_space<vmem>>, vector<288x4xf32>
    %c7_108 = arith.constant 7 : index
    %c0_109 = arith.constant 0 : index
    %c0_110 = arith.constant 0 : index
    %87 = vector.load %arg2[%c7_108, %c0_109, %c0_110] : memref<9x4x4xf32, #tpu.memory_space<vmem>>, vector<1x4x4xf32>
    %88 = vector.shape_cast %87 : vector<1x4x4xf32> to vector<4x4xf32>
    %cst_111 = arith.constant dense<0.000000e+00> : vector<288x4xf32>
    %89 = tpu.matmul %86, %88, %cst_111 {dimension_numbers = #tpu.dot_dimension_numbers<[1], [0], [0], [1], [0, 0, 1, 1], [], []>} : vector<288x4xf32>, vector<4x4xf32>, vector<288x4xf32> -> vector<288x4xf32>
    %90 = arith.addf %85, %89 : vector<288x4xf32>
    %c38 = arith.constant 38 : index
    %c0_112 = arith.constant 0 : index
    %91 = vector.load %arg7[%c38, %c0_112] : memref<342x4xf32, #tpu.memory_space<vmem>>, vector<288x4xf32>
    %c8_113 = arith.constant 8 : index
    %c0_114 = arith.constant 0 : index
    %c0_115 = arith.constant 0 : index
    %92 = vector.load %arg2[%c8_113, %c0_114, %c0_115] : memref<9x4x4xf32, #tpu.memory_space<vmem>>, vector<1x4x4xf32>
    %93 = vector.shape_cast %92 : vector<1x4x4xf32> to vector<4x4xf32>
    %cst_116 = arith.constant dense<0.000000e+00> : vector<288x4xf32>
    %94 = tpu.matmul %91, %93, %cst_116 {dimension_numbers = #tpu.dot_dimension_numbers<[1], [0], [0], [1], [0, 0, 1, 1], [], []>} : vector<288x4xf32>, vector<4x4xf32>, vector<288x4xf32> -> vector<288x4xf32>
    %95 = arith.addf %90, %94 : vector<288x4xf32>
    %c0_117 = arith.constant 0 : index
    %c0_118 = arith.constant 0 : index
    %96 = vector.load %arg3[%c0_117, %c0_118] : memref<1x4xf32, #tpu.memory_space<vmem>>, vector<1x4xf32>
    %97 = vector.broadcast %96 : vector<1x4xf32> to vector<288x4xf32>
    %98 = arith.addf %95, %97 : vector<288x4xf32>
    %99 = tpu.iota {dimensions = array<i32: 0>} : vector<7x14xi32>
    %100 = tpu.iota {dimensions = array<i32: 1>} : vector<7x14xi32>
    %c2_i32 = arith.constant 2 : i32
    %101 = vector.broadcast %c2_i32 : i32 to vector<7x14xi32>
    %102 = arith.muli %101, %99 : vector<7x14xi32>
    %103 = arith.cmpi eq, %100, %102 : vector<7x14xi32>
    %104 = arith.extui %103 : vector<7x14xi1> to vector<7x14xi32>
    %105 = arith.sitofp %104 : vector<7x14xi32> to vector<7x14xf32>
    %106 = vector.extract_strided_slice %98 {offsets = [0, 0], sizes = [16, 4], strides = [1, 1]} : vector<288x4xf32> to vector<16x4xf32>
    %107 = vector.extract_strided_slice %98 {offsets = [18, 0], sizes = [16, 4], strides = [1, 1]} : vector<288x4xf32> to vector<16x4xf32>
    %108 = vector.extract_strided_slice %98 {offsets = [36, 0], sizes = [16, 4], strides = [1, 1]} : vector<288x4xf32> to vector<16x4xf32>
    %109 = arith.maximumf %106, %107 : vector<16x4xf32>
    %110 = arith.maximumf %109, %108 : vector<16x4xf32>
    %111 = vector.extract_strided_slice %110 {offsets = [0, 0], sizes = [14, 4], strides = [1, 1]} : vector<16x4xf32> to vector<14x4xf32>
    %112 = vector.extract_strided_slice %110 {offsets = [1, 0], sizes = [14, 4], strides = [1, 1]} : vector<16x4xf32> to vector<14x4xf32>
    %113 = arith.maximumf %111, %112 : vector<14x4xf32>
    %114 = vector.extract_strided_slice %110 {offsets = [2, 0], sizes = [14, 4], strides = [1, 1]} : vector<16x4xf32> to vector<14x4xf32>
    %115 = arith.maximumf %113, %114 : vector<14x4xf32>
    %cst_119 = arith.constant dense<0.000000e+00> : vector<7x4xf32>
    %116 = tpu.matmul %105, %115, %cst_119 {dimension_numbers = #tpu.dot_dimension_numbers<[1], [0], [0], [1], [0, 0, 1, 1], [], []>} : vector<7x14xf32>, vector<14x4xf32>, vector<7x4xf32> -> vector<7x4xf32>
    %117 = vector.extract_strided_slice %98 {offsets = [36, 0], sizes = [16, 4], strides = [1, 1]} : vector<288x4xf32> to vector<16x4xf32>
    %118 = vector.extract_strided_slice %98 {offsets = [54, 0], sizes = [16, 4], strides = [1, 1]} : vector<288x4xf32> to vector<16x4xf32>
    %119 = vector.extract_strided_slice %98 {offsets = [72, 0], sizes = [16, 4], strides = [1, 1]} : vector<288x4xf32> to vector<16x4xf32>
    %120 = arith.maximumf %117, %118 : vector<16x4xf32>
    %121 = arith.maximumf %120, %119 : vector<16x4xf32>
    %122 = vector.extract_strided_slice %121 {offsets = [0, 0], sizes = [14, 4], strides = [1, 1]} : vector<16x4xf32> to vector<14x4xf32>
    %123 = vector.extract_strided_slice %121 {offsets = [1, 0], sizes = [14, 4], strides = [1, 1]} : vector<16x4xf32> to vector<14x4xf32>
    %124 = arith.maximumf %122, %123 : vector<14x4xf32>
    %125 = vector.extract_strided_slice %121 {offsets = [2, 0], sizes = [14, 4], strides = [1, 1]} : vector<16x4xf32> to vector<14x4xf32>
    %126 = arith.maximumf %124, %125 : vector<14x4xf32>
    %cst_120 = arith.constant dense<0.000000e+00> : vector<7x4xf32>
    %127 = tpu.matmul %105, %126, %cst_120 {dimension_numbers = #tpu.dot_dimension_numbers<[1], [0], [0], [1], [0, 0, 1, 1], [], []>} : vector<7x14xf32>, vector<14x4xf32>, vector<7x4xf32> -> vector<7x4xf32>
    %128 = vector.extract_strided_slice %98 {offsets = [72, 0], sizes = [16, 4], strides = [1, 1]} : vector<288x4xf32> to vector<16x4xf32>
    %129 = vector.extract_strided_slice %98 {offsets = [90, 0], sizes = [16, 4], strides = [1, 1]} : vector<288x4xf32> to vector<16x4xf32>
    %130 = vector.extract_strided_slice %98 {offsets = [108, 0], sizes = [16, 4], strides = [1, 1]} : vector<288x4xf32> to vector<16x4xf32>
    %131 = arith.maximumf %128, %129 : vector<16x4xf32>
    %132 = arith.maximumf %131, %130 : vector<16x4xf32>
    %133 = vector.extract_strided_slice %132 {offsets = [0, 0], sizes = [14, 4], strides = [1, 1]} : vector<16x4xf32> to vector<14x4xf32>
    %134 = vector.extract_strided_slice %132 {offsets = [1, 0], sizes = [14, 4], strides = [1, 1]} : vector<16x4xf32> to vector<14x4xf32>
    %135 = arith.maximumf %133, %134 : vector<14x4xf32>
    %136 = vector.extract_strided_slice %132 {offsets = [2, 0], sizes = [14, 4], strides = [1, 1]} : vector<16x4xf32> to vector<14x4xf32>
    %137 = arith.maximumf %135, %136 : vector<14x4xf32>
    %cst_121 = arith.constant dense<0.000000e+00> : vector<7x4xf32>
    %138 = tpu.matmul %105, %137, %cst_121 {dimension_numbers = #tpu.dot_dimension_numbers<[1], [0], [0], [1], [0, 0, 1, 1], [], []>} : vector<7x14xf32>, vector<14x4xf32>, vector<7x4xf32> -> vector<7x4xf32>
    %139 = vector.extract_strided_slice %98 {offsets = [108, 0], sizes = [16, 4], strides = [1, 1]} : vector<288x4xf32> to vector<16x4xf32>
    %140 = vector.extract_strided_slice %98 {offsets = [126, 0], sizes = [16, 4], strides = [1, 1]} : vector<288x4xf32> to vector<16x4xf32>
    %141 = vector.extract_strided_slice %98 {offsets = [144, 0], sizes = [16, 4], strides = [1, 1]} : vector<288x4xf32> to vector<16x4xf32>
    %142 = arith.maximumf %139, %140 : vector<16x4xf32>
    %143 = arith.maximumf %142, %141 : vector<16x4xf32>
    %144 = vector.extract_strided_slice %143 {offsets = [0, 0], sizes = [14, 4], strides = [1, 1]} : vector<16x4xf32> to vector<14x4xf32>
    %145 = vector.extract_strided_slice %143 {offsets = [1, 0], sizes = [14, 4], strides = [1, 1]} : vector<16x4xf32> to vector<14x4xf32>
    %146 = arith.maximumf %144, %145 : vector<14x4xf32>
    %147 = vector.extract_strided_slice %143 {offsets = [2, 0], sizes = [14, 4], strides = [1, 1]} : vector<16x4xf32> to vector<14x4xf32>
    %148 = arith.maximumf %146, %147 : vector<14x4xf32>
    %cst_122 = arith.constant dense<0.000000e+00> : vector<7x4xf32>
    %149 = tpu.matmul %105, %148, %cst_122 {dimension_numbers = #tpu.dot_dimension_numbers<[1], [0], [0], [1], [0, 0, 1, 1], [], []>} : vector<7x14xf32>, vector<14x4xf32>, vector<7x4xf32> -> vector<7x4xf32>
    %150 = vector.extract_strided_slice %98 {offsets = [144, 0], sizes = [16, 4], strides = [1, 1]} : vector<288x4xf32> to vector<16x4xf32>
    %151 = vector.extract_strided_slice %98 {offsets = [162, 0], sizes = [16, 4], strides = [1, 1]} : vector<288x4xf32> to vector<16x4xf32>
    %152 = vector.extract_strided_slice %98 {offsets = [180, 0], sizes = [16, 4], strides = [1, 1]} : vector<288x4xf32> to vector<16x4xf32>
    %153 = arith.maximumf %150, %151 : vector<16x4xf32>
    %154 = arith.maximumf %153, %152 : vector<16x4xf32>
    %155 = vector.extract_strided_slice %154 {offsets = [0, 0], sizes = [14, 4], strides = [1, 1]} : vector<16x4xf32> to vector<14x4xf32>
    %156 = vector.extract_strided_slice %154 {offsets = [1, 0], sizes = [14, 4], strides = [1, 1]} : vector<16x4xf32> to vector<14x4xf32>
    %157 = arith.maximumf %155, %156 : vector<14x4xf32>
    %158 = vector.extract_strided_slice %154 {offsets = [2, 0], sizes = [14, 4], strides = [1, 1]} : vector<16x4xf32> to vector<14x4xf32>
    %159 = arith.maximumf %157, %158 : vector<14x4xf32>
    %cst_123 = arith.constant dense<0.000000e+00> : vector<7x4xf32>
    %160 = tpu.matmul %105, %159, %cst_123 {dimension_numbers = #tpu.dot_dimension_numbers<[1], [0], [0], [1], [0, 0, 1, 1], [], []>} : vector<7x14xf32>, vector<14x4xf32>, vector<7x4xf32> -> vector<7x4xf32>
    %161 = vector.extract_strided_slice %98 {offsets = [180, 0], sizes = [16, 4], strides = [1, 1]} : vector<288x4xf32> to vector<16x4xf32>
    %162 = vector.extract_strided_slice %98 {offsets = [198, 0], sizes = [16, 4], strides = [1, 1]} : vector<288x4xf32> to vector<16x4xf32>
    %163 = vector.extract_strided_slice %98 {offsets = [216, 0], sizes = [16, 4], strides = [1, 1]} : vector<288x4xf32> to vector<16x4xf32>
    %164 = arith.maximumf %161, %162 : vector<16x4xf32>
    %165 = arith.maximumf %164, %163 : vector<16x4xf32>
    %166 = vector.extract_strided_slice %165 {offsets = [0, 0], sizes = [14, 4], strides = [1, 1]} : vector<16x4xf32> to vector<14x4xf32>
    %167 = vector.extract_strided_slice %165 {offsets = [1, 0], sizes = [14, 4], strides = [1, 1]} : vector<16x4xf32> to vector<14x4xf32>
    %168 = arith.maximumf %166, %167 : vector<14x4xf32>
    %169 = vector.extract_strided_slice %165 {offsets = [2, 0], sizes = [14, 4], strides = [1, 1]} : vector<16x4xf32> to vector<14x4xf32>
    %170 = arith.maximumf %168, %169 : vector<14x4xf32>
    %cst_124 = arith.constant dense<0.000000e+00> : vector<7x4xf32>
    %171 = tpu.matmul %105, %170, %cst_124 {dimension_numbers = #tpu.dot_dimension_numbers<[1], [0], [0], [1], [0, 0, 1, 1], [], []>} : vector<7x14xf32>, vector<14x4xf32>, vector<7x4xf32> -> vector<7x4xf32>
    %172 = vector.extract_strided_slice %98 {offsets = [216, 0], sizes = [16, 4], strides = [1, 1]} : vector<288x4xf32> to vector<16x4xf32>
    %173 = vector.extract_strided_slice %98 {offsets = [234, 0], sizes = [16, 4], strides = [1, 1]} : vector<288x4xf32> to vector<16x4xf32>
    %174 = vector.extract_strided_slice %98 {offsets = [252, 0], sizes = [16, 4], strides = [1, 1]} : vector<288x4xf32> to vector<16x4xf32>
    %175 = arith.maximumf %172, %173 : vector<16x4xf32>
    %176 = arith.maximumf %175, %174 : vector<16x4xf32>
    %177 = vector.extract_strided_slice %176 {offsets = [0, 0], sizes = [14, 4], strides = [1, 1]} : vector<16x4xf32> to vector<14x4xf32>
    %178 = vector.extract_strided_slice %176 {offsets = [1, 0], sizes = [14, 4], strides = [1, 1]} : vector<16x4xf32> to vector<14x4xf32>
    %179 = arith.maximumf %177, %178 : vector<14x4xf32>
    %180 = vector.extract_strided_slice %176 {offsets = [2, 0], sizes = [14, 4], strides = [1, 1]} : vector<16x4xf32> to vector<14x4xf32>
    %181 = arith.maximumf %179, %180 : vector<14x4xf32>
    %cst_125 = arith.constant dense<0.000000e+00> : vector<7x4xf32>
    %182 = tpu.matmul %105, %181, %cst_125 {dimension_numbers = #tpu.dot_dimension_numbers<[1], [0], [0], [1], [0, 0, 1, 1], [], []>} : vector<7x14xf32>, vector<14x4xf32>, vector<7x4xf32> -> vector<7x4xf32>
    %cst_126 = arith.constant 0.000000e+00 : f32
    %183 = vector.broadcast %cst_126 : f32 to vector<90x4xf32>
    %c0_127 = arith.constant 0 : index
    %c0_128 = arith.constant 0 : index
    %184 = vector.load %arg7[%c0_127, %c0_128] : memref<342x4xf32, #tpu.memory_space<vmem>>, vector<90x4xf32>
    tpu.vector_store %arg7[%c0_127, %c0_128], %183 {strides = array<i32>} : memref<342x4xf32, #tpu.memory_space<vmem>>, vector<90x4xf32>,
    %c10_129 = arith.constant 10 : index
    %c0_130 = arith.constant 0 : index
    %185 = vector.load %arg7[%c10_129, %c0_130] : memref<342x4xf32, #tpu.memory_space<vmem>>, vector<7x4xf32>
    tpu.vector_store %arg7[%c10_129, %c0_130], %116 {strides = array<i32>} : memref<342x4xf32, #tpu.memory_space<vmem>>, vector<7x4xf32>,
    %c19_131 = arith.constant 19 : index
    %c0_132 = arith.constant 0 : index
    %186 = vector.load %arg7[%c19_131, %c0_132] : memref<342x4xf32, #tpu.memory_space<vmem>>, vector<7x4xf32>
    tpu.vector_store %arg7[%c19_131, %c0_132], %127 {strides = array<i32>} : memref<342x4xf32, #tpu.memory_space<vmem>>, vector<7x4xf32>,
    %c28 = arith.constant 28 : index
    %c0_133 = arith.constant 0 : index
    %187 = vector.load %arg7[%c28, %c0_133] : memref<342x4xf32, #tpu.memory_space<vmem>>, vector<7x4xf32>
    tpu.vector_store %arg7[%c28, %c0_133], %138 {strides = array<i32>} : memref<342x4xf32, #tpu.memory_space<vmem>>, vector<7x4xf32>,
    %c37_134 = arith.constant 37 : index
    %c0_135 = arith.constant 0 : index
    %188 = vector.load %arg7[%c37_134, %c0_135] : memref<342x4xf32, #tpu.memory_space<vmem>>, vector<7x4xf32>
    tpu.vector_store %arg7[%c37_134, %c0_135], %149 {strides = array<i32>} : memref<342x4xf32, #tpu.memory_space<vmem>>, vector<7x4xf32>,
    %c46 = arith.constant 46 : index
    %c0_136 = arith.constant 0 : index
    %189 = vector.load %arg7[%c46, %c0_136] : memref<342x4xf32, #tpu.memory_space<vmem>>, vector<7x4xf32>
    tpu.vector_store %arg7[%c46, %c0_136], %160 {strides = array<i32>} : memref<342x4xf32, #tpu.memory_space<vmem>>, vector<7x4xf32>,
    %c55_137 = arith.constant 55 : index
    %c0_138 = arith.constant 0 : index
    %190 = vector.load %arg7[%c55_137, %c0_138] : memref<342x4xf32, #tpu.memory_space<vmem>>, vector<7x4xf32>
    tpu.vector_store %arg7[%c55_137, %c0_138], %171 {strides = array<i32>} : memref<342x4xf32, #tpu.memory_space<vmem>>, vector<7x4xf32>,
    %c64 = arith.constant 64 : index
    %c0_139 = arith.constant 0 : index
    %191 = vector.load %arg7[%c64, %c0_139] : memref<342x4xf32, #tpu.memory_space<vmem>>, vector<7x4xf32>
    tpu.vector_store %arg7[%c64, %c0_139], %182 {strides = array<i32>} : memref<342x4xf32, #tpu.memory_space<vmem>>, vector<7x4xf32>,
    %cst_140 = arith.constant 0.000000e+00 : f32
    %192 = vector.broadcast %cst_140 : f32 to vector<63x4xf32>
    %c0_141 = arith.constant 0 : index
    %c0_142 = arith.constant 0 : index
    %193 = vector.load %arg7[%c0_141, %c0_142] : memref<342x4xf32, #tpu.memory_space<vmem>>, vector<63x4xf32>
    %c0_143 = arith.constant 0 : index
    %c0_144 = arith.constant 0 : index
    %c0_145 = arith.constant 0 : index
    %194 = vector.load %arg2[%c0_143, %c0_144, %c0_145] : memref<9x4x4xf32, #tpu.memory_space<vmem>>, vector<1x4x4xf32>
    %195 = vector.shape_cast %194 : vector<1x4x4xf32> to vector<4x4xf32>
    %cst_146 = arith.constant dense<0.000000e+00> : vector<63x4xf32>
    %196 = tpu.matmul %193, %195, %cst_146 {dimension_numbers = #tpu.dot_dimension_numbers<[1], [0], [0], [1], [0, 0, 1, 1], [], []>} : vector<63x4xf32>, vector<4x4xf32>, vector<63x4xf32> -> vector<63x4xf32>
    %197 = arith.addf %192, %196 : vector<63x4xf32>
    %c1_147 = arith.constant 1 : index
    %c0_148 = arith.constant 0 : index
    %198 = vector.load %arg7[%c1_147, %c0_148] : memref<342x4xf32, #tpu.memory_space<vmem>>, vector<63x4xf32>
    %c1_149 = arith.constant 1 : index
    %c0_150 = arith.constant 0 : index
    %c0_151 = arith.constant 0 : index
    %199 = vector.load %arg2[%c1_149, %c0_150, %c0_151] : memref<9x4x4xf32, #tpu.memory_space<vmem>>, vector<1x4x4xf32>
    %200 = vector.shape_cast %199 : vector<1x4x4xf32> to vector<4x4xf32>
    %cst_152 = arith.constant dense<0.000000e+00> : vector<63x4xf32>
    %201 = tpu.matmul %198, %200, %cst_152 {dimension_numbers = #tpu.dot_dimension_numbers<[1], [0], [0], [1], [0, 0, 1, 1], [], []>} : vector<63x4xf32>, vector<4x4xf32>, vector<63x4xf32> -> vector<63x4xf32>
    %202 = arith.addf %197, %201 : vector<63x4xf32>
    %c2_153 = arith.constant 2 : index
    %c0_154 = arith.constant 0 : index
    %203 = vector.load %arg7[%c2_153, %c0_154] : memref<342x4xf32, #tpu.memory_space<vmem>>, vector<63x4xf32>
    %c2_155 = arith.constant 2 : index
    %c0_156 = arith.constant 0 : index
    %c0_157 = arith.constant 0 : index
    %204 = vector.load %arg2[%c2_155, %c0_156, %c0_157] : memref<9x4x4xf32, #tpu.memory_space<vmem>>, vector<1x4x4xf32>
    %205 = vector.shape_cast %204 : vector<1x4x4xf32> to vector<4x4xf32>
    %cst_158 = arith.constant dense<0.000000e+00> : vector<63x4xf32>
    %206 = tpu.matmul %203, %205, %cst_158 {dimension_numbers = #tpu.dot_dimension_numbers<[1], [0], [0], [1], [0, 0, 1, 1], [], []>} : vector<63x4xf32>, vector<4x4xf32>, vector<63x4xf32> -> vector<63x4xf32>
    %207 = arith.addf %202, %206 : vector<63x4xf32>
    %c9_159 = arith.constant 9 : index
    %c0_160 = arith.constant 0 : index
    %208 = vector.load %arg7[%c9_159, %c0_160] : memref<342x4xf32, #tpu.memory_space<vmem>>, vector<63x4xf32>
    %c3_161 = arith.constant 3 : index
    %c0_162 = arith.constant 0 : index
    %c0_163 = arith.constant 0 : index
    %209 = vector.load %arg2[%c3_161, %c0_162, %c0_163] : memref<9x4x4xf32, #tpu.memory_space<vmem>>, vector<1x4x4xf32>
    %210 = vector.shape_cast %209 : vector<1x4x4xf32> to vector<4x4xf32>
    %cst_164 = arith.constant dense<0.000000e+00> : vector<63x4xf32>
    %211 = tpu.matmul %208, %210, %cst_164 {dimension_numbers = #tpu.dot_dimension_numbers<[1], [0], [0], [1], [0, 0, 1, 1], [], []>} : vector<63x4xf32>, vector<4x4xf32>, vector<63x4xf32> -> vector<63x4xf32>
    %212 = arith.addf %207, %211 : vector<63x4xf32>
    %c10_165 = arith.constant 10 : index
    %c0_166 = arith.constant 0 : index
    %213 = vector.load %arg7[%c10_165, %c0_166] : memref<342x4xf32, #tpu.memory_space<vmem>>, vector<63x4xf32>
    %c4_167 = arith.constant 4 : index
    %c0_168 = arith.constant 0 : index
    %c0_169 = arith.constant 0 : index
    %214 = vector.load %arg2[%c4_167, %c0_168, %c0_169] : memref<9x4x4xf32, #tpu.memory_space<vmem>>, vector<1x4x4xf32>
    %215 = vector.shape_cast %214 : vector<1x4x4xf32> to vector<4x4xf32>
    %cst_170 = arith.constant dense<0.000000e+00> : vector<63x4xf32>
    %216 = tpu.matmul %213, %215, %cst_170 {dimension_numbers = #tpu.dot_dimension_numbers<[1], [0], [0], [1], [0, 0, 1, 1], [], []>} : vector<63x4xf32>, vector<4x4xf32>, vector<63x4xf32> -> vector<63x4xf32>
    %217 = arith.addf %212, %216 : vector<63x4xf32>
    %c11_171 = arith.constant 11 : index
    %c0_172 = arith.constant 0 : index
    %218 = vector.load %arg7[%c11_171, %c0_172] : memref<342x4xf32, #tpu.memory_space<vmem>>, vector<63x4xf32>
    %c5_173 = arith.constant 5 : index
    %c0_174 = arith.constant 0 : index
    %c0_175 = arith.constant 0 : index
    %219 = vector.load %arg2[%c5_173, %c0_174, %c0_175] : memref<9x4x4xf32, #tpu.memory_space<vmem>>, vector<1x4x4xf32>
    %220 = vector.shape_cast %219 : vector<1x4x4xf32> to vector<4x4xf32>
    %cst_176 = arith.constant dense<0.000000e+00> : vector<63x4xf32>
    %221 = tpu.matmul %218, %220, %cst_176 {dimension_numbers = #tpu.dot_dimension_numbers<[1], [0], [0], [1], [0, 0, 1, 1], [], []>} : vector<63x4xf32>, vector<4x4xf32>, vector<63x4xf32> -> vector<63x4xf32>
    %222 = arith.addf %217, %221 : vector<63x4xf32>
    %c18_177 = arith.constant 18 : index
    %c0_178 = arith.constant 0 : index
    %223 = vector.load %arg7[%c18_177, %c0_178] : memref<342x4xf32, #tpu.memory_space<vmem>>, vector<63x4xf32>
    %c6_179 = arith.constant 6 : index
    %c0_180 = arith.constant 0 : index
    %c0_181 = arith.constant 0 : index
    %224 = vector.load %arg2[%c6_179, %c0_180, %c0_181] : memref<9x4x4xf32, #tpu.memory_space<vmem>>, vector<1x4x4xf32>
    %225 = vector.shape_cast %224 : vector<1x4x4xf32> to vector<4x4xf32>
    %cst_182 = arith.constant dense<0.000000e+00> : vector<63x4xf32>
    %226 = tpu.matmul %223, %225, %cst_182 {dimension_numbers = #tpu.dot_dimension_numbers<[1], [0], [0], [1], [0, 0, 1, 1], [], []>} : vector<63x4xf32>, vector<4x4xf32>, vector<63x4xf32> -> vector<63x4xf32>
    %227 = arith.addf %222, %226 : vector<63x4xf32>
    %c19_183 = arith.constant 19 : index
    %c0_184 = arith.constant 0 : index
    %228 = vector.load %arg7[%c19_183, %c0_184] : memref<342x4xf32, #tpu.memory_space<vmem>>, vector<63x4xf32>
    %c7_185 = arith.constant 7 : index
    %c0_186 = arith.constant 0 : index
    %c0_187 = arith.constant 0 : index
    %229 = vector.load %arg2[%c7_185, %c0_186, %c0_187] : memref<9x4x4xf32, #tpu.memory_space<vmem>>, vector<1x4x4xf32>
    %230 = vector.shape_cast %229 : vector<1x4x4xf32> to vector<4x4xf32>
    %cst_188 = arith.constant dense<0.000000e+00> : vector<63x4xf32>
    %231 = tpu.matmul %228, %230, %cst_188 {dimension_numbers = #tpu.dot_dimension_numbers<[1], [0], [0], [1], [0, 0, 1, 1], [], []>} : vector<63x4xf32>, vector<4x4xf32>, vector<63x4xf32> -> vector<63x4xf32>
    %232 = arith.addf %227, %231 : vector<63x4xf32>
    %c20_189 = arith.constant 20 : index
    %c0_190 = arith.constant 0 : index
    %233 = vector.load %arg7[%c20_189, %c0_190] : memref<342x4xf32, #tpu.memory_space<vmem>>, vector<63x4xf32>
    %c8_191 = arith.constant 8 : index
    %c0_192 = arith.constant 0 : index
    %c0_193 = arith.constant 0 : index
    %234 = vector.load %arg2[%c8_191, %c0_192, %c0_193] : memref<9x4x4xf32, #tpu.memory_space<vmem>>, vector<1x4x4xf32>
    %235 = vector.shape_cast %234 : vector<1x4x4xf32> to vector<4x4xf32>
    %cst_194 = arith.constant dense<0.000000e+00> : vector<63x4xf32>
    %236 = tpu.matmul %233, %235, %cst_194 {dimension_numbers = #tpu.dot_dimension_numbers<[1], [0], [0], [1], [0, 0, 1, 1], [], []>} : vector<63x4xf32>, vector<4x4xf32>, vector<63x4xf32> -> vector<63x4xf32>
    %237 = arith.addf %232, %236 : vector<63x4xf32>
    %c0_195 = arith.constant 0 : index
    %c0_196 = arith.constant 0 : index
    %238 = vector.load %arg3[%c0_195, %c0_196] : memref<1x4xf32, #tpu.memory_space<vmem>>, vector<1x4xf32>
    %239 = vector.broadcast %238 : vector<1x4xf32> to vector<63x4xf32>
    %240 = arith.addf %237, %239 : vector<63x4xf32>
    %241 = tpu.iota {dimensions = array<i32: 0>} : vector<3x5xi32>
    %242 = tpu.iota {dimensions = array<i32: 1>} : vector<3x5xi32>
    %c2_i32_197 = arith.constant 2 : i32
    %243 = vector.broadcast %c2_i32_197 : i32 to vector<3x5xi32>
    %244 = arith.muli %243, %241 : vector<3x5xi32>
    %245 = arith.cmpi eq, %242, %244 : vector<3x5xi32>
    %246 = arith.extui %245 : vector<3x5xi1> to vector<3x5xi32>
    %247 = arith.sitofp %246 : vector<3x5xi32> to vector<3x5xf32>
    %248 = vector.extract_strided_slice %240 {offsets = [0, 0], sizes = [7, 4], strides = [1, 1]} : vector<63x4xf32> to vector<7x4xf32>
    %249 = vector.extract_strided_slice %240 {offsets = [9, 0], sizes = [7, 4], strides = [1, 1]} : vector<63x4xf32> to vector<7x4xf32>
    %250 = vector.extract_strided_slice %240 {offsets = [18, 0], sizes = [7, 4], strides = [1, 1]} : vector<63x4xf32> to vector<7x4xf32>
    %251 = arith.maximumf %248, %249 : vector<7x4xf32>
    %252 = arith.maximumf %251, %250 : vector<7x4xf32>
    %253 = vector.extract_strided_slice %252 {offsets = [0, 0], sizes = [5, 4], strides = [1, 1]} : vector<7x4xf32> to vector<5x4xf32>
    %254 = vector.extract_strided_slice %252 {offsets = [1, 0], sizes = [5, 4], strides = [1, 1]} : vector<7x4xf32> to vector<5x4xf32>
    %255 = arith.maximumf %253, %254 : vector<5x4xf32>
    %256 = vector.extract_strided_slice %252 {offsets = [2, 0], sizes = [5, 4], strides = [1, 1]} : vector<7x4xf32> to vector<5x4xf32>
    %257 = arith.maximumf %255, %256 : vector<5x4xf32>
    %cst_198 = arith.constant dense<0.000000e+00> : vector<3x4xf32>
    %258 = tpu.matmul %247, %257, %cst_198 {dimension_numbers = #tpu.dot_dimension_numbers<[1], [0], [0], [1], [0, 0, 1, 1], [], []>} : vector<3x5xf32>, vector<5x4xf32>, vector<3x4xf32> -> vector<3x4xf32>
    %259 = vector.extract_strided_slice %240 {offsets = [18, 0], sizes = [7, 4], strides = [1, 1]} : vector<63x4xf32> to vector<7x4xf32>
    %260 = vector.extract_strided_slice %240 {offsets = [27, 0], sizes = [7, 4], strides = [1, 1]} : vector<63x4xf32> to vector<7x4xf32>
    %261 = vector.extract_strided_slice %240 {offsets = [36, 0], sizes = [7, 4], strides = [1, 1]} : vector<63x4xf32> to vector<7x4xf32>
    %262 = arith.maximumf %259, %260 : vector<7x4xf32>
    %263 = arith.maximumf %262, %261 : vector<7x4xf32>
    %264 = vector.extract_strided_slice %263 {offsets = [0, 0], sizes = [5, 4], strides = [1, 1]} : vector<7x4xf32> to vector<5x4xf32>
    %265 = vector.extract_strided_slice %263 {offsets = [1, 0], sizes = [5, 4], strides = [1, 1]} : vector<7x4xf32> to vector<5x4xf32>
    %266 = arith.maximumf %264, %265 : vector<5x4xf32>
    %267 = vector.extract_strided_slice %263 {offsets = [2, 0], sizes = [5, 4], strides = [1, 1]} : vector<7x4xf32> to vector<5x4xf32>
    %268 = arith.maximumf %266, %267 : vector<5x4xf32>
    %cst_199 = arith.constant dense<0.000000e+00> : vector<3x4xf32>
    %269 = tpu.matmul %247, %268, %cst_199 {dimension_numbers = #tpu.dot_dimension_numbers<[1], [0], [0], [1], [0, 0, 1, 1], [], []>} : vector<3x5xf32>, vector<5x4xf32>, vector<3x4xf32> -> vector<3x4xf32>
    %270 = vector.extract_strided_slice %240 {offsets = [36, 0], sizes = [7, 4], strides = [1, 1]} : vector<63x4xf32> to vector<7x4xf32>
    %271 = vector.extract_strided_slice %240 {offsets = [45, 0], sizes = [7, 4], strides = [1, 1]} : vector<63x4xf32> to vector<7x4xf32>
    %272 = vector.extract_strided_slice %240 {offsets = [54, 0], sizes = [7, 4], strides = [1, 1]} : vector<63x4xf32> to vector<7x4xf32>
    %273 = arith.maximumf %270, %271 : vector<7x4xf32>
    %274 = arith.maximumf %273, %272 : vector<7x4xf32>
    %275 = vector.extract_strided_slice %274 {offsets = [0, 0], sizes = [5, 4], strides = [1, 1]} : vector<7x4xf32> to vector<5x4xf32>
    %276 = vector.extract_strided_slice %274 {offsets = [1, 0], sizes = [5, 4], strides = [1, 1]} : vector<7x4xf32> to vector<5x4xf32>
    %277 = arith.maximumf %275, %276 : vector<5x4xf32>
    %278 = vector.extract_strided_slice %274 {offsets = [2, 0], sizes = [5, 4], strides = [1, 1]} : vector<7x4xf32> to vector<5x4xf32>
    %279 = arith.maximumf %277, %278 : vector<5x4xf32>
    %cst_200 = arith.constant dense<0.000000e+00> : vector<3x4xf32>
    %280 = tpu.matmul %247, %279, %cst_200 {dimension_numbers = #tpu.dot_dimension_numbers<[1], [0], [0], [1], [0, 0, 1, 1], [], []>} : vector<3x5xf32>, vector<5x4xf32>, vector<3x4xf32> -> vector<3x4xf32>
    %cst_201 = arith.constant 0.000000e+00 : f32
    %281 = vector.broadcast %cst_201 : f32 to vector<30x4xf32>
    %c0_202 = arith.constant 0 : index
    %c0_203 = arith.constant 0 : index
    %282 = vector.load %arg7[%c0_202, %c0_203] : memref<342x4xf32, #tpu.memory_space<vmem>>, vector<30x4xf32>
    tpu.vector_store %arg7[%c0_202, %c0_203], %281 {strides = array<i32>} : memref<342x4xf32, #tpu.memory_space<vmem>>, vector<30x4xf32>,
    %c6_204 = arith.constant 6 : index
    %c0_205 = arith.constant 0 : index
    %283 = vector.load %arg7[%c6_204, %c0_205] : memref<342x4xf32, #tpu.memory_space<vmem>>, vector<3x4xf32>
    tpu.vector_store %arg7[%c6_204, %c0_205], %258 {strides = array<i32>} : memref<342x4xf32, #tpu.memory_space<vmem>>, vector<3x4xf32>,
    %c11_206 = arith.constant 11 : index
    %c0_207 = arith.constant 0 : index
    %284 = vector.load %arg7[%c11_206, %c0_207] : memref<342x4xf32, #tpu.memory_space<vmem>>, vector<3x4xf32>
    tpu.vector_store %arg7[%c11_206, %c0_207], %269 {strides = array<i32>} : memref<342x4xf32, #tpu.memory_space<vmem>>, vector<3x4xf32>,
    %c16 = arith.constant 16 : index
    %c0_208 = arith.constant 0 : index
    %285 = vector.load %arg7[%c16, %c0_208] : memref<342x4xf32, #tpu.memory_space<vmem>>, vector<3x4xf32>
    tpu.vector_store %arg7[%c16, %c0_208], %280 {strides = array<i32>} : memref<342x4xf32, #tpu.memory_space<vmem>>, vector<3x4xf32>,
    %cst_209 = arith.constant 0.000000e+00 : f32
    %286 = vector.broadcast %cst_209 : f32 to vector<15x4xf32>
    %c0_210 = arith.constant 0 : index
    %c0_211 = arith.constant 0 : index
    %287 = vector.load %arg7[%c0_210, %c0_211] : memref<342x4xf32, #tpu.memory_space<vmem>>, vector<15x4xf32>
    %c0_212 = arith.constant 0 : index
    %c0_213 = arith.constant 0 : index
    %c0_214 = arith.constant 0 : index
    %288 = vector.load %arg4[%c0_212, %c0_213, %c0_214] : memref<9x4x4xf32, #tpu.memory_space<vmem>>, vector<1x4x4xf32>
    %289 = vector.shape_cast %288 : vector<1x4x4xf32> to vector<4x4xf32>
    %cst_215 = arith.constant dense<0.000000e+00> : vector<15x4xf32>
    %290 = tpu.matmul %287, %289, %cst_215 {dimension_numbers = #tpu.dot_dimension_numbers<[1], [0], [0], [1], [0, 0, 1, 1], [], []>} : vector<15x4xf32>, vector<4x4xf32>, vector<15x4xf32> -> vector<15x4xf32>
    %291 = arith.addf %286, %290 : vector<15x4xf32>
    %c1_216 = arith.constant 1 : index
    %c0_217 = arith.constant 0 : index
    %292 = vector.load %arg7[%c1_216, %c0_217] : memref<342x4xf32, #tpu.memory_space<vmem>>, vector<15x4xf32>
    %c1_218 = arith.constant 1 : index
    %c0_219 = arith.constant 0 : index
    %c0_220 = arith.constant 0 : index
    %293 = vector.load %arg4[%c1_218, %c0_219, %c0_220] : memref<9x4x4xf32, #tpu.memory_space<vmem>>, vector<1x4x4xf32>
    %294 = vector.shape_cast %293 : vector<1x4x4xf32> to vector<4x4xf32>
    %cst_221 = arith.constant dense<0.000000e+00> : vector<15x4xf32>
    %295 = tpu.matmul %292, %294, %cst_221 {dimension_numbers = #tpu.dot_dimension_numbers<[1], [0], [0], [1], [0, 0, 1, 1], [], []>} : vector<15x4xf32>, vector<4x4xf32>, vector<15x4xf32> -> vector<15x4xf32>
    %296 = arith.addf %291, %295 : vector<15x4xf32>
    %c2_222 = arith.constant 2 : index
    %c0_223 = arith.constant 0 : index
    %297 = vector.load %arg7[%c2_222, %c0_223] : memref<342x4xf32, #tpu.memory_space<vmem>>, vector<15x4xf32>
    %c2_224 = arith.constant 2 : index
    %c0_225 = arith.constant 0 : index
    %c0_226 = arith.constant 0 : index
    %298 = vector.load %arg4[%c2_224, %c0_225, %c0_226] : memref<9x4x4xf32, #tpu.memory_space<vmem>>, vector<1x4x4xf32>
    %299 = vector.shape_cast %298 : vector<1x4x4xf32> to vector<4x4xf32>
    %cst_227 = arith.constant dense<0.000000e+00> : vector<15x4xf32>
    %300 = tpu.matmul %297, %299, %cst_227 {dimension_numbers = #tpu.dot_dimension_numbers<[1], [0], [0], [1], [0, 0, 1, 1], [], []>} : vector<15x4xf32>, vector<4x4xf32>, vector<15x4xf32> -> vector<15x4xf32>
    %301 = arith.addf %296, %300 : vector<15x4xf32>
    %c5_228 = arith.constant 5 : index
    %c0_229 = arith.constant 0 : index
    %302 = vector.load %arg7[%c5_228, %c0_229] : memref<342x4xf32, #tpu.memory_space<vmem>>, vector<15x4xf32>
    %c3_230 = arith.constant 3 : index
    %c0_231 = arith.constant 0 : index
    %c0_232 = arith.constant 0 : index
    %303 = vector.load %arg4[%c3_230, %c0_231, %c0_232] : memref<9x4x4xf32, #tpu.memory_space<vmem>>, vector<1x4x4xf32>
    %304 = vector.shape_cast %303 : vector<1x4x4xf32> to vector<4x4xf32>
    %cst_233 = arith.constant dense<0.000000e+00> : vector<15x4xf32>
    %305 = tpu.matmul %302, %304, %cst_233 {dimension_numbers = #tpu.dot_dimension_numbers<[1], [0], [0], [1], [0, 0, 1, 1], [], []>} : vector<15x4xf32>, vector<4x4xf32>, vector<15x4xf32> -> vector<15x4xf32>
    %306 = arith.addf %301, %305 : vector<15x4xf32>
    %c6_234 = arith.constant 6 : index
    %c0_235 = arith.constant 0 : index
    %307 = vector.load %arg7[%c6_234, %c0_235] : memref<342x4xf32, #tpu.memory_space<vmem>>, vector<15x4xf32>
    %c4_236 = arith.constant 4 : index
    %c0_237 = arith.constant 0 : index
    %c0_238 = arith.constant 0 : index
    %308 = vector.load %arg4[%c4_236, %c0_237, %c0_238] : memref<9x4x4xf32, #tpu.memory_space<vmem>>, vector<1x4x4xf32>
    %309 = vector.shape_cast %308 : vector<1x4x4xf32> to vector<4x4xf32>
    %cst_239 = arith.constant dense<0.000000e+00> : vector<15x4xf32>
    %310 = tpu.matmul %307, %309, %cst_239 {dimension_numbers = #tpu.dot_dimension_numbers<[1], [0], [0], [1], [0, 0, 1, 1], [], []>} : vector<15x4xf32>, vector<4x4xf32>, vector<15x4xf32> -> vector<15x4xf32>
    %311 = arith.addf %306, %310 : vector<15x4xf32>
    %c7_240 = arith.constant 7 : index
    %c0_241 = arith.constant 0 : index
    %312 = vector.load %arg7[%c7_240, %c0_241] : memref<342x4xf32, #tpu.memory_space<vmem>>, vector<15x4xf32>
    %c5_242 = arith.constant 5 : index
    %c0_243 = arith.constant 0 : index
    %c0_244 = arith.constant 0 : index
    %313 = vector.load %arg4[%c5_242, %c0_243, %c0_244] : memref<9x4x4xf32, #tpu.memory_space<vmem>>, vector<1x4x4xf32>
    %314 = vector.shape_cast %313 : vector<1x4x4xf32> to vector<4x4xf32>
    %cst_245 = arith.constant dense<0.000000e+00> : vector<15x4xf32>
    %315 = tpu.matmul %312, %314, %cst_245 {dimension_numbers = #tpu.dot_dimension_numbers<[1], [0], [0], [1], [0, 0, 1, 1], [], []>} : vector<15x4xf32>, vector<4x4xf32>, vector<15x4xf32> -> vector<15x4xf32>
    %316 = arith.addf %311, %315 : vector<15x4xf32>
    %c10_246 = arith.constant 10 : index
    %c0_247 = arith.constant 0 : index
    %317 = vector.load %arg7[%c10_246, %c0_247] : memref<342x4xf32, #tpu.memory_space<vmem>>, vector<15x4xf32>
    %c6_248 = arith.constant 6 : index
    %c0_249 = arith.constant 0 : index
    %c0_250 = arith.constant 0 : index
    %318 = vector.load %arg4[%c6_248, %c0_249, %c0_250] : memref<9x4x4xf32, #tpu.memory_space<vmem>>, vector<1x4x4xf32>
    %319 = vector.shape_cast %318 : vector<1x4x4xf32> to vector<4x4xf32>
    %cst_251 = arith.constant dense<0.000000e+00> : vector<15x4xf32>
    %320 = tpu.matmul %317, %319, %cst_251 {dimension_numbers = #tpu.dot_dimension_numbers<[1], [0], [0], [1], [0, 0, 1, 1], [], []>} : vector<15x4xf32>, vector<4x4xf32>, vector<15x4xf32> -> vector<15x4xf32>
    %321 = arith.addf %316, %320 : vector<15x4xf32>
    %c11_252 = arith.constant 11 : index
    %c0_253 = arith.constant 0 : index
    %322 = vector.load %arg7[%c11_252, %c0_253] : memref<342x4xf32, #tpu.memory_space<vmem>>, vector<15x4xf32>
    %c7_254 = arith.constant 7 : index
    %c0_255 = arith.constant 0 : index
    %c0_256 = arith.constant 0 : index
    %323 = vector.load %arg4[%c7_254, %c0_255, %c0_256] : memref<9x4x4xf32, #tpu.memory_space<vmem>>, vector<1x4x4xf32>
    %324 = vector.shape_cast %323 : vector<1x4x4xf32> to vector<4x4xf32>
    %cst_257 = arith.constant dense<0.000000e+00> : vector<15x4xf32>
    %325 = tpu.matmul %322, %324, %cst_257 {dimension_numbers = #tpu.dot_dimension_numbers<[1], [0], [0], [1], [0, 0, 1, 1], [], []>} : vector<15x4xf32>, vector<4x4xf32>, vector<15x4xf32> -> vector<15x4xf32>
    %326 = arith.addf %321, %325 : vector<15x4xf32>
    %c12_258 = arith.constant 12 : index
    %c0_259 = arith.constant 0 : index
    %327 = vector.load %arg7[%c12_258, %c0_259] : memref<342x4xf32, #tpu.memory_space<vmem>>, vector<15x4xf32>
    %c8_260 = arith.constant 8 : index
    %c0_261 = arith.constant 0 : index
    %c0_262 = arith.constant 0 : index
    %328 = vector.load %arg4[%c8_260, %c0_261, %c0_262] : memref<9x4x4xf32, #tpu.memory_space<vmem>>, vector<1x4x4xf32>
    %329 = vector.shape_cast %328 : vector<1x4x4xf32> to vector<4x4xf32>
    %cst_263 = arith.constant dense<0.000000e+00> : vector<15x4xf32>
    %330 = tpu.matmul %327, %329, %cst_263 {dimension_numbers = #tpu.dot_dimension_numbers<[1], [0], [0], [1], [0, 0, 1, 1], [], []>} : vector<15x4xf32>, vector<4x4xf32>, vector<15x4xf32> -> vector<15x4xf32>
    %331 = arith.addf %326, %330 : vector<15x4xf32>
    %c0_264 = arith.constant 0 : index
    %c0_265 = arith.constant 0 : index
    %332 = vector.load %arg5[%c0_264, %c0_265] : memref<1x4xf32, #tpu.memory_space<vmem>>, vector<1x4xf32>
    %333 = vector.broadcast %332 : vector<1x4xf32> to vector<15x4xf32>
    %334 = arith.addf %331, %333 : vector<15x4xf32>
    %335 = vector.extract_strided_slice %334 {offsets = [0, 0], sizes = [3, 4], strides = [1, 1]} : vector<15x4xf32> to vector<3x4xf32>
    %336 = vector.extract_strided_slice %334 {offsets = [5, 0], sizes = [3, 4], strides = [1, 1]} : vector<15x4xf32> to vector<3x4xf32>
    %337 = vector.extract_strided_slice %334 {offsets = [10, 0], sizes = [3, 4], strides = [1, 1]} : vector<15x4xf32> to vector<3x4xf32>
    %338 = arith.maximumf %335, %336 : vector<3x4xf32>
    %339 = arith.maximumf %338, %337 : vector<3x4xf32>
    %340 = vector.extract_strided_slice %339 {offsets = [0, 0], sizes = [1, 4], strides = [1, 1]} : vector<3x4xf32> to vector<1x4xf32>
    %341 = vector.extract_strided_slice %339 {offsets = [1, 0], sizes = [1, 4], strides = [1, 1]} : vector<3x4xf32> to vector<1x4xf32>
    %342 = arith.maximumf %340, %341 : vector<1x4xf32>
    %343 = vector.extract_strided_slice %339 {offsets = [2, 0], sizes = [1, 4], strides = [1, 1]} : vector<3x4xf32> to vector<1x4xf32>
    %344 = arith.maximumf %342, %343 : vector<1x4xf32>
    %c0_266 = arith.constant 0 : index
    %c0_267 = arith.constant 0 : index
    %c0_268 = arith.constant 0 : index
    %345 = vector.load %arg6[%c0_266, %c0_267, %c0_268] : memref<1x1x4xf32, #tpu.memory_space<vmem>>, vector<1x1x4xf32>
    %346 = vector.shape_cast %345 : vector<1x1x4xf32> to vector<1x4xf32>
    %347 = vector.shape_cast %344 : vector<1x4xf32> to vector<1x1x4xf32>
    tpu.vector_store %arg6[%c0_266, %c0_267, %c0_268], %347 {strides = array<i32>} : memref<1x1x4xf32, #tpu.memory_space<vmem>>, vector<1x1x4xf32>,
    return
  }
  func.func @transform_0(%arg0: i32) -> (i32, i32, i32, i32) {
    %c0_i32 = arith.constant 0 : i32
    %c0_i32_0 = arith.constant 0 : i32
    %c0_i32_1 = arith.constant 0 : i32
    %c0_i32_2 = arith.constant 0 : i32
    return %arg0, %c0_i32, %c0_i32_0, %c0_i32_1 : i32, i32, i32, i32
  }
  func.func @transform_1(%arg0: i32) -> (i32, i32, i32) {
    %c0_i32 = arith.constant 0 : i32
    %c0_i32_0 = arith.constant 0 : i32
    %c0_i32_1 = arith.constant 0 : i32
    %c0_i32_2 = arith.constant 0 : i32
    return %c0_i32, %c0_i32_0, %c0_i32_1 : i32, i32, i32
  }
  func.func @transform_2(%arg0: i32) -> (i32, i32) {
    %c0_i32 = arith.constant 0 : i32
    %c0_i32_0 = arith.constant 0 : i32
    %c0_i32_1 = arith.constant 0 : i32
    return %c0_i32, %c0_i32_0 : i32, i32
  }
  func.func @transform_3(%arg0: i32) -> (i32, i32, i32) {
    %c0_i32 = arith.constant 0 : i32
    %c0_i32_0 = arith.constant 0 : i32
    %c0_i32_1 = arith.constant 0 : i32
    %c0_i32_2 = arith.constant 0 : i32
    return %c0_i32, %c0_i32_0, %c0_i32_1 : i32, i32, i32
  }
  func.func @transform_4(%arg0: i32) -> (i32, i32) {
    %c0_i32 = arith.constant 0 : i32
    %c0_i32_0 = arith.constant 0 : i32
    %c0_i32_1 = arith.constant 0 : i32
    return %c0_i32, %c0_i32_0 : i32, i32
  }
  func.func @transform_5(%arg0: i32) -> (i32, i32, i32) {
    %c0_i32 = arith.constant 0 : i32
    %c0_i32_0 = arith.constant 0 : i32
    %c0_i32_1 = arith.constant 0 : i32
    return %arg0, %c0_i32, %c0_i32_0 : i32, i32, i32
  }
}

</mosaic_0001>

<bundles_post_ra>
// kernel: tpu_custom_call.1
= control target key start
LH: loop header
LB: loop body
LE: loop exit
PB: predicated region body
PF: predicated region fallthrough
CT: control target
= control target key end

     0   :  { %10 = vsyncpa [#allocation4], 0  ;;  %s11379_s0 = inlined_call_operand.vmem [shape: f32[2,16,16,4], index: 0, kind: input, shape index: {}]   ;;  %s11380_s1 = inlined_call_operand.vmem [shape: f32[9,4,4], index: 1, kind: input, shape index: {}]   ;;  %s11381_s2 = inlined_call_operand.vmem [shape: f32[1,4], index: 2, kind: input, shape index: {}]   ;;  %s11382_s3 = inlined_call_operand.vmem [shape: f32[9,4,4], index: 3, kind: input, shape index: {}]   ;;  %s11383_s4 = inlined_call_operand.vmem [shape: f32[1,4], index: 4, kind: input, shape index: {}]   ;;  %s11384_s5 = inlined_call_operand.hbm [shape: f32[2,1,4], index: 5, kind: output, shape index: {}]  }
   0x1   :  { %12 = vsyncpa [#allocation4 + $0x1], 0  ;;  %s9835_s18 = smov 0   ;;  %s9837_s19 = smov 0  }
   0x2   :  { %s9839_s20 = smov 0   ;;  %s9841_s21 = smov 0  }
   0x3 LB: > { %s9856_s22 = sadd.s32 4294967295, %s9798_s21   ;;  %s7577_s23 = sadd.s32 4294967294, %s9798_s21   ;;  %s9798_s21 = sphi %s9841_s21, %s11392_s21   ;;  %s9794_s20 = sphi %s9839_s20, %s11391_s20   ;;  %s9790_s19 = sphi %s9837_s19, %s11390_s19   ;;  %s9786_s18 = sphi %s9835_s18, %s11389_s18  }
   0x4   : > { %s9860_s24 = sadd.s32 1, %s9798_s21   ;;  %s135_s25 = sadd.s32 1, %s9794_s20 }
   0x5   : > { %s132_s26 = ssub.s32 %s9798_s21, %s9860_s24  ;;  %p145_p0 = scmp.ne.s32.totalorder %s9794_s20, %s9790_s19 }
   0x6   : > { %p133_p1 = scmp.eq.s32.totalorder %s132_s26, 0  ;;  %p146_p2 = scmp.eq.s32.totalorder %s9856_s22, 1 }
   0x7   : > { %p151_p3 = scmp.ne.s32.totalorder %s9790_s19, %s9786_s18  ;;  %p152_p4 = scmp.eq.s32.totalorder %s7577_s23, 1 }
   0x8   : > { %s9871_s27 = scalar_select %p133_p1, %s9794_s20, %s135_s25  }
   0x9   : > { %p9873_p5 = por %p146_p2, %p145_p0  ;;  %p9877_p6 = por %p152_p4, %p151_p3 }
   0xa   : > { %p7580_p7 = scmp.ge.s32.totalorder %s9798_s21, 1  ;;  %p190_p8 = scmp.lt.s32.totalorder %s9798_s21, 3 }
   0xc   : > { %p191_p9 = pnand %p7580_p7, %p190_p8 }
   0xd   : > { %vm529_vm0 = vcmask (!%p191_p9), 1043456   ;;  %v7726_v0 = vld [vmem:[%s11380_s1 + $0xc] sm:$0xf] (!%p191_p9)  ;;  %p217_p10 = scmp.lt.s32.totalorder (!%p191_p9), %s9856_s22, 1  ;;  %vm269_vm1 = vcmask (!%p191_p9), 31744   ;;  %v9800_v1 = vmov (!%p191_p9), 0.0  }
   0xe   : > { %194 = sbr.rel (%p191_p9) target bundleno = 1803 (0x70b), region = 40  ;;  %8742 = vmatprep.subr.msk.mxu0 (!%p191_p9), %vm529_vm0, %v7726_v0  ;;  %272 = vst.msk [vmem:[#allocation2 + $0x10] sm:$0xff] (!%p191_p9), %vm269_vm1, %v9800_v1  ;;  %273 = vst.msk [vmem:[#allocation2 + $0x18] sm:$0xff] (!%p191_p9), %vm269_vm1, %v9800_v1  ;;  %v9973_v2 = vld [vmem:[%s11380_s1 + $0x10] sm:$0xf] (!%p191_p9)  ;;  %vm5016_vm2 = vcmask (!%p191_p9), 25600  }
   0xf   : > { %270 = vst.msk [vmem:[#allocation2] sm:$0xff] (!%p191_p9), %vm269_vm1, %v9800_v1  ;;  %271 = vst.msk [vmem:[#allocation2 + $0x8] sm:$0xff] (!%p191_p9), %vm269_vm1, %v9800_v1  ;;  %v7613_v3 = vld [vmem:[%s11380_s1 + $0x4] sm:$0xf] (!%p191_p9)  ;;  %8743 = vmatpush3.msk.msra.mxu0 (!%p191_p9), %vm529_vm0, %v7726_v0  ;;  %v10050_v31 = vld [vmem:[%s11380_s1 + $0x14] sm:$0xf] (!%p191_p9) }
  0x10   : > { %274 = vst.msk [vmem:[#allocation2 + $0x20] sm:$0xff] (!%p191_p9), %vm269_vm1, %v9800_v1  ;;  %275 = vst.msk [vmem:[#allocation2 + $0x28] sm:$0xff] (!%p191_p9), %vm269_vm1, %v9800_v1  ;;  %8574 = vmatprep.subr.msk.mxu1 (!%p191_p9), %vm529_vm0, %v7613_v3  ;;  %8798 = vmatprep.subr.msk.mxu0 (!%p191_p9), %vm529_vm0, %v9973_v2  ;;  %vm9802_vm3 = vmmov (!%p191_p9), 0   ;;  %vm4164_vm4 = vcmask (!%p191_p9), 1045504   ;;  %vm4187_vm6 = vcmask (!%p191_p9), 1046528   ;;  %vm4202_vm7 = vcmask (!%p191_p9), 113664  }
  0x11   : > { %276 = vst.msk [vmem:[#allocation2 + $0x30] sm:$0xff] (!%p191_p9), %vm269_vm1, %v9800_v1  ;;  %277 = vst.msk [vmem:[#allocation2 + $0x38] sm:$0xff] (!%p191_p9), %vm269_vm1, %v9800_v1  ;;  %8575 = vmatpush3.msk.msra.mxu1 (!%p191_p9), %vm529_vm0, %v7613_v3  ;;  %vm9803_vm8 = vmmov (!%p191_p9), 1   ;;  %vm5018_vm10 = vcmask (!%p191_p9), 30720   ;;  %vm6387_vm11 = vcmask (!%p191_p9), 1044480   ;;  %vm6384_vm12 = vcmask (!%p191_p9), 39936  }
  0x12   : > { %278 = vst.msk [vmem:[#allocation2 + $0x40] sm:$0xff] (!%p191_p9), %vm269_vm1, %v9800_v1  ;;  %279 = vst.msk [vmem:[#allocation2 + $0x48] sm:$0xff] (!%p191_p9), %vm269_vm1, %v9800_v1  ;;  %vm312_vm13 = vcmask (!%p191_p9), 29696   ;;  %vm6674_vm14 = vcmask (!%p191_p9), 26624   ;;  %s215_s6 = sand.u32 (!%p191_p9), 1, %s9790_s19   ;;  %s8102_s7 = sshll.u32 (!%p191_p9), %s9856_s22, 4 }
  0x13   : > { %280 = vst.msk [vmem:[#allocation2 + $0x50] sm:$0xff] (!%p191_p9), %vm269_vm1, %v9800_v1  ;;  %281 = vst.msk [vmem:[#allocation2 + $0x58] sm:$0xff] (!%p191_p9), %vm269_vm1, %v9800_v1  ;;  %s216_s8 = scalar_lea.vmem (!%p191_p9), [#allocation3], %s215_s6  ;;  %vm7507_vm15 = vcmask (!%p191_p9), 24576   ;;  %s7510_s13 = scalar_lea.sflag (!%p191_p9), [#allocation4], %s215_s6 }
  0x14   : > { %282 = vst.msk [vmem:[#allocation2 + $0x60] sm:$0xff] (!%p191_p9), %vm269_vm1, %v9800_v1  ;;  %283 = vst.msk [vmem:[#allocation2 + $0x68] sm:$0xff] (!%p191_p9), %vm269_vm1, %v9800_v1  ;;  %s7522_s9 = sshll.u32 (!%p191_p9), %s216_s8, 4  ;;  %s11339_s9 = int_to_ptr.vmem [resolvable:$true] %s7522_s9 }
  0x15   : > { %284 = vst.msk [vmem:[#allocation2 + $0x70] sm:$0xff] %vm269_vm1, %v9800_v1  ;;  %285 = vst.msk [vmem:[#allocation2 + $0x78] sm:$0xff] %vm269_vm1, %v9800_v1  ;;  %s218_s11 = scalar_select %p217_p10, %s9856_s22, 1 }
  0x16   : > { %286 = vst.msk [vmem:[#allocation2 + $0x80] sm:$0xff] %vm269_vm1, %v9800_v1  ;;  %287 = vst.msk [vmem:[#allocation2 + $0x88] sm:$0xff] %vm269_vm1, %v9800_v1  ;;  %v383_v45 = vld [vmem:[#allocation2 + $0x1] sm:$0xff]  ;;  %v384_v47 = vld [vmem:[#allocation2 + $0x9] sm:$0xff]  ;;  %s9736_s14 = scalar_lea.vmem %s11339_s9, 16  ;;  %s9804_s22 = smov [#allocation3]  }
  0x17   : > { %288 = vst.msk [vmem:[#allocation2 + $0x90] sm:$0xff] %vm269_vm1, %v9800_v1  ;;  %289 = vst.msk [vmem:[#allocation2 + $0x98] sm:$0xff] %vm269_vm1, %v9800_v1  ;;  %s8105_s12 = sshll.u32 %s218_s11, 8  ;;  %8576 = vmatprep.mubr.msk.f32.mxu1 %vm269_vm1, %v383_v45  ;;  %p9737_p11 = scmp.ne.s32.totalorder %s11339_s9, %s9736_s14 }
  0x18   : > { %290 = vst.msk [vmem:[#allocation2 + $0xa0] sm:$0xff] %vm269_vm1, %v9800_v1  ;;  %291 = vst.msk [vmem:[#allocation2 + $0xa8] sm:$0xff] %vm269_vm1, %v9800_v1  ;;  %s9989_s15 = scalar_lea.vmem %s11379_s0, %s8105_s12  ;;  %8577 = vmatmul.mubr.msk.f32.vlgmr.msra.gmra.mrb[0].mxu1 %vm269_vm1, %v384_v47  ;;  %s11337_s12 = scalar_lea.hbm %s11384_s5, %s8102_s7 }
  0x19   : > { %292 = vst.msk [vmem:[#allocation2 + $0xb0] sm:$0xff] %vm269_vm1, %v9800_v1  ;;  %293 = vst.msk [vmem:[#allocation2 + $0xb8] sm:$0xff] %vm269_vm1, %v9800_v1  ;;  %v222_v4 = vld [vmem:[%s9989_s15] sm:$0xff]  ;;  %v223_v5 = vld [vmem:[%s9989_s15 + $0x8] sm:$0xff]  ;;  %p9738_p12 = pnand %p9737_p11, %p9873_p5 }
  0x1a   : > { %294 = vst.msk [vmem:[#allocation2 + $0xc0] sm:$0xff] %vm269_vm1, %v9800_v1  ;;  %295 = vst.msk [vmem:[#allocation2 + $0xc8] sm:$0xff] %vm269_vm1, %v9800_v1  ;;  %v7583_v6 = vld [vmem:[%s9989_s15 + $0x10] sm:$0xff]  ;;  %v7584_v7 = vld [vmem:[%s9989_s15 + $0x18] sm:$0xff] }
  0x1b   : > { %296 = vst.msk [vmem:[#allocation2 + $0xd0] sm:$0xff] %vm269_vm1, %v9800_v1  ;;  %297 = vst.msk [vmem:[#allocation2 + $0xd8] sm:$0xff] %vm269_vm1, %v9800_v1  ;;  %v7585_v8 = vld [vmem:[%s9989_s15 + $0x20] sm:$0xff]  ;;  %v7586_v9 = vld [vmem:[%s9989_s15 + $0x28] sm:$0xff]  ;;  %p9739_p13 = pneg %p9738_p12 }
  0x1c   : > { %298 = vst.msk [vmem:[#allocation2 + $0xe0] sm:$0xff] %vm269_vm1, %v9800_v1  ;;  %299 = vst.msk [vmem:[#allocation2 + $0xe8] sm:$0xff] %vm269_vm1, %v9800_v1  ;;  %v7587_v10 = vld [vmem:[%s9989_s15 + $0x30] sm:$0xff]  ;;  %v7588_v11 = vld [vmem:[%s9989_s15 + $0x38] sm:$0xff] }
  0x1d   : > { %300 = vst.msk [vmem:[#allocation2 + $0xf0] sm:$0xff] %vm269_vm1, %v9800_v1  ;;  %301 = vst.msk [vmem:[#allocation2 + $0xf8] sm:$0xff] %vm269_vm1, %v9800_v1  ;;  %v7589_v12 = vld [vmem:[%s9989_s15 + $0x40] sm:$0xff]  ;;  %v7590_v13 = vld [vmem:[%s9989_s15 + $0x48] sm:$0xff] }
  0x1e   : > { %302 = vst.msk [vmem:[#allocation2 + $0x100] sm:$0xff] %vm269_vm1, %v9800_v1  ;;  %303 = vst.msk [vmem:[#allocation2 + $0x108] sm:$0xff] %vm269_vm1, %v9800_v1  ;;  %v7591_v14 = vld [vmem:[%s9989_s15 + $0x50] sm:$0xff]  ;;  %v7592_v15 = vld [vmem:[%s9989_s15 + $0x58] sm:$0xff] }
  0x1f   : > { %304 = vst.msk [vmem:[#allocation2 + $0x110] sm:$0xff] %vm269_vm1, %v9800_v1  ;;  %305 = vst.msk [vmem:[#allocation2 + $0x118] sm:$0xff] %vm269_vm1, %v9800_v1  ;;  %v7593_v16 = vld [vmem:[%s9989_s15 + $0x60] sm:$0xff]  ;;  %v7594_v17 = vld [vmem:[%s9989_s15 + $0x68] sm:$0xff] }
  0x20   : > { %306 = vst.msk [vmem:[#allocation2 + $0x120] sm:$0xff] %vm269_vm1, %v9800_v1  ;;  %307 = vst.msk [vmem:[#allocation2 + $0x128] sm:$0xff] %vm269_vm1, %v9800_v1  ;;  %v7595_v18 = vld [vmem:[%s9989_s15 + $0x70] sm:$0xff]  ;;  %v7596_v19 = vld [vmem:[%s9989_s15 + $0x78] sm:$0xff] }
  0x21   : > { %308 = vst.msk [vmem:[#allocation2 + $0x130] sm:$0xff] %vm269_vm1, %v9800_v1  ;;  %309 = vst.msk [vmem:[#allocation2 + $0x138] sm:$0xff] %vm269_vm1, %v9800_v1  ;;  %v7597_v20 = vld [vmem:[%s9989_s15 + $0x80] sm:$0xff]  ;;  %v7598_v21 = vld [vmem:[%s9989_s15 + $0x88] sm:$0xff] }
  0x22   : > { %310 = vst.msk [vmem:[#allocation2 + $0x140] sm:$0xff] %vm269_vm1, %v9800_v1  ;;  %314 = vst.msk [vmem:[#allocation2 + $0x13] sm:$0xff] %vm269_vm1, %v222_v4  ;;  %v7599_v22 = vld [vmem:[%s9989_s15 + $0x90] sm:$0xff]  ;;  %v7600_v23 = vld [vmem:[%s9989_s15 + $0x98] sm:$0xff] }
  0x23   : > { %315 = vst.msk [vmem:[#allocation2 + $0x1b] sm:$0xff] %vm269_vm1, %v223_v5  ;;  %316 = vst.msk [vmem:[#allocation2 + $0x25] sm:$0xff] %vm269_vm1, %v7583_v6  ;;  %v7601_v24 = vld [vmem:[%s9989_s15 + $0xa0] sm:$0xff]  ;;  %v7602_v25 = vld [vmem:[%s9989_s15 + $0xa8] sm:$0xff] }
  0x24   : > { %317 = vst.msk [vmem:[#allocation2 + $0x2d] sm:$0xff] %vm269_vm1, %v7584_v7  ;;  %318 = vst.msk [vmem:[#allocation2 + $0x37] sm:$0xff] %vm269_vm1, %v7585_v8  ;;  %v7603_v26 = vld [vmem:[%s9989_s15 + $0xb0] sm:$0xff]  ;;  %v7604_v27 = vld [vmem:[%s9989_s15 + $0xb8] sm:$0xff] }
  0x25   : > { %319 = vst.msk [vmem:[#allocation2 + $0x3f] sm:$0xff] %vm269_vm1, %v7586_v9  ;;  %320 = vst.msk [vmem:[#allocation2 + $0x49] sm:$0xff] %vm269_vm1, %v7587_v10  ;;  %v7605_v37 = vld [vmem:[%s9989_s15 + $0xc0] sm:$0xff]  ;;  %v7606_v38 = vld [vmem:[%s9989_s15 + $0xc8] sm:$0xff] }
  0x26   : > { %321 = vst.msk [vmem:[#allocation2 + $0x51] sm:$0xff] %vm269_vm1, %v7588_v11  ;;  %322 = vst.msk [vmem:[#allocation2 + $0x5b] sm:$0xff] %vm269_vm1, %v7589_v12  ;;  %v7607_v39 = vld [vmem:[%s9989_s15 + $0xd0] sm:$0xff]  ;;  %v7608_v40 = vld [vmem:[%s9989_s15 + $0xd8] sm:$0xff] }
  0x27   : > { %323 = vst.msk [vmem:[#allocation2 + $0x63] sm:$0xff] %vm269_vm1, %v7590_v13  ;;  %324 = vst.msk [vmem:[#allocation2 + $0x6d] sm:$0xff] %vm269_vm1, %v7591_v14  ;;  %v7609_v41 = vld [vmem:[%s9989_s15 + $0xe0] sm:$0xff]  ;;  %v7610_v42 = vld [vmem:[%s9989_s15 + $0xe8] sm:$0xff] }
  0x28   : > { %325 = vst.msk [vmem:[#allocation2 + $0x75] sm:$0xff] %vm269_vm1, %v7592_v15  ;;  %326 = vst.msk [vmem:[#allocation2 + $0x7f] sm:$0xff] %vm269_vm1, %v7593_v16  ;;  %v7611_v43 = vld [vmem:[%s9989_s15 + $0xf0] sm:$0xff]  ;;  %v7612_v44 = vld [vmem:[%s9989_s15 + $0xf8] sm:$0xff]  ;;  %s9740_s15 = sshll.u32 %s9804_s22, 4  ;;  %s9741_s15 = int_to_ptr.vmem [resolvable:$false] %s9740_s15 }
  0x29   : > { %327 = vst.msk [vmem:[#allocation2 + $0x87] sm:$0xff] %vm269_vm1, %v7594_v17  ;;  %328 = vst.msk [vmem:[#allocation2 + $0x91] sm:$0xff] %vm269_vm1, %v7595_v18  ;;  %v10036_v28 = vld [vmem:[#allocation2 + $0x12] sm:$0xff]  ;;  %v382_v13 = vld [vmem:[%s11380_s1] sm:$0xf]  ;;  %s9742_s16 = scalar_lea.vmem %s9741_s15, 32  ;;  %p9743_p0 = scmp.lt.s32.totalorder %s11339_s9, %s9741_s15 }
  0x2a   : > { %329 = vst.msk [vmem:[#allocation2 + $0x99] sm:$0xff] %vm269_vm1, %v7596_v19  ;;  %330 = vst.msk [vmem:[#allocation2 + $0xa3] sm:$0xff] %vm269_vm1, %v7597_v20  ;;  %v10038_v29 = vld [vmem:[#allocation2 + $0x1a] sm:$0xff]  ;;  %v10040_v30 = vld [vmem:[#allocation2 + $0x22] sm:$0xff]  ;;  %8744 = vmatprep.mubr.msk.f32.mxu0 %vm269_vm1, %v10036_v28  ;;  %8630 = vmatprep.subr.msk.mxu1 %vm529_vm0, %v382_v13  ;;  %p9744_p1 = scmp.lt.s32.totalorder %s9742_s16, %s9736_s14 }
  0x2b   : > { %331 = vst.msk [vmem:[#allocation2 + $0xab] sm:$0xff] %vm269_vm1, %v7598_v21  ;;  %332 = vst.msk [vmem:[#allocation2 + $0xb5] sm:$0xff] %vm269_vm1, %v7599_v22  ;;  %8745 = vmatmul.mubr.msk.f32.vlgmr.msra.gmra.mrb[0].mxu0 %vm269_vm1, %v10038_v29  ;;  %v10056_v32 = vld [vmem:[#allocation2 + $0x2a] sm:$0xff]  ;;  %v10060_v33 = vld [vmem:[#allocation2 + $0x32] sm:$0xff]  ;;  %8631 = vmatpush3.msk.msra.mxu1 %vm529_vm0, %v382_v13 }
  0x2c   : > { %333 = vst.msk [vmem:[#allocation2 + $0xbd] sm:$0xff] %vm269_vm1, %v7600_v23  ;;  %334 = vst.msk [vmem:[#allocation2 + $0xc7] sm:$0xff] %vm269_vm1, %v7601_v24  ;;  %8747 = vmatprep.mubr.msk.f32.mxu0 %vm269_vm1, %v10040_v30  ;;  %8799 = vmatpush3.msk.msra.mxu0 %vm529_vm0, %v9973_v2  ;;  %v10068_v34 = vld [vmem:[#allocation2 + $0x3a] sm:$0xff]  ;;  %v10070_v35 = vld [vmem:[#allocation2 + $0x42] sm:$0xff]  ;;  %p9745_p2 = por %p9744_p1, %p9743_p0 }
  0x2d   : > { %335 = vst.msk [vmem:[#allocation2 + $0xcf] sm:$0xff] %vm269_vm1, %v7602_v25  ;;  %336 = vst.msk [vmem:[#allocation2 + $0xd9] sm:$0xff] %vm269_vm1, %v7603_v26  ;;  %8854 = vmatprep.subr.msk.mxu0 %vm529_vm0, %v10050_v31  ;;  %v10072_v36 = vld [vmem:[#allocation2 + $0x4a] sm:$0xff]  ;;  %v10092_v46 = vld [vmem:[#allocation2 + $0x52] sm:$0xff] }
  0x2e   : > { %337 = vst.msk [vmem:[#allocation2 + $0xe1] sm:$0xff] %vm269_vm1, %v7604_v27  ;;  %338 = vst.msk [vmem:[#allocation2 + $0xeb] sm:$0xff] %vm269_vm1, %v7605_v37  ;;  %v385_v48 = vld [vmem:[#allocation2 + $0x11] sm:$0xff]  ;;  %v386_v49 = vld [vmem:[#allocation2 + $0x19] sm:$0xff]  ;;  %p9746_p3 = pnand %p9745_p2, %p9739_p13 }
  0x2f   : > { %8748 = vmatmul.mubr.msk.f32.gmra.mrb[2].mxu0 %vm269_vm1, %v10056_v32  ;;  %339 = vst.msk [vmem:[#allocation2 + $0xf3] sm:$0xff] %vm269_vm1, %v7606_v38  ;;  %340 = vst.msk [vmem:[#allocation2 + $0xfd] sm:$0xff] %vm269_vm1, %v7607_v39  ;;  %8579 = vmatprep.mubr.msk.f32.mxu1 %vm269_vm1, %v385_v48  ;;  %v10103_v50 = vld [vmem:[#allocation2 + $0x5a] sm:$0xff]  ;;  %v10105_v52 = vld [vmem:[#allocation2 + $0x62] sm:$0xff] }
  0x30   : > { %8750 = vmatprep.mubr.msk.f32.mxu0 %vm269_vm1, %v10060_v33  ;;  %341 = vst.msk [vmem:[#allocation2 + $0x105] sm:$0xff] %vm269_vm1, %v7608_v40  ;;  %342 = vst.msk [vmem:[#allocation2 + $0x10f] sm:$0xff] %vm269_vm1, %v7609_v41  ;;  %v387_v51 = vld [vmem:[#allocation2 + $0x21] sm:$0xff]  ;;  %8580 = vmatmul.mubr.msk.f32.gmra.mrb[2].mxu1 %vm269_vm1, %v386_v49  ;;  %v388_v53 = vld [vmem:[#allocation2 + $0x29] sm:$0xff] }
  0x31   : > { %343 = vst.msk [vmem:[#allocation2 + $0x117] sm:$0xff] %vm269_vm1, %v7610_v42  ;;  %344 = vst.msk [vmem:[#allocation2 + $0x121] sm:$0xff] %vm269_vm1, %v7611_v43  ;;  %8582 = vmatprep.mubr.msk.f32.mxu1 %vm269_vm1, %v387_v51  ;;  %v10113_v54 = vld [vmem:[#allocation2 + $0x6a] sm:$0xff]  ;;  %v10115_v56 = vld [vmem:[#allocation2 + $0x72] sm:$0xff] }
  0x32   : > { %345 = vst.msk [vmem:[#allocation2 + $0x129] sm:$0xff] %vm269_vm1, %v7612_v44  ;;  %v389_v55 = vld [vmem:[#allocation2 + $0x31] sm:$0xff]  ;;  %v390_v57 = vld [vmem:[#allocation2 + $0x39] sm:$0xff]  ;;  %v391_v59 = vld [vmem:[#allocation2 + $0x41] sm:$0xff] }
  0x33   : > { %8751 = vmatmul.mubr.msk.f32.gmra.mrb[4].mxu0 %vm269_vm1, %v10068_v34  ;;  %v10123_v58 = vld [vmem:[#allocation2 + $0x7a] sm:$0xff]  ;;  %v10125_v60 = vld [vmem:[#allocation2 + $0x82] sm:$0xff]  ;;  %v10133_v62 = vld [vmem:[#allocation2 + $0x8a] sm:$0xff] }
  0x34   : > { %8753 = vmatprep.mubr.msk.f32.mxu0 %vm269_vm1, %v10070_v35  ;;  %8583 = vmatmul.mubr.msk.f32.gmra.mrb[4].mxu1 %vm269_vm1, %v388_v53  ;;  %v392_v61 = vld [vmem:[#allocation2 + $0x49] sm:$0xff]  ;;  %v393_v63 = vld [vmem:[#allocation2 + $0x51] sm:$0xff]  ;;  %v394_v2 = vld [vmem:[#allocation2 + $0x59] sm:$0xff] }
  0x35   : > { %8585 = vmatprep.mubr.msk.f32.mxu1 %vm269_vm1, %v389_v55  ;;  %v10135_v0 = vld [vmem:[#allocation2 + $0x92] sm:$0xff]  ;;  %v10143_v3 = vld [vmem:[#allocation2 + $0x9a] sm:$0xff]  ;;  %v10145_v5 = vld [vmem:[#allocation2 + $0xa2] sm:$0xff] }
  0x36   : > { %v395_v4 = vld [vmem:[#allocation2 + $0x61] sm:$0xff]  ;;  %v396_v6 = vld [vmem:[#allocation2 + $0x69] sm:$0xff]  ;;  %v397_v8 = vld [vmem:[#allocation2 + $0x71] sm:$0xff] }
  0x37   : > { %8754 = vmatmul.mubr.msk.f32.gmra.mrb[6].mxu0 %vm269_vm1, %v10072_v36  ;;  %v10153_v7 = vld [vmem:[#allocation2 + $0xaa] sm:$0xff]  ;;  %v10155_v9 = vld [vmem:[#allocation2 + $0xb2] sm:$0xff]  ;;  %v10157_v10 = vld [vmem:[#allocation2 + $0xba] sm:$0xff] }
  0x38   : > { %8756 = vmatprep.mubr.msk.f32.mxu0 %vm269_vm1, %v10092_v46  ;;  %8586 = vmatmul.mubr.msk.f32.gmra.mrb[6].mxu1 %vm269_vm1, %v390_v57  ;;  %v10162_v11 = vld [vmem:[#allocation2 + $0xc2] sm:$0xff]  ;;  %v398_v12 = vld [vmem:[#allocation2 + $0x79] sm:$0xff]  ;;  %v10190_v21 = vld [vmem:[#allocation2 + $0xca] sm:$0xff] }
  0x39   : > { %8588 = vmatprep.mubr.msk.f32.mxu1 %vm269_vm1, %v391_v59  ;;  %v10170_v14 = vld [vmem:[#allocation2 + $0x13] sm:$0xff]  ;;  %v10172_v15 = vld [vmem:[#allocation2 + $0x1b] sm:$0xff]  ;;  %v400_v20 = vld [vmem:[#allocation2 + $0x89] sm:$0xff] }
  0x3a   : > { %v399_v16 = vld [vmem:[#allocation2 + $0x81] sm:$0xff]  ;;  %v10176_v17 = vld [vmem:[#allocation2 + $0x14] sm:$0xff]  ;;  %v404_v37 = vld [vmem:[#allocation2 + $0xa9] sm:$0xff] }
  0x3b   : > { %8757 = vmatmul.mubr.msk.f32.gmra.mrb[8].mxu0 %vm269_vm1, %v10103_v50  ;;  %v10178_v18 = vld [vmem:[#allocation2 + $0x1c] sm:$0xff]  ;;  %v401_v22 = vld [vmem:[#allocation2 + $0x91] sm:$0xff]  ;;  %v408_v45 = vld [vmem:[#allocation2 + $0xc9] sm:$0xff] }
  0x3c   : > { %8759 = vmatprep.mubr.msk.f32.mxu0 %vm269_vm1, %v10105_v52  ;;  %8589 = vmatmul.mubr.msk.f32.gmra.mrb[8].mxu1 %vm269_vm1, %v392_v61  ;;  %v10180_v19 = vld [vmem:[#allocation2 + $0x18] sm:$0xff]  ;;  %v403_v26 = vld [vmem:[#allocation2 + $0xa1] sm:$0xff]  ;;  %v10210_v38 = vld [vmem:[#allocation2 + $0xea] sm:$0xff] }
  0x3d   : > { %8591 = vmatprep.mubr.msk.f32.mxu1 %vm269_vm1, %v393_v63  ;;  %5008 = vst.msk [vmem:[#allocation2 + $0x18] sm:$0xff] %vm269_vm1, %v9800_v1  ;;  %v10192_v23 = vld [vmem:[#allocation2 + $0xd2] sm:$0xff]  ;;  %v10200_v25 = vld [vmem:[#allocation2 + $0xda] sm:$0xff]  ;;  %v10202_v27 = vld [vmem:[#allocation2 + $0xe2] sm:$0xff] }
  0x3e   : > { %v402_v24 = vld [vmem:[#allocation2 + $0x99] sm:$0xff]  ;;  %v405_v39 = vld [vmem:[#allocation2 + $0xb1] sm:$0xff]  ;;  %v407_v43 = vld [vmem:[#allocation2 + $0xc1] sm:$0xff] }
  0x3f   : > { %8760 = vmatmul.mubr.msk.f32.gmra.mrb[10].mxu0 %vm269_vm1, %v10113_v54  ;;  %v10212_v40 = vld [vmem:[#allocation2 + $0xf2] sm:$0xff]  ;;  %v10220_v42 = vld [vmem:[#allocation2 + $0xfa] sm:$0xff]  ;;  %v10222_v44 = vld [vmem:[#allocation2 + $0x102] sm:$0xff] }
  0x40   : > { %8762 = vmatprep.mubr.msk.f32.mxu0 %vm269_vm1, %v10115_v56  ;;  %8592 = vmatmul.mubr.msk.f32.gmra.mrb[10].mxu1 %vm269_vm1, %v394_v2  ;;  %v406_v41 = vld [vmem:[#allocation2 + $0xb9] sm:$0xff]  ;;  %v10230_v47 = vld [vmem:[#allocation2 + $0x10a] sm:$0xff]  ;;  %v411_v55 = vld [vmem:[#allocation2 + $0xe1] sm:$0xff] }
  0x41   : > { %8594 = vmatprep.mubr.msk.f32.mxu1 %vm269_vm1, %v395_v4  ;;  %v409_v48 = vld [vmem:[#allocation2 + $0xd1] sm:$0xff]  ;;  %v410_v51 = vld [vmem:[#allocation2 + $0xd9] sm:$0xff]  ;;  %v1590_v57 = vld [vmem:[#allocation2 + $0x122] sm:$0xff] }
  0x42   : > { %v1588_v49 = vld [vmem:[#allocation2 + $0x112] sm:$0xff]  ;;  %v1589_v53 = vld [vmem:[#allocation2 + $0x11a] sm:$0xff]  ;;  %v412_v59 = vld [vmem:[#allocation2 + $0xe9] sm:$0xff] }
  0x43   : > { %8763 = vmatmul.mubr.msk.f32.gmra.mrb[12].mxu0 %vm269_vm1, %v10123_v58  ;;  %v1591_v61 = vld [vmem:[#allocation2 + $0x12a] sm:$0xff]  ;;  %v414_v2 = vld [vmem:[#allocation2 + $0xf9] sm:$0xff]  ;;  %v415_v4 = vld [vmem:[#allocation2 + $0x101] sm:$0xff] }
  0x44   : > { %8765 = vmatprep.mubr.msk.f32.mxu0 %vm269_vm1, %v10125_v60  ;;  %8595 = vmatmul.mubr.msk.f32.gmra.mrb[12].mxu1 %vm269_vm1, %v396_v6  ;;  %v413_v63 = vld [vmem:[#allocation2 + $0xf1] sm:$0xff]  ;;  %v1984_v6 = vld [vmem:[#allocation2 + $0x23] sm:$0xff]  ;;  %vm10890_vm9 = vmpackc.low %vm4164_vm4, %vm9803_vm8 }
  0x45   : > { %8597 = vmatprep.mubr.msk.f32.mxu1 %vm269_vm1, %v397_v8  ;;  %v10250_v8 = vld [vmem:[%s11380_s1 + $0x18] sm:$0xf]  ;;  %v1985_v13 = vld [vmem:[#allocation2 + $0x2b] sm:$0xff] }
  0x47   : > { %8766 = vmatmul.mubr.msk.f32.gmra.mrb[14].mxu0 %vm269_vm1, %v10133_v62 }
  0x48   : > { %8768 = vmatprep.mubr.msk.f32.mxu0 %vm269_vm1, %v10135_v0  ;;  %8598 = vmatmul.mubr.msk.f32.gmra.mrb[14].mxu1 %vm269_vm1, %v398_v12  ;;  %v416_v12 = vld [vmem:[#allocation2 + $0x109] sm:$0xff] }
  0x49   : > { %8600 = vmatprep.mubr.msk.f32.mxu1 %vm269_vm1, %v399_v16  ;;  %v1986_v16 = vld [vmem:[#allocation2 + $0x33] sm:$0xff] }
  0x4b   : > { %8769 = vmatmul.mubr.msk.f32.gmra.mrb[16].mxu0 %vm269_vm1, %v10143_v3 }
  0x4c   : > { %8771 = vmatprep.mubr.msk.f32.mxu0 %vm269_vm1, %v10145_v5  ;;  %8601 = vmatmul.mubr.msk.f32.gmra.mrb[16].mxu1 %vm269_vm1, %v400_v20  ;;  %v1987_v20 = vld [vmem:[#allocation2 + $0x3b] sm:$0xff] }
  0x4d   : > { %8603 = vmatprep.mubr.msk.f32.mxu1 %vm269_vm1, %v401_v22  ;;  %v346_v22 = vld [vmem:[#allocation2] sm:$0xff] }
  0x4f   : > { %8772 = vmatmul.mubr.msk.f32.gmra.mrb[18].mxu0 %vm269_vm1, %v10153_v7 }
  0x50   : > { %8774 = vmatprep.mubr.msk.f32.mxu0 %vm269_vm1, %v10155_v9  ;;  %8604 = vmatmul.mubr.msk.f32.gmra.mrb[18].mxu1 %vm269_vm1, %v402_v24  ;;  %v1988_v24 = vld [vmem:[#allocation2 + $0x43] sm:$0xff] }
  0x51   : > { %8606 = vmatprep.mubr.msk.f32.mxu1 %vm269_vm1, %v403_v26  ;;  %v1989_v26 = vld [vmem:[#allocation2 + $0x4b] sm:$0xff] }
  0x53   : > { %8775 = vmatmul.mubr.msk.f32.gmra.mrb[20].mxu0 %vm269_vm1, %v10157_v10 }
  0x54   : > { %8777 = vmatprep.mubr.msk.f32.mxu0 %vm269_vm1, %v10162_v11  ;;  %8607 = vmatmul.mubr.msk.f32.gmra.mrb[20].mxu1 %vm269_vm1, %v404_v37  ;;  %v348_v37 = vld [vmem:[#allocation2 + $0x10] sm:$0xff] }
  0x55   : > { %8609 = vmatprep.mubr.msk.f32.mxu1 %vm269_vm1, %v405_v39  ;;  %v1990_v39 = vld [vmem:[#allocation2 + $0x53] sm:$0xff] }
  0x57   : > { %8778 = vmatmul.mubr.msk.f32.gmra.mrb[22].mxu0 %vm269_vm1, %v10190_v21 }
  0x58   : > { %8780 = vmatprep.mubr.msk.f32.mxu0 %vm269_vm1, %v10192_v23  ;;  %8610 = vmatmul.mubr.msk.f32.gmra.mrb[22].mxu1 %vm269_vm1, %v406_v41  ;;  %v7688_v41 = vld [vmem:[%s11380_s1 + $0x8] sm:$0xf] }
  0x59   : > { %8612 = vmatprep.mubr.msk.f32.mxu1 %vm269_vm1, %v407_v43  ;;  %v10274_v43 = vld [vmem:[#allocation2 + $0x2] sm:$0xff]  ;;  %8686 = vmatprep.subr.msk.mxu1 %vm529_vm0, %v7688_v41 }
  0x5a   : > { %5005 = vst.msk [vmem:[#allocation2] sm:$0xff] %vm269_vm1, %v9800_v1 }
  0x5b   : > { %8781 = vmatmul.mubr.msk.f32.gmra.mrb[24].mxu0 %vm269_vm1, %v10200_v25 }
  0x5c   : > { %8783 = vmatprep.mubr.msk.f32.mxu0 %vm269_vm1, %v10202_v27  ;;  %8613 = vmatmul.mubr.msk.f32.gmra.mrb[24].mxu1 %vm269_vm1, %v408_v45  ;;  %v10276_v45 = vld [vmem:[#allocation2 + $0xa] sm:$0xff] }
  0x5d   : > { %8615 = vmatprep.mubr.msk.f32.mxu1 %vm269_vm1, %v409_v48  ;;  %v1991_v48 = vld [vmem:[#allocation2 + $0x5b] sm:$0xff]  ;;  %5007 = vst.msk [vmem:[#allocation2 + $0x10] sm:$0xff] %vm269_vm1, %v9800_v1 }
  0x5f   : > { %8784 = vmatmul.mubr.msk.f32.gmra.mrb[26].mxu0 %vm269_vm1, %v10210_v38 }
  0x60   : > { %8786 = vmatprep.mubr.msk.f32.mxu0 %vm269_vm1, %v10212_v40  ;;  %8616 = vmatmul.mubr.msk.f32.gmra.mrb[26].mxu1 %vm269_vm1, %v410_v51  ;;  %v1992_v51 = vld [vmem:[#allocation2 + $0x63] sm:$0xff] }
  0x61   : > { %8618 = vmatprep.mubr.msk.f32.mxu1 %vm269_vm1, %v411_v55  ;;  %v1993_v55 = vld [vmem:[#allocation2 + $0x6b] sm:$0xff] }
  0x63   : > { %8787 = vmatmul.mubr.msk.f32.gmra.mrb[28].mxu0 %vm269_vm1, %v10220_v42 }
  0x64   : > { %8789 = vmatprep.mubr.msk.f32.mxu0 %vm269_vm1, %v10222_v44  ;;  %8619 = vmatmul.mubr.msk.f32.gmra.mrb[28].mxu1 %vm269_vm1, %v412_v59  ;;  %v1994_v59 = vld [vmem:[#allocation2 + $0x73] sm:$0xff] }
  0x65   : > { %8621 = vmatprep.mubr.msk.f32.mxu1 %vm269_vm1, %v413_v63  ;;  %v354_v63 = vld [vmem:[#allocation2 + $0x40] sm:$0xff] }
  0x67   : > { %8790 = vmatmul.mubr.msk.f32.gmra.mrb[30].mxu0 %vm269_vm1, %v10230_v47 }
  0x68   : > { %8792 = vmatprep.mubr.msk.f32.mxu0 %vm269_vm1, %v1588_v49  ;;  %8622 = vmatmul.mubr.msk.f32.gmra.mrb[30].mxu1 %vm269_vm1, %v414_v2  ;;  %v350_v49 = vld [vmem:[#allocation2 + $0x20] sm:$0xff] }
  0x69   : > { %8624 = vmatprep.mubr.msk.f32.mxu1 %vm269_vm1, %v415_v4  ;;  %v1996_v2 = vld [vmem:[#allocation2 + $0x83] sm:$0xff] }
  0x6a   : > { %v355_v4 = vld [vmem:[#allocation2 + $0x48] sm:$0xff] }
  0x6b   : > { %8793 = vmatmul.mubr.msk.f32.gmra.mrb[32].mxu0 %vm269_vm1, %v1589_v53  ;;  %v351_v53 = vld [vmem:[#allocation2 + $0x28] sm:$0xff] }
  0x6c   : > { %8795 = vmatprep.mubr.msk.f32.mxu0 %vm269_vm1, %v1590_v57  ;;  %8625 = vmatmul.mubr.msk.f32.gmra.mrb[32].mxu1 %vm269_vm1, %v416_v12  ;;  %v352_v57 = vld [vmem:[#allocation2 + $0x30] sm:$0xff] }
  0x6d   : > { %v356_v12 = vld [vmem:[#allocation2 + $0x50] sm:$0xff] }
  0x6f   : > { %8796 = vmatmul.mubr.msk.f32.gmra.mrb[34].mxu0 %vm269_vm1, %v1591_v61  ;;  %v353_v61 = vld [vmem:[#allocation2 + $0x38] sm:$0xff] }
  0x70   : > { %8800 = vmatprep.mubr.msk.f32.mxu0 %vm269_vm1, %v10170_v14  ;;  %v417_v14 = vld [vmem:[#allocation2 + $0x111] sm:$0xff] }
  0x71   : > { %8627 = vmatprep.mubr.msk.f32.mxu1 %vm269_vm1, %v417_v14  ;;  %v357_v14 = vld [vmem:[#allocation2 + $0x58] sm:$0xff] }
  0x73   : > { %8801 = vmatmul.mubr.msk.f32.vlgmr.msra.gmra.mrb[0].mxu0 %vm269_vm1, %v10172_v15  ;;  %v418_v15 = vld [vmem:[#allocation2 + $0x119] sm:$0xff] }
  0x74   : > { %8803 = vmatprep.mubr.msk.f32.mxu0 %vm269_vm1, %v1984_v6  ;;  %8855 = vmatpush3.msk.msra.mxu0 %vm529_vm0, %v10050_v31  ;;  %v347_v31 = vld [vmem:[#allocation2 + $0x8] sm:$0xff] }
  0x75   : > { %8910 = vmatprep.subr.msk.mxu0 %vm529_vm0, %v10250_v8  ;;  %8628 = vmatmul.mubr.msk.f32.gmra.mrb[34].mxu1 %vm269_vm1, %v418_v15  ;;  %5006 = vst.msk [vmem:[#allocation2 + $0x8] sm:$0xff] %vm269_vm1, %v9800_v1  ;;  %v1997_v6 = vld [vmem:[#allocation2 + $0x8b] sm:$0xff]  ;;  %v358_v15 = vld [vmem:[#allocation2 + $0x60] sm:$0xff] }
  0x76   : > { %8632 = vmatprep.mubr.msk.f32.mxu1 %vm269_vm1, %v346_v22  ;;  %v359_v22 = vld [vmem:[#allocation2 + $0x68] sm:$0xff] }
  0x77   : > { %8804 = vmatmul.mubr.msk.f32.gmra.mrb[2].mxu0 %vm269_vm1, %v1985_v13  ;;  %v1998_v13 = vld [vmem:[#allocation2 + $0x93] sm:$0xff] }
  0x78   : > { %8806 = vmatprep.mubr.msk.f32.mxu0 %vm269_vm1, %v1986_v16  ;;  %v1999_v16 = vld [vmem:[#allocation2 + $0x9b] sm:$0xff] }
  0x79   : > { %8633 = vmatmul.mubr.msk.f32.vlgmr.msra.gmra.mrb[0].mxu1 %vm269_vm1, %v347_v31  ;;  %v360_v31 = vld [vmem:[#allocation2 + $0x70] sm:$0xff] }
  0x7a   : > { %8635 = vmatprep.mubr.msk.f32.mxu1 %vm269_vm1, %v348_v37  ;;  %8687 = vmatpush3.msk.msra.mxu1 %vm529_vm0, %v7688_v41  ;;  %v361_v37 = vld [vmem:[#allocation2 + $0x78] sm:$0xff]  ;;  %v362_v41 = vld [vmem:[#allocation2 + $0x80] sm:$0xff] }
  0x7b   : > { %8807 = vmatmul.mubr.msk.f32.gmra.mrb[4].mxu0 %vm269_vm1, %v1987_v20  ;;  %v2000_v20 = vld [vmem:[#allocation2 + $0xa3] sm:$0xff] }
  0x7c   : > { %8809 = vmatprep.mubr.msk.f32.mxu0 %vm269_vm1, %v1988_v24  ;;  %v2001_v24 = vld [vmem:[#allocation2 + $0xab] sm:$0xff] }
  0x7d   : > { %8636 = vmatmul.mubr.msk.f32.gmra.mrb[2].mxu1 %vm269_vm1, %v10180_v19  ;;  %v1995_v19 = vld [vmem:[#allocation2 + $0x7b] sm:$0xff] }
  0x7e   : > { %8638 = vmatprep.mubr.msk.f32.mxu1 %vm269_vm1, %v350_v49  ;;  %v363_v49 = vld [vmem:[#allocation2 + $0x88] sm:$0xff] }
  0x7f   : > { %8810 = vmatmul.mubr.msk.f32.gmra.mrb[6].mxu0 %vm269_vm1, %v1989_v26  ;;  %v2002_v26 = vld [vmem:[#allocation2 + $0xb3] sm:$0xff] }
  0x80   : > { %8812 = vmatprep.mubr.msk.f32.mxu0 %vm269_vm1, %v1990_v39  ;;  %v2003_v39 = vld [vmem:[#allocation2 + $0xbb] sm:$0xff] }
  0x81   : > { %8639 = vmatmul.mubr.msk.f32.gmra.mrb[4].mxu1 %vm269_vm1, %v351_v53  ;;  %v364_v53 = vld [vmem:[#allocation2 + $0x90] sm:$0xff] }
  0x82   : > { %8641 = vmatprep.mubr.msk.f32.mxu1 %vm269_vm1, %v352_v57  ;;  %v365_v57 = vld [vmem:[#allocation2 + $0x98] sm:$0xff] }
  0x83   : > { %8813 = vmatmul.mubr.msk.f32.gmra.mrb[8].mxu0 %vm269_vm1, %v1991_v48  ;;  %v2004_v48 = vld [vmem:[#allocation2 + $0xc3] sm:$0xff] }
  0x84   : > { %8815 = vmatprep.mubr.msk.f32.mxu0 %vm269_vm1, %v1992_v51  ;;  %v2005_v51 = vld [vmem:[#allocation2 + $0xcb] sm:$0xff] }
  0x85   : > { %8642 = vmatmul.mubr.msk.f32.gmra.mrb[6].mxu1 %vm269_vm1, %v353_v61  ;;  %v366_v61 = vld [vmem:[#allocation2 + $0xa0] sm:$0xff] }
  0x86   : > { %8644 = vmatprep.mubr.msk.f32.mxu1 %vm269_vm1, %v354_v63  ;;  %v367_v63 = vld [vmem:[#allocation2 + $0xa8] sm:$0xff] }
  0x87   : > { %8816 = vmatmul.mubr.msk.f32.gmra.mrb[10].mxu0 %vm269_vm1, %v1993_v55  ;;  %v2006_v55 = vld [vmem:[#allocation2 + $0xd3] sm:$0xff] }
  0x88   : > { %8818 = vmatprep.mubr.msk.f32.mxu0 %vm269_vm1, %v1994_v59  ;;  %v2007_v59 = vld [vmem:[#allocation2 + $0xdb] sm:$0xff] }
  0x89   : > { %8645 = vmatmul.mubr.msk.f32.gmra.mrb[8].mxu1 %vm269_vm1, %v355_v4  ;;  %v368_v4 = vld [vmem:[#allocation2 + $0xb0] sm:$0xff] }
  0x8a   : > { %8647 = vmatprep.mubr.msk.f32.mxu1 %vm269_vm1, %v356_v12  ;;  %v369_v12 = vld [vmem:[#allocation2 + $0xb8] sm:$0xff] }
  0x8b   : > { %8819 = vmatmul.mubr.msk.f32.gmra.mrb[12].mxu0 %vm269_vm1, %v1995_v19  ;;  %v2008_v19 = vld [vmem:[#allocation2 + $0xe3] sm:$0xff] }
  0x8c   : > { %8821 = vmatprep.mubr.msk.f32.mxu0 %vm269_vm1, %v1996_v2  ;;  %v2009_v2 = vld [vmem:[#allocation2 + $0xeb] sm:$0xff] }
  0x8d   : > { %8648 = vmatmul.mubr.msk.f32.gmra.mrb[10].mxu1 %vm269_vm1, %v357_v14  ;;  %v370_v14 = vld [vmem:[#allocation2 + $0xc0] sm:$0xff] }
  0x8e   : > { %8650 = vmatprep.mubr.msk.f32.mxu1 %vm269_vm1, %v358_v15  ;;  %v371_v15 = vld [vmem:[#allocation2 + $0xc8] sm:$0xff] }
  0x8f   : > { %8822 = vmatmul.mubr.msk.f32.gmra.mrb[14].mxu0 %vm269_vm1, %v1997_v6  ;;  %v2010_v6 = vld [vmem:[#allocation2 + $0xf3] sm:$0xff] }
  0x90   : > { %8824 = vmatprep.mubr.msk.f32.mxu0 %vm269_vm1, %v1998_v13  ;;  %v2011_v13 = vld [vmem:[#allocation2 + $0xfb] sm:$0xff] }
  0x91   : > { %8651 = vmatmul.mubr.msk.f32.gmra.mrb[12].mxu1 %vm269_vm1, %v359_v22  ;;  %v372_v22 = vld [vmem:[#allocation2 + $0xd0] sm:$0xff] }
  0x92   : > { %8653 = vmatprep.mubr.msk.f32.mxu1 %vm269_vm1, %v360_v31  ;;  %v373_v31 = vld [vmem:[#allocation2 + $0xd8] sm:$0xff] }
  0x93   : > { %8825 = vmatmul.mubr.msk.f32.gmra.mrb[16].mxu0 %vm269_vm1, %v1999_v16  ;;  %v2012_v16 = vld [vmem:[#allocation2 + $0x103] sm:$0xff] }
  0x94   : > { %8827 = vmatprep.mubr.msk.f32.mxu0 %vm269_vm1, %v2000_v20  ;;  %v2013_v20 = vld [vmem:[#allocation2 + $0x10b] sm:$0xff] }
  0x95   : > { %8654 = vmatmul.mubr.msk.f32.gmra.mrb[14].mxu1 %vm269_vm1, %v361_v37  ;;  %v374_v37 = vld [vmem:[#allocation2 + $0xe0] sm:$0xff] }
  0x96   : > { %8656 = vmatprep.mubr.msk.f32.mxu1 %vm269_vm1, %v362_v41  ;;  %v375_v41 = vld [vmem:[#allocation2 + $0xe8] sm:$0xff] }
  0x97   : > { %8828 = vmatmul.mubr.msk.f32.gmra.mrb[18].mxu0 %vm269_vm1, %v2001_v24  ;;  %v2014_v24 = vld [vmem:[#allocation2 + $0x113] sm:$0xff] }
  0x98   : > { %8830 = vmatprep.mubr.msk.f32.mxu0 %vm269_vm1, %v2002_v26  ;;  %v2015_v26 = vld [vmem:[#allocation2 + $0x11b] sm:$0xff] }
  0x99   : > { %8657 = vmatmul.mubr.msk.f32.gmra.mrb[16].mxu1 %vm269_vm1, %v363_v49  ;;  %v376_v49 = vld [vmem:[#allocation2 + $0xf0] sm:$0xff] }
  0x9a   : > { %8659 = vmatprep.mubr.msk.f32.mxu1 %vm269_vm1, %v364_v53  ;;  %v378_v53 = vld [vmem:[#allocation2 + $0x100] sm:$0xff] }
  0x9b   : > { %8831 = vmatmul.mubr.msk.f32.gmra.mrb[20].mxu0 %vm269_vm1, %v2003_v39  ;;  %v2016_v39 = vld [vmem:[#allocation2 + $0x123] sm:$0xff] }
  0x9c   : > { %8833 = vmatprep.mubr.msk.f32.mxu0 %vm269_vm1, %v2004_v48  ;;  %v2017_v48 = vld [vmem:[#allocation2 + $0x12b] sm:$0xff] }
  0x9d   : > { %8660 = vmatmul.mubr.msk.f32.gmra.mrb[18].mxu1 %vm269_vm1, %v365_v57  ;;  %v10351_v57 = vld [vmem:[%s11380_s1 + $0x1c] sm:$0xf] }
  0x9e   : > { %8662 = vmatprep.mubr.msk.f32.mxu1 %vm269_vm1, %v366_v61  ;;  %v380_v61 = vld [vmem:[#allocation2 + $0x110] sm:$0xff] }
  0x9f   : > { %8834 = vmatmul.mubr.msk.f32.gmra.mrb[22].mxu0 %vm269_vm1, %v2005_v51  ;;  %v377_v51 = vld [vmem:[#allocation2 + $0xf8] sm:$0xff] }
  0xa0   : > { %8836 = vmatprep.mubr.msk.f32.mxu0 %vm269_vm1, %v2006_v55  ;;  %v10345_v55 = vld [vmem:[#allocation2 + $0x24] sm:$0xff] }
  0xa1   : > { %8663 = vmatmul.mubr.msk.f32.gmra.mrb[20].mxu1 %vm269_vm1, %v367_v63  ;;  %v10372_v63 = vld [vmem:[#allocation2 + $0x3c] sm:$0xff] }
  0xa2   : > { %8665 = vmatprep.mubr.msk.f32.mxu1 %vm269_vm1, %v368_v4  ;;  %v10385_v4 = vld [vmem:[#allocation2 + $0x54] sm:$0xff] }
  0xa3   : > { %8837 = vmatmul.mubr.msk.f32.gmra.mrb[24].mxu0 %vm269_vm1, %v2007_v59  ;;  %v379_v59 = vld [vmem:[#allocation2 + $0x108] sm:$0xff] }
  0xa4   : > { %8839 = vmatprep.mubr.msk.f32.mxu0 %vm269_vm1, %v2008_v19  ;;  %v10362_v19 = vld [vmem:[#allocation2 + $0x34] sm:$0xff] }
  0xa5   : > { %8666 = vmatmul.mubr.msk.f32.gmra.mrb[22].mxu1 %vm269_vm1, %v369_v12  ;;  %v10608_v12 = vld [vmem:[#allocation2 + $0x3e] sm:$0xff] }
  0xa6   : > { %8668 = vmatprep.mubr.msk.f32.mxu1 %vm269_vm1, %v370_v14  ;;  %v10614_v14 = vld [vmem:[#allocation2 + $0x46] sm:$0xff] }
  0xa7   : > { %8840 = vmatmul.mubr.msk.f32.gmra.mrb[26].mxu0 %vm269_vm1, %v2009_v2  ;;  %v10383_v2 = vld [vmem:[#allocation2 + $0x4c] sm:$0xff] }
  0xa8   : > { %8842 = vmatprep.mubr.msk.f32.mxu0 %vm269_vm1, %v2010_v6  ;;  %v10397_v6 = vld [vmem:[#allocation2 + $0x64] sm:$0xff] }
  0xa9   : > { %8669 = vmatmul.mubr.msk.f32.gmra.mrb[24].mxu1 %vm269_vm1, %v371_v15  ;;  %v10620_v15 = vld [vmem:[#allocation2 + $0x4e] sm:$0xff] }
  0xaa   : > { %8671 = vmatprep.mubr.msk.f32.mxu1 %vm269_vm1, %v372_v22  ;;  %v10626_v22 = vld [vmem:[#allocation2 + $0x56] sm:$0xff] }
  0xab   : > { %8843 = vmatmul.mubr.msk.f32.gmra.mrb[28].mxu0 %vm269_vm1, %v2011_v13  ;;  %v3264_v13 = vld [vmem:[#allocation2 + $0x45] sm:$0xff] }
  0xac   : > { %8845 = vmatprep.mubr.msk.f32.mxu0 %vm269_vm1, %v2012_v16  ;;  %v3265_v16 = vld [vmem:[#allocation2 + $0x4d] sm:$0xff] }
  0xad   : > { %8672 = vmatmul.mubr.msk.f32.gmra.mrb[26].mxu1 %vm269_vm1, %v373_v31 }
  0xae   : > { %8674 = vmatprep.mubr.msk.f32.mxu1 %vm269_vm1, %v374_v37  ;;  %v2869_v37 = vld [vmem:[#allocation2 + $0x13c] sm:$0xff] }
  0xaf   : > { %8846 = vmatmul.mubr.msk.f32.gmra.mrb[30].mxu0 %vm269_vm1, %v2013_v20  ;;  %v3266_v20 = vld [vmem:[#allocation2 + $0x55] sm:$0xff] }
  0xb0   : > { %8848 = vmatprep.mubr.msk.f32.mxu0 %vm269_vm1, %v2014_v24  ;;  %5015 = vst.msk [vmem:[#allocation2 + $0x50] sm:$0xff] %vm269_vm1, %v9800_v1  ;;  %v2868_v24 = vld [vmem:[#allocation2 + $0x134] sm:$0xff] }
  0xb1   : > { %8675 = vmatmul.mubr.msk.f32.gmra.mrb[28].mxu1 %vm269_vm1, %v375_v41  ;;  %5017 = vst.msk [vmem:[#allocation2 + $0x58] sm:$0x3] %vm5016_vm2, %v9800_v1 }
  0xb2   : > { %8677 = vmatprep.mubr.msk.f32.mxu1 %vm269_vm1, %v376_v49  ;;  %v3268_v49 = vld [vmem:[#allocation2 + $0x65] sm:$0xff] }
  0xb3   : > { %8849 = vmatmul.mubr.msk.f32.gmra.mrb[32].mxu0 %vm269_vm1, %v2015_v26 }
  0xb4   : > { %8851 = vmatprep.mubr.msk.f32.mxu0 %vm269_vm1, %v2016_v39 }
  0xb5   : > { %8678 = vmatmul.mubr.msk.f32.gmra.mrb[30].mxu1 %vm269_vm1, %v377_v51  ;;  %v3269_v51 = vld [vmem:[#allocation2 + $0x6d] sm:$0xff] }
  0xb6   : > { %8680 = vmatprep.mubr.msk.f32.mxu1 %vm269_vm1, %v378_v53  ;;  %v3270_v53 = vld [vmem:[#allocation2 + $0x75] sm:$0xff] }
  0xb7   : > { %8852 = vmatmul.mubr.msk.f32.gmra.mrb[36].mxu0 %vm269_vm1, %v2017_v48  ;;  %v3267_v48 = vld [vmem:[#allocation2 + $0x5d] sm:$0xff] }
  0xb8   : > { %8856 = vmatprep.mubr.msk.f32.mxu0 %vm269_vm1, %v10176_v17  ;;  %v10358_v17 = vld [vmem:[#allocation2 + $0x2c] sm:$0xff] }
  0xb9   : > { %8681 = vmatmul.mubr.msk.f32.gmra.mrb[32].mxu1 %vm269_vm1, %v379_v59  ;;  %v3273_v59 = vld [vmem:[#allocation2 + $0x8d] sm:$0xff] }
  0xba   : > { %8683 = vmatprep.mubr.msk.f32.mxu1 %vm269_vm1, %v380_v61  ;;  %v3275_v61 = vld [vmem:[#allocation2 + $0x9d] sm:$0xff] }
  0xbb   : > { %8857 = vmatmul.mubr.msk.f32.vlgmr.msra.gmra.mrb[0].mxu0 %vm269_vm1, %v10178_v18  ;;  %v381_v18 = vld [vmem:[#allocation2 + $0x118] sm:$0xff] }
  0xbc   : > { %8859 = vmatprep.mubr.msk.f32.mxu0 %vm269_vm1, %v10345_v55  ;;  %8911 = vmatpush3.msk.msra.mxu0 %vm529_vm0, %v10250_v8  ;;  %v10374_v8 = vld [vmem:[#allocation2 + $0x44] sm:$0xff] }
  0xbd   : > { %8966 = vmatprep.subr.msk.mxu0 %vm529_vm0, %v10351_v57  ;;  %8684 = vmatmul.mubr.msk.f32.gmra.mrb[36].mxu1 %vm269_vm1, %v381_v18  ;;  %5014 = vst.msk [vmem:[#allocation2 + $0x48] sm:$0xff] %vm269_vm1, %v9800_v1  ;;  %v3277_v18 = vld [vmem:[#allocation2 + $0xad] sm:$0xff] }
  0xbe   : > { %8688 = vmatprep.mubr.msk.f32.mxu1 %vm269_vm1, %v10274_v43  ;;  %v10395_v43 = vld [vmem:[#allocation2 + $0x5c] sm:$0xff] }
  0xbf   : > { %8860 = vmatmul.mubr.msk.f32.gmra.mrb[2].mxu0 %vm269_vm1, %v10358_v17 }
  0xc0   : > { %8862 = vmatprep.mubr.msk.f32.mxu0 %vm269_vm1, %v10362_v19 }
  0xc1   : > { %8689 = vmatmul.mubr.msk.f32.vlgmr.msra.gmra.mrb[0].mxu1 %vm269_vm1, %v10276_v45  ;;  %v10409_v45 = vld [vmem:[#allocation2 + $0x74] sm:$0xff] }
  0xc2   : > { %8691 = vmatprep.mubr.msk.f32.mxu1 %vm269_vm1, %v10036_v28  ;;  %v10407_v28 = vld [vmem:[#allocation2 + $0x6c] sm:$0xff] }
  0xc3   : > { %8863 = vmatmul.mubr.msk.f32.gmra.mrb[4].mxu0 %vm269_vm1, %v10372_v63 }
  0xc4   : > { %8865 = vmatprep.mubr.msk.f32.mxu0 %vm269_vm1, %v10374_v8 }
  0xc5   : > { %8692 = vmatmul.mubr.msk.f32.gmra.mrb[2].mxu1 %vm269_vm1, %v10038_v29  ;;  %v10419_v29 = vld [vmem:[#allocation2 + $0x7c] sm:$0xff] }
  0xc6   : > { %8694 = vmatprep.mubr.msk.f32.mxu1 %vm269_vm1, %v10040_v30  ;;  %v10421_v30 = vld [vmem:[#allocation2 + $0x84] sm:$0xff] }
  0xc7   : > { %8866 = vmatmul.mubr.msk.f32.gmra.mrb[6].mxu0 %vm269_vm1, %v10383_v2 }
  0xc8   : > { %8868 = vmatprep.mubr.msk.f32.mxu0 %vm269_vm1, %v10385_v4 }
  0xc9   : > { %8695 = vmatmul.mubr.msk.f32.gmra.mrb[4].mxu1 %vm269_vm1, %v10056_v32  ;;  %v10431_v32 = vld [vmem:[#allocation2 + $0x8c] sm:$0xff] }
  0xca   : > { %8697 = vmatprep.mubr.msk.f32.mxu1 %vm269_vm1, %v10060_v33  ;;  %v10433_v33 = vld [vmem:[#allocation2 + $0x94] sm:$0xff] }
  0xcb   : > { %8869 = vmatmul.mubr.msk.f32.gmra.mrb[8].mxu0 %vm269_vm1, %v10395_v43 }
  0xcc   : > { %8871 = vmatprep.mubr.msk.f32.mxu0 %vm269_vm1, %v10397_v6 }
  0xcd   : > { %8698 = vmatmul.mubr.msk.f32.gmra.mrb[6].mxu1 %vm269_vm1, %v10068_v34  ;;  %v10443_v34 = vld [vmem:[#allocation2 + $0x9c] sm:$0xff] }
  0xce   : > { %8700 = vmatprep.mubr.msk.f32.mxu1 %vm269_vm1, %v10070_v35  ;;  %v10445_v35 = vld [vmem:[#allocation2 + $0xa4] sm:$0xff] }
  0xcf   : > { %8872 = vmatmul.mubr.msk.f32.gmra.mrb[10].mxu0 %vm269_vm1, %v10407_v28 }
  0xd0   : > { %8874 = vmatprep.mubr.msk.f32.mxu0 %vm269_vm1, %v10409_v45 }
  0xd1   : > { %8701 = vmatmul.mubr.msk.f32.gmra.mrb[8].mxu1 %vm269_vm1, %v10072_v36  ;;  %v10455_v36 = vld [vmem:[#allocation2 + $0xac] sm:$0xff] }
  0xd2   : > { %8703 = vmatprep.mubr.msk.f32.mxu1 %vm269_vm1, %v10092_v46  ;;  %v10457_v46 = vld [vmem:[#allocation2 + $0xb4] sm:$0xff] }
  0xd3   : > { %8875 = vmatmul.mubr.msk.f32.gmra.mrb[12].mxu0 %vm269_vm1, %v10419_v29 }
  0xd4   : > { %8877 = vmatprep.mubr.msk.f32.mxu0 %vm269_vm1, %v10421_v30 }
  0xd5   : > { %8704 = vmatmul.mubr.msk.f32.gmra.mrb[10].mxu1 %vm269_vm1, %v10103_v50  ;;  %v10467_v50 = vld [vmem:[#allocation2 + $0xbc] sm:$0xff] }
  0xd6   : > { %8706 = vmatprep.mubr.msk.f32.mxu1 %vm269_vm1, %v10105_v52  ;;  %v10469_v52 = vld [vmem:[#allocation2 + $0xc4] sm:$0xff] }
  0xd7   : > { %8878 = vmatmul.mubr.msk.f32.gmra.mrb[14].mxu0 %vm269_vm1, %v10431_v32 }
  0xd8   : > { %8880 = vmatprep.mubr.msk.f32.mxu0 %vm269_vm1, %v10433_v33 }
  0xd9   : > { %8707 = vmatmul.mubr.msk.f32.gmra.mrb[12].mxu1 %vm269_vm1, %v10113_v54  ;;  %v10479_v54 = vld [vmem:[#allocation2 + $0xcc] sm:$0xff] }
  0xda   : > { %8709 = vmatprep.mubr.msk.f32.mxu1 %vm269_vm1, %v10115_v56  ;;  %v10481_v56 = vld [vmem:[#allocation2 + $0xd4] sm:$0xff] }
  0xdb   : > { %8881 = vmatmul.mubr.msk.f32.gmra.mrb[16].mxu0 %vm269_vm1, %v10443_v34 }
  0xdc   : > { %8883 = vmatprep.mubr.msk.f32.mxu0 %vm269_vm1, %v10445_v35 }
  0xdd   : > { %8710 = vmatmul.mubr.msk.f32.gmra.mrb[14].mxu1 %vm269_vm1, %v10123_v58  ;;  %v10491_v58 = vld [vmem:[#allocation2 + $0xdc] sm:$0xff] }
  0xde   : > { %8712 = vmatprep.mubr.msk.f32.mxu1 %vm269_vm1, %v10125_v60  ;;  %v10493_v60 = vld [vmem:[#allocation2 + $0xe4] sm:$0xff] }
  0xdf   : > { %8884 = vmatmul.mubr.msk.f32.gmra.mrb[18].mxu0 %vm269_vm1, %v10455_v36 }
  0xe0   : > { %8886 = vmatprep.mubr.msk.f32.mxu0 %vm269_vm1, %v10457_v46 }
  0xe1   : > { %8713 = vmatmul.mubr.msk.f32.gmra.mrb[16].mxu1 %vm269_vm1, %v10133_v62  ;;  %v10503_v62 = vld [vmem:[#allocation2 + $0xec] sm:$0xff] }
  0xe2   : > { %8715 = vmatprep.mubr.msk.f32.mxu1 %vm269_vm1, %v10135_v0  ;;  %v10505_v0 = vld [vmem:[#allocation2 + $0xf4] sm:$0xff] }
  0xe3   : > { %8887 = vmatmul.mubr.msk.f32.gmra.mrb[20].mxu0 %vm269_vm1, %v10467_v50 }
  0xe4   : > { %8889 = vmatprep.mubr.msk.f32.mxu0 %vm269_vm1, %v10469_v52 }
  0xe5   : > { %8716 = vmatmul.mubr.msk.f32.gmra.mrb[18].mxu1 %vm269_vm1, %v10143_v3  ;;  %v10515_v3 = vld [vmem:[#allocation2 + $0xfc] sm:$0xff] }
  0xe6   : > { %8718 = vmatprep.mubr.msk.f32.mxu1 %vm269_vm1, %v10145_v5  ;;  %v10517_v5 = vld [vmem:[#allocation2 + $0x104] sm:$0xff] }
  0xe7   : > { %8890 = vmatmul.mubr.msk.f32.gmra.mrb[22].mxu0 %vm269_vm1, %v10479_v54 }
  0xe8   : > { %8892 = vmatprep.mubr.msk.f32.mxu0 %vm269_vm1, %v10481_v56 }
  0xe9   : > { %8719 = vmatmul.mubr.msk.f32.gmra.mrb[20].mxu1 %vm269_vm1, %v10153_v7  ;;  %v10527_v7 = vld [vmem:[#allocation2 + $0x10c] sm:$0xff] }
  0xea   : > { %8721 = vmatprep.mubr.msk.f32.mxu1 %vm269_vm1, %v10155_v9  ;;  %v10529_v9 = vld [vmem:[#allocation2 + $0x114] sm:$0xff] }
  0xeb   : > { %8893 = vmatmul.mubr.msk.f32.gmra.mrb[24].mxu0 %vm269_vm1, %v10491_v58 }
  0xec   : > { %8895 = vmatprep.mubr.msk.f32.mxu0 %vm269_vm1, %v10493_v60 }
  0xed   : > { %8722 = vmatmul.mubr.msk.f32.gmra.mrb[22].mxu1 %vm269_vm1, %v10157_v10  ;;  %v10539_v10 = vld [vmem:[#allocation2 + $0x11c] sm:$0xff] }
  0xee   : > { %8724 = vmatprep.mubr.msk.f32.mxu1 %vm269_vm1, %v10162_v11  ;;  %v10541_v11 = vld [vmem:[#allocation2 + $0x124] sm:$0xff] }
  0xef   : > { %8896 = vmatmul.mubr.msk.f32.gmra.mrb[26].mxu0 %vm269_vm1, %v10503_v62 }
  0xf0   : > { %8898 = vmatprep.mubr.msk.f32.mxu0 %vm269_vm1, %v10505_v0 }
  0xf1   : > { %8725 = vmatmul.mubr.msk.f32.gmra.mrb[24].mxu1 %vm269_vm1, %v10190_v21  ;;  %v10551_v21 = vld [vmem:[#allocation2 + $0x12c] sm:$0xff] }
  0xf2   : > { %8727 = vmatprep.mubr.msk.f32.mxu1 %vm269_vm1, %v10192_v23  ;;  %v10566_v23 = vld [vmem:[%s11380_s1 + $0x20] sm:$0xf] }
  0xf3   : > { %8899 = vmatmul.mubr.msk.f32.gmra.mrb[28].mxu0 %vm269_vm1, %v10515_v3 }
  0xf4   : > { %8901 = vmatprep.mubr.msk.f32.mxu0 %vm269_vm1, %v10517_v5 }
  0xf5   : > { %8728 = vmatmul.mubr.msk.f32.gmra.mrb[26].mxu1 %vm269_vm1, %v10200_v25  ;;  %v3260_v25 = vld [vmem:[#allocation2 + $0x25] sm:$0xff] }
  0xf6   : > { %8730 = vmatprep.mubr.msk.f32.mxu1 %vm269_vm1, %v10202_v27  ;;  %v10590_v27 = vld [vmem:[#allocation2 + $0x26] sm:$0xff] }
  0xf7   : > { %8902 = vmatmul.mubr.msk.f32.gmra.mrb[30].mxu0 %vm269_vm1, %v10527_v7  ;;  %5009 = vst.msk [vmem:[#allocation2 + $0x20] sm:$0xff] %vm269_vm1, %v9800_v1 }
  0xf8   : > { %8904 = vmatprep.mubr.msk.f32.mxu0 %vm269_vm1, %v10529_v9 }
  0xf9   : > { %8731 = vmatmul.mubr.msk.f32.gmra.mrb[28].mxu1 %vm269_vm1, %v10210_v38  ;;  %v3261_v38 = vld [vmem:[#allocation2 + $0x2d] sm:$0xff] }
  0xfa   : > { %8733 = vmatprep.mubr.msk.f32.mxu1 %vm269_vm1, %v10212_v40  ;;  %v10596_v40 = vld [vmem:[#allocation2 + $0x2e] sm:$0xff] }
  0xfb   : > { %8905 = vmatmul.mubr.msk.f32.gmra.mrb[32].mxu0 %vm269_vm1, %v10539_v10  ;;  %5010 = vst.msk [vmem:[#allocation2 + $0x28] sm:$0xff] %vm269_vm1, %v9800_v1 }
  0xfc   : > { %8907 = vmatprep.mubr.msk.f32.mxu0 %vm269_vm1, %v10541_v11 }
  0xfd   : > { %8734 = vmatmul.mubr.msk.f32.gmra.mrb[30].mxu1 %vm269_vm1, %v10220_v42  ;;  %v3262_v42 = vld [vmem:[#allocation2 + $0x35] sm:$0xff] }
  0xfe   : > { %8736 = vmatprep.mubr.msk.f32.mxu1 %vm269_vm1, %v10222_v44  ;;  %v10602_v44 = vld [vmem:[#allocation2 + $0x36] sm:$0xff] }
  0xff   : > { %8908 = vmatmul.mubr.msk.f32.gmra.mrb[38].mxu0 %vm269_vm1, %v10551_v21  ;;  %5011 = vst.msk [vmem:[#allocation2 + $0x30] sm:$0xff] %vm269_vm1, %v9800_v1 }
 0x100   : > { %8912 = vmatprep.mubr.msk.f32.mxu0 %vm269_vm1, %v10345_v55  ;;  %v3271_v55 = vld [vmem:[#allocation2 + $0x7d] sm:$0xff] }
 0x101   : > { %8737 = vmatmul.mubr.msk.f32.gmra.mrb[32].mxu1 %vm269_vm1, %v10230_v47  ;;  %v3263_v47 = vld [vmem:[#allocation2 + $0x3d] sm:$0xff] }
 0x102   : > { %5012 = vst.msk [vmem:[#allocation2 + $0x38] sm:$0xff] %vm269_vm1, %v9800_v1  ;;  %5013 = vst.msk [vmem:[#allocation2 + $0x40] sm:$0xff] %vm269_vm1, %v9800_v1 }
 0x103   : > { %8913 = vmatmul.mubr.msk.f32.vlgmr.msra.gmra.mrb[0].mxu0 %vm269_vm1, %v10358_v17  ;;  %v3274_v17 = vld [vmem:[#allocation2 + $0x95] sm:$0xff] }
 0x104   : > { %8915 = vmatprep.mubr.msk.f32.mxu0 %vm269_vm1, %v10362_v19  ;;  %8967 = vmatpush3.msk.msra.mxu0 %vm529_vm0, %v10351_v57  ;;  %v3272_v57 = vld [vmem:[#allocation2 + $0x85] sm:$0xff] }
 0x105   : > { %9022 = vmatprep.subr.msk.mxu0 %vm529_vm0, %v10566_v23  ;;  %v3276_v19 = vld [vmem:[#allocation2 + $0xa5] sm:$0xff] }
 0x107   : > { %8916 = vmatmul.mubr.msk.f32.gmra.mrb[2].mxu0 %vm269_vm1, %v10372_v63  ;;  %v3278_v63 = vld [vmem:[#allocation2 + $0xb5] sm:$0xff] }
 0x108   : > { %8918 = vmatprep.mubr.msk.f32.mxu0 %vm269_vm1, %v10374_v8  ;;  %v3279_v8 = vld [vmem:[#allocation2 + $0xbd] sm:$0xff] }
 0x10b   : > { %8919 = vmatmul.mubr.msk.f32.gmra.mrb[4].mxu0 %vm269_vm1, %v10383_v2  ;;  %v3280_v2 = vld [vmem:[#allocation2 + $0xc5] sm:$0xff] }
 0x10c   : > { %8921 = vmatprep.mubr.msk.f32.mxu0 %vm269_vm1, %v10385_v4  ;;  %v3281_v4 = vld [vmem:[#allocation2 + $0xcd] sm:$0xff] }
 0x10f   : > { %8922 = vmatmul.mubr.msk.f32.gmra.mrb[6].mxu0 %vm269_vm1, %v10395_v43  ;;  %v3282_v43 = vld [vmem:[#allocation2 + $0xd5] sm:$0xff] }
 0x110   : > { %8924 = vmatprep.mubr.msk.f32.mxu0 %vm269_vm1, %v10397_v6  ;;  %v3283_v6 = vld [vmem:[#allocation2 + $0xdd] sm:$0xff] }
 0x113   : > { %8925 = vmatmul.mubr.msk.f32.gmra.mrb[8].mxu0 %vm269_vm1, %v10407_v28  ;;  %v3284_v28 = vld [vmem:[#allocation2 + $0xe5] sm:$0xff] }
 0x114   : > { %8927 = vmatprep.mubr.msk.f32.mxu0 %vm269_vm1, %v10409_v45  ;;  %v3285_v45 = vld [vmem:[#allocation2 + $0xed] sm:$0xff] }
 0x117   : > { %8928 = vmatmul.mubr.msk.f32.gmra.mrb[10].mxu0 %vm269_vm1, %v10419_v29  ;;  %v3286_v29 = vld [vmem:[#allocation2 + $0xf5] sm:$0xff] }
 0x118   : > { %8930 = vmatprep.mubr.msk.f32.mxu0 %vm269_vm1, %v10421_v30  ;;  %v3287_v30 = vld [vmem:[#allocation2 + $0xfd] sm:$0xff] }
 0x11b   : > { %8931 = vmatmul.mubr.msk.f32.gmra.mrb[12].mxu0 %vm269_vm1, %v10431_v32  ;;  %v3288_v32 = vld [vmem:[#allocation2 + $0x105] sm:$0xff] }
 0x11c   : > { %8933 = vmatprep.mubr.msk.f32.mxu0 %vm269_vm1, %v10433_v33  ;;  %v3289_v33 = vld [vmem:[#allocation2 + $0x10d] sm:$0xff] }
 0x11f   : > { %8934 = vmatmul.mubr.msk.f32.gmra.mrb[14].mxu0 %vm269_vm1, %v10443_v34  ;;  %v3290_v34 = vld [vmem:[#allocation2 + $0x115] sm:$0xff] }
 0x120   : > { %8936 = vmatprep.mubr.msk.f32.mxu0 %vm269_vm1, %v10445_v35  ;;  %v3291_v35 = vld [vmem:[#allocation2 + $0x11d] sm:$0xff] }
 0x123   : > { %8937 = vmatmul.mubr.msk.f32.gmra.mrb[16].mxu0 %vm269_vm1, %v10455_v36  ;;  %v3292_v36 = vld [vmem:[#allocation2 + $0x125] sm:$0xff] }
 0x124   : > { %8939 = vmatprep.mubr.msk.f32.mxu0 %vm269_vm1, %v10457_v46  ;;  %v3293_v46 = vld [vmem:[#allocation2 + $0x12d] sm:$0xff] }
 0x127   : > { %8940 = vmatmul.mubr.msk.f32.gmra.mrb[18].mxu0 %vm269_vm1, %v10467_v50  ;;  %v3294_v50 = vld [vmem:[#allocation2 + $0x135] sm:$0xff] }
 0x128   : > { %8942 = vmatprep.mubr.msk.f32.mxu0 %vm269_vm1, %v10469_v52 }
 0x12b   : > { %8943 = vmatmul.mubr.msk.f32.gmra.mrb[20].mxu0 %vm269_vm1, %v10479_v54 }
 0x12c   : > { %8945 = vmatprep.mubr.msk.f32.mxu0 %vm269_vm1, %v10481_v56  ;;  %v3295_v56 = vld [vmem:[#allocation2 + $0x13d] sm:$0xff] }
 0x12f   : > { %8946 = vmatmul.mubr.msk.f32.gmra.mrb[22].mxu0 %vm269_vm1, %v10491_v58 }
 0x130   : > { %8948 = vmatprep.mubr.msk.f32.mxu0 %vm269_vm1, %v10493_v60 }
 0x133   : > { %8949 = vmatmul.mubr.msk.f32.gmra.mrb[24].mxu0 %vm269_vm1, %v10503_v62 }
 0x134   : > { %8951 = vmatprep.mubr.msk.f32.mxu0 %vm269_vm1, %v10505_v0 }
 0x137   : > { %8952 = vmatmul.mubr.msk.f32.gmra.mrb[26].mxu0 %vm269_vm1, %v10515_v3  ;;  %v3693_v3 = vld [vmem:[#allocation2 + $0x5e] sm:$0xff] }
 0x138   : > { %8954 = vmatprep.mubr.msk.f32.mxu0 %vm269_vm1, %v10517_v5  ;;  %v3694_v5 = vld [vmem:[#allocation2 + $0x66] sm:$0xff] }
 0x13b   : > { %8955 = vmatmul.mubr.msk.f32.gmra.mrb[28].mxu0 %vm269_vm1, %v10527_v7 }
 0x13c   : > { %8957 = vmatprep.mubr.msk.f32.mxu0 %vm269_vm1, %v10529_v9 }
 0x13f   : > { %8958 = vmatmul.mubr.msk.f32.gmra.mrb[30].mxu0 %vm269_vm1, %v10539_v10  ;;  %v3695_v10 = vld [vmem:[#allocation2 + $0x6e] sm:$0xff] }
 0x140   : > { %8960 = vmatprep.mubr.msk.f32.mxu0 %vm269_vm1, %v10541_v11  ;;  %v3696_v11 = vld [vmem:[#allocation2 + $0x76] sm:$0xff] }
 0x142   : > { %v8797_v31 = vpop.f32.mrb[34].mxu0 }
 0x143   : > { %v1941_v26 = vpop.f32.mrb[35].mxu0  ;;  %8961 = vmatmul.mubr.msk.f32.gmra.mrb[32].mxu0 %vm269_vm1, %v10551_v21 }
 0x144   : > { %8963 = vmatprep.mubr.msk.f32.mxu0 %vm269_vm1, %v2868_v24  ;;  %v3705_v26 = vld [vmem:[#allocation2 + $0xbe] sm:$0xff] }
 0x147   : > { %8964 = vmatmul.mubr.msk.f32.gmra.mrb[40].mxu0 %vm269_vm1, %v2869_v37  ;;  %v3706_v37 = vld [vmem:[#allocation2 + $0xc6] sm:$0xff] }
 0x148   : > { %8968 = vmatprep.mubr.msk.f32.mxu0 %vm269_vm1, %v3260_v25  ;;  %v8629_v39 = vpop.f32.mrb[34].mxu1  ;;  %v3697_v25 = vld [vmem:[#allocation2 + $0x7e] sm:$0xff] }
 0x149   : > { %v769_v41 = vpop.f32.mrb[35].mxu1 }
 0x14b   : > { %8969 = vmatmul.mubr.msk.f32.vlgmr.msra.gmra.mrb[0].mxu0 %vm269_vm1, %v3261_v38 }
 0x14c   : > { %8971 = vmatprep.mubr.msk.f32.mxu0 %vm269_vm1, %v3262_v42  ;;  %9023 = vmatpush3.msk.msra.mxu0 %vm529_vm0, %v10566_v23  ;;  %v3699_v42 = vld [vmem:[#allocation2 + $0x8e] sm:$0xff] }
 0x14f   : > { %8972 = vmatmul.mubr.msk.f32.gmra.mrb[2].mxu0 %vm269_vm1, %v3263_v47 }
 0x150   : > { %8974 = vmatprep.mubr.msk.f32.mxu0 %vm269_vm1, %v3264_v13  ;;  %v3701_v13 = vld [vmem:[#allocation2 + $0x9e] sm:$0xff] }
 0x153   : > { %8975 = vmatmul.mubr.msk.f32.gmra.mrb[4].mxu0 %vm269_vm1, %v3265_v16 }
 0x154   : > { %8977 = vmatprep.mubr.msk.f32.mxu0 %vm269_vm1, %v3266_v20  ;;  %v3703_v20 = vld [vmem:[#allocation2 + $0xae] sm:$0xff] }
 0x157   : > { %8978 = vmatmul.mubr.msk.f32.gmra.mrb[6].mxu0 %vm269_vm1, %v3267_v48  ;;  %v3707_v48 = vld [vmem:[#allocation2 + $0xce] sm:$0xff] }
 0x158   : > { %8980 = vmatprep.mubr.msk.f32.mxu0 %vm269_vm1, %v3268_v49  ;;  %v3708_v49 = vld [vmem:[#allocation2 + $0xd6] sm:$0xff] }
 0x15b   : > { %8981 = vmatmul.mubr.msk.f32.gmra.mrb[8].mxu0 %vm269_vm1, %v3269_v51 }
 0x15c   : > { %8983 = vmatprep.mubr.msk.f32.mxu0 %vm269_vm1, %v3270_v53 }
 0x15f   : > { %8984 = vmatmul.mubr.msk.f32.gmra.mrb[10].mxu0 %vm269_vm1, %v3271_v55  ;;  %v3709_v55 = vld [vmem:[#allocation2 + $0xde] sm:$0xff] }
 0x160   : > { %8986 = vmatprep.mubr.msk.f32.mxu0 %vm269_vm1, %v3272_v57  ;;  %v3710_v57 = vld [vmem:[#allocation2 + $0xe6] sm:$0xff] }
 0x163   : > { %8987 = vmatmul.mubr.msk.f32.gmra.mrb[12].mxu0 %vm269_vm1, %v3273_v59 }
 0x164   : > { %8989 = vmatprep.mubr.msk.f32.mxu0 %vm269_vm1, %v3274_v17 }
 0x167   : > { %8990 = vmatmul.mubr.msk.f32.gmra.mrb[14].mxu0 %vm269_vm1, %v3275_v61  ;;  %v3711_v61 = vld [vmem:[#allocation2 + $0xee] sm:$0xff] }
 0x168   : > { %8992 = vmatprep.mubr.msk.f32.mxu0 %vm269_vm1, %v3276_v19  ;;  %v3712_v19 = vld [vmem:[#allocation2 + $0xf6] sm:$0xff] }
 0x16b   : > { %8993 = vmatmul.mubr.msk.f32.gmra.mrb[16].mxu0 %vm269_vm1, %v3277_v18 }
 0x16c   : > { %8995 = vmatprep.mubr.msk.f32.mxu0 %vm269_vm1, %v3278_v63 }
 0x16f   : > { %8996 = vmatmul.mubr.msk.f32.gmra.mrb[18].mxu0 %vm269_vm1, %v3279_v8  ;;  %v3713_v8 = vld [vmem:[#allocation2 + $0xfe] sm:$0xff] }
 0x170   : > { %8998 = vmatprep.mubr.msk.f32.mxu0 %vm269_vm1, %v3280_v2  ;;  %v3714_v2 = vld [vmem:[#allocation2 + $0x106] sm:$0xff] }
 0x173   : > { %8999 = vmatmul.mubr.msk.f32.gmra.mrb[20].mxu0 %vm269_vm1, %v3281_v4 }
 0x174   : > { %9001 = vmatprep.mubr.msk.f32.mxu0 %vm269_vm1, %v3282_v43 }
 0x177   : > { %9002 = vmatmul.mubr.msk.f32.gmra.mrb[22].mxu0 %vm269_vm1, %v3283_v6  ;;  %v3715_v6 = vld [vmem:[#allocation2 + $0x10e] sm:$0xff] }
 0x178   : > { %9004 = vmatprep.mubr.msk.f32.mxu0 %vm269_vm1, %v3284_v28  ;;  %v3716_v28 = vld [vmem:[#allocation2 + $0x116] sm:$0xff] }
 0x17b   : > { %9005 = vmatmul.mubr.msk.f32.gmra.mrb[24].mxu0 %vm269_vm1, %v3285_v45 }
 0x17c   : > { %9007 = vmatprep.mubr.msk.f32.mxu0 %vm269_vm1, %v3286_v29 }
 0x17f   : > { %9008 = vmatmul.mubr.msk.f32.gmra.mrb[26].mxu0 %vm269_vm1, %v3287_v30  ;;  %v3717_v30 = vld [vmem:[#allocation2 + $0x11e] sm:$0xff] }
 0x180   : > { %9010 = vmatprep.mubr.msk.f32.mxu0 %vm269_vm1, %v3288_v32  ;;  %v3718_v32 = vld [vmem:[#allocation2 + $0x126] sm:$0xff] }
 0x183   : > { %9011 = vmatmul.mubr.msk.f32.gmra.mrb[28].mxu0 %vm269_vm1, %v3289_v33 }
 0x184   : > { %9013 = vmatprep.mubr.msk.f32.mxu0 %vm269_vm1, %v3290_v34 }
 0x187   : > { %9014 = vmatmul.mubr.msk.f32.gmra.mrb[30].mxu0 %vm269_vm1, %v3291_v35  ;;  %v3719_v35 = vld [vmem:[#allocation2 + $0x12e] sm:$0xff] }
 0x188   : > { %9016 = vmatprep.mubr.msk.f32.mxu0 %vm269_vm1, %v3292_v36 }
 0x18a   : > { %v8853_v52 = vpop.f32.mrb[36].mxu0 }
 0x18b   : > { %v2367_v54 = vpop.f32.mrb[37].mxu0  ;;  %9017 = vmatmul.mubr.msk.f32.gmra.mrb[32].mxu0 %vm269_vm1, %v3293_v46 }
 0x18c   : > { %9019 = vmatprep.mubr.msk.f32.mxu0 %vm269_vm1, %v3294_v50 }
 0x18f   : > { %9020 = vmatmul.mubr.msk.f32.gmra.mrb[42].mxu0 %vm269_vm1, %v3295_v56 }
 0x190   : > { %9024 = vmatprep.mubr.msk.f32.mxu0 %vm269_vm1, %v10590_v27  ;;  %v8685_v58 = vpop.f32.mrb[36].mxu1  ;;  %v3698_v27 = vld [vmem:[#allocation2 + $0x86] sm:$0xff] }
 0x191   : > { %v1123_v60 = vpop.f32.mrb[37].mxu1 }
 0x193   : > { %9025 = vmatmul.mubr.msk.f32.vlgmr.msra.gmra.mrb[0].mxu0 %vm269_vm1, %v10596_v40 }
 0x194   : > { %9027 = vmatprep.mubr.msk.f32.mxu0 %vm269_vm1, %v10602_v44  ;;  %v10721_v62 = vpop.f32.mrb[0].mxu1  ;;  %v3700_v44 = vld [vmem:[#allocation2 + $0x96] sm:$0xff] }
 0x195   : > { %v10723_v0 = vpop.f32.mrb[1].mxu1 }
 0x197   : > { %9028 = vmatmul.mubr.msk.f32.gmra.mrb[2].mxu0 %vm269_vm1, %v10608_v12 }
 0x198   : > { %9030 = vmatprep.mubr.msk.f32.mxu0 %vm269_vm1, %v10614_v14  ;;  %v10729_v7 = vpop.f32.mrb[2].mxu1  ;;  %v3702_v14 = vld [vmem:[#allocation2 + $0xa6] sm:$0xff] }
 0x199   : > { %v10731_v9 = vpop.f32.mrb[3].mxu1 }
 0x19b   : > { %9031 = vmatmul.mubr.msk.f32.gmra.mrb[4].mxu0 %vm269_vm1, %v10620_v15 }
 0x19c   : > { %9033 = vmatprep.mubr.msk.f32.mxu0 %vm269_vm1, %v10626_v22  ;;  %v10735_v21 = vpop.f32.mrb[4].mxu1  ;;  %v3704_v22 = vld [vmem:[#allocation2 + $0xb6] sm:$0xff] }
 0x19d   : > { %v10737_v23 = vpop.f32.mrb[5].mxu1 }
 0x19f   : > { %9034 = vmatmul.mubr.msk.f32.gmra.mrb[6].mxu0 %vm269_vm1, %v3693_v3  ;;  %v9801_v3 = vmov 0.0|0.0  }
 0x1a0   : > { %9036 = vmatprep.mubr.msk.f32.mxu0 %vm269_vm1, %v3694_v5  ;;  %v10741_v38 = vpop.f32.mrb[6].mxu1  ;;  %9313 = vmatprep.subr.bf16.mxu1 %v9801_v3  ;;  %v1164_v5 = vld [vmem:[#allocation2 + $0x112] sm:$0xff] }
 0x1a1   : > { %v10743_v40 = vpop.f32.mrb[7].mxu1  ;;  %8739 = vmatprep.mubr.msk.f32.mxu1 %vm269_vm1, %v1164_v5 }
 0x1a3   : > { %9037 = vmatmul.mubr.msk.f32.gmra.mrb[8].mxu0 %vm269_vm1, %v3695_v10  ;;  %v1165_v10 = vld [vmem:[#allocation2 + $0x11a] sm:$0xff] }
 0x1a4   : > { %9039 = vmatprep.mubr.msk.f32.mxu0 %vm269_vm1, %v3696_v11  ;;  %v10747_v47 = vpop.f32.mrb[8].mxu1  ;;  %8740 = vmatmul.mubr.msk.f32.gmra.mrb[38].mxu1 %vm269_vm1, %v1165_v10 }
 0x1a5   : > { %v10749_v12 = vpop.f32.mrb[9].mxu1  ;;  %9082 = vmatprep.mubr.msk.f32.mxu1 %vm9802_vm3, %v9800_v1 }
 0x1a7   : > { %9040 = vmatmul.mubr.msk.f32.gmra.mrb[10].mxu0 %vm269_vm1, %v3697_v25 }
 0x1a8   : > { %9042 = vmatprep.mubr.msk.f32.mxu0 %vm269_vm1, %v3698_v27  ;;  %v10753_v16 = vpop.f32.mrb[10].mxu1 }
 0x1a9   : > { %v10755_v15 = vpop.f32.mrb[11].mxu1 }
 0x1ab   : > { %9043 = vmatmul.mubr.msk.f32.gmra.mrb[12].mxu0 %vm269_vm1, %v3699_v42 }
 0x1ac   : > { %9045 = vmatprep.mubr.msk.f32.mxu0 %vm269_vm1, %v3700_v44  ;;  %v10759_v24 = vpop.f32.mrb[12].mxu1 }
 0x1ad   : > { %v10761_v31 = vpop.f32.mrb[13].mxu1 }
 0x1af   : > { %9046 = vmatmul.mubr.msk.f32.gmra.mrb[14].mxu0 %vm269_vm1, %v3701_v13 }
 0x1b0   : > { %9048 = vmatprep.mubr.msk.f32.mxu0 %vm269_vm1, %v3702_v14  ;;  %v10765_v39 = vpop.f32.mrb[14].mxu1 }
 0x1b1   : > { %v10767_v41 = vpop.f32.mrb[15].mxu1 }
 0x1b3   : > { %9049 = vmatmul.mubr.msk.f32.gmra.mrb[16].mxu0 %vm269_vm1, %v3703_v20 }
 0x1b4   : > { %9051 = vmatprep.mubr.msk.f32.mxu0 %vm269_vm1, %v3704_v22  ;;  %v10771_v51 = vpop.f32.mrb[16].mxu1 }
 0x1b5   : > { %v10773_v53 = vpop.f32.mrb[17].mxu1 }
 0x1b7   : > { %9052 = vmatmul.mubr.msk.f32.gmra.mrb[18].mxu0 %vm269_vm1, %v3705_v26 }
 0x1b8   : > { %9054 = vmatprep.mubr.msk.f32.mxu0 %vm269_vm1, %v3706_v37  ;;  %v10777_v59 = vpop.f32.mrb[18].mxu1 }
 0x1b9   : > { %v10779_v17 = vpop.f32.mrb[19].mxu1 }
 0x1bb   : > { %9055 = vmatmul.mubr.msk.f32.gmra.mrb[20].mxu0 %vm269_vm1, %v3707_v48  ;;  %v10831_v48 = vld [vmem:[%s11381_s2] ss:$0 sm:$0xff] }
 0x1bc   : > { %9057 = vmatprep.mubr.msk.f32.mxu0 %vm269_vm1, %v3708_v49  ;;  %v10783_v18 = vpop.f32.mrb[20].mxu1 }
 0x1bd   : > { %v10785_v63 = vpop.f32.mrb[21].mxu1 }
 0x1bf   : > { %9058 = vmatmul.mubr.msk.f32.gmra.mrb[22].mxu0 %vm269_vm1, %v3709_v55 }
 0x1c0   : > { %9060 = vmatprep.mubr.msk.f32.mxu0 %vm269_vm1, %v3710_v57  ;;  %v10789_v4 = vpop.f32.mrb[22].mxu1 }
 0x1c1   : > { %v10791_v43 = vpop.f32.mrb[23].mxu1 }
 0x1c3   : > { %9061 = vmatmul.mubr.msk.f32.gmra.mrb[24].mxu0 %vm269_vm1, %v3711_v61 }
 0x1c4   : > { %9063 = vmatprep.mubr.msk.f32.mxu0 %vm269_vm1, %v3712_v19  ;;  %v10795_v45 = vpop.f32.mrb[24].mxu1 }
 0x1c5   : > { %v10797_v29 = vpop.f32.mrb[25].mxu1 }
 0x1c7   : > { %9064 = vmatmul.mubr.msk.f32.gmra.mrb[26].mxu0 %vm269_vm1, %v3713_v8 }
 0x1c8   : > { %9066 = vmatprep.mubr.msk.f32.mxu0 %vm269_vm1, %v3714_v2  ;;  %v10801_v33 = vpop.f32.mrb[26].mxu1 }
 0x1c9   : > { %v10803_v34 = vpop.f32.mrb[27].mxu1 }
 0x1cb   : > { %9067 = vmatmul.mubr.msk.f32.gmra.mrb[28].mxu0 %vm269_vm1, %v3715_v6 }
 0x1cc   : > { %9069 = vmatprep.mubr.msk.f32.mxu0 %vm269_vm1, %v3716_v28  ;;  %v10807_v36 = vpop.f32.mrb[28].mxu1 }
 0x1cd   : > { %v10809_v50 = vpop.f32.mrb[29].mxu1 }
 0x1cf   : > { %9070 = vmatmul.mubr.msk.f32.gmra.mrb[30].mxu0 %vm269_vm1, %v3717_v30 }
 0x1d0   : > { %9072 = vmatprep.mubr.msk.f32.mxu0 %vm269_vm1, %v3718_v32  ;;  %v10812_v54 = vpop.f32.mrb[30].mxu1 }
 0x1d1   : > { %v10814_v56 = vpop.f32.mrb[31].mxu1 }
 0x1d2   : > { %v8909_v46 = vpop.f32.mrb[38].mxu0 }
 0x1d3   : > { %v2793_v52 = vpop.f32.mrb[39].mxu0  ;;  %9073 = vmatmul.mubr.msk.f32.gmra.mrb[32].mxu0 %vm269_vm1, %v3719_v35 }
 0x1d4   : > { %v10816_v58 = vpop.f32.mrb[32].mxu1 }
 0x1d5   : > { %v10818_v60 = vpop.f32.mrb[33].mxu1 }
 0x21a   : > { %v8965_v11 = vpop.f32.mrb[40].mxu0 }
 0x21b   : > { %v3219_v25 = vpop.f32.mrb[41].mxu0 }
 0x262   : > { %v9021_v27 = vpop.f32.mrb[42].mxu0 }
 0x263   : > { %v3645_v42 = vpop.f32.mrb[43].mxu0 }
 0x266   : > { %v9026_v44 = vpop.f32.mrb[0].mxu0 }
 0x267   : > { %v9341_v13 = vadd.f32 %v9026_v44, %v10721_v62  ;;  %v3901_v14 = vpop.f32.mrb[1].mxu0  ;;  %v4153_v62 = vlaneseq }
 0x268   : > { %v9342_v20 = vadd.f32 %v3901_v14, %v10723_v0 }
 0x269   : > { %v4154_v35 = vshrl.u32 %v4153_v62, 7  ;;  %v4120_v25 = vadd.f32 %v9341_v13, %v10831_v48  ;;  %v4156_v42 = vand.u32 127, %v4153_v62 }
 0x26a   : > { %v9029_v22 = vpop.f32.mrb[2].mxu0  ;;  %v4119_v6 = vadd.f32 %v9342_v20, %v10831_v48 }
 0x26b   : > { %v9343_v26 = vadd.f32 %v9029_v22, %v10729_v7  ;;  %v3911_v37 = vpop.f32.mrb[3].mxu0 }
 0x26c   : > { %v9344_v49 = vadd.f32 %v3911_v37, %v10731_v9 }
 0x26d   : > { %v4122_v55 = vadd.f32 %v9343_v26, %v10831_v48  ;;  %v4157_v26 = vmul.u32 2, %v4154_v35 }
 0x26e   : > { %v4121_v57 = vadd.f32 %v9344_v49, %v10831_v48  ;;  %v9032_v61 = vpop.f32.mrb[4].mxu0 }
 0x26f   : > { %v4166_v19 = vrot.slane %v4122_v55, 2  ;;  %v9345_v0 = vadd.f32 %v9032_v61, %v10735_v21  ;;  %v3921_v8 = vpop.f32.mrb[5].mxu0  ;;  %vm4158_vm5 = vcmp.eq.s32.totalorder %v4156_v42, %v4157_v26 }
 0x270   : > { %v4165_v7 = vrot.slane %v4121_v57, 2  ;;  %v9346_v2 = vadd.f32 %v3921_v8, %v10737_v23 }
 0x271   : > { %v10840_v28 = vadd.f32 %v9345_v0, %v10831_v48 }
 0x272   : > { %v4167_v9 = vsel %vm4164_vm4, %v4165_v7, %v4166_v19  ;;  %v4123_v30 = vadd.f32 %v9346_v2, %v10831_v48  ;;  %v9035_v32 = vpop.f32.mrb[6].mxu0 }
 0x273   : > { %v4172_v46 = vmax.f32 %v4119_v6, %v4167_v9  ;;  %v4177_v52 = vrot.slane %v10840_v28, 4  ;;  %v9347_v21 = vadd.f32 %v9035_v32, %v10741_v38  ;;  %v3931_v5 = vpop.f32.mrb[7].mxu0 }
 0x274   : > { %v4168_v10 = vrot.slane %v4123_v30, 2  ;;  %v4176_v11 = vrot.slane %v4123_v30, 4  ;;  %v9348_v23 = vadd.f32 %v3931_v5, %v10743_v40  ;;  %v10866_v5 = vsel %vm4158_vm5, 1.0, %v9800_v1 }
 0x275   : > { %v4126_v27 = vadd.f32 %v9347_v21, %v10831_v48 }
 0x276   : > { %v4169_v44 = vsel %vm4164_vm4, %v4166_v19, %v4168_v10  ;;  %v4178_v14 = vsel %vm529_vm0, %v4176_v11, %v4177_v52  ;;  %v4125_v20 = vadd.f32 %v9348_v23, %v10831_v48  ;;  %v9038_v22 = vpop.f32.mrb[8].mxu0 }
 0x277   : > { %v4173_v37 = vmax.f32 %v4120_v25, %v4169_v44  ;;  %v4183_v38 = vmax.f32 %v4172_v46, %v4178_v14  ;;  %v4282_v49 = vrot.slane %v4126_v27, 2  ;;  %v9349_v55 = vadd.f32 %v9038_v22, %v10747_v47  ;;  %v3941_v57 = vpop.f32.mrb[9].mxu0 }
 0x278   : > { %v4179_v40 = vrot.slane %v4125_v20, 4  ;;  %v4281_v61 = vrot.slane %v4125_v20, 2  ;;  %v9350_v13 = vadd.f32 %v3941_v57, %v10749_v12 }
 0x279   : > { %v10855_v62 = vadd.f32 %v9349_v55, %v10831_v48  ;;  %v4188_v10 = vrot.slane %v4183_v38, 1  ;;  %v4195_v25 = vrot.slane %v4183_v38, 2 }
 0x27a   : > { %v4180_v19 = vsel %vm529_vm0, %v4177_v52, %v4179_v40  ;;  %v4283_v0 = vsel %vm4164_vm4, %v4281_v61, %v4282_v49  ;;  %v4127_v8 = vadd.f32 %v9350_v13, %v10831_v48  ;;  %v9041_v7 = vpop.f32.mrb[10].mxu0 }
 0x27b   : > { %v4184_v2 = vmax.f32 %v4173_v37, %v4180_v19  ;;  %v4289_v6 = vmax.f32 %v4123_v30, %v4283_v0  ;;  %v4294_v47 = vrot.slane %v10855_v62, 4  ;;  %v9351_v9 = vadd.f32 %v9041_v7, %v10753_v16  ;;  %v3951_v32 = vpop.f32.mrb[11].mxu0 }
 0x27c   : > { %v4284_v35 = vrot.slane %v4127_v8, 2  ;;  %v9352_v12 = vadd.f32 %v3951_v32, %v10755_v15 }
 0x27d   : > { %v4189_v46 = vrot.slane %v4184_v2, 1  ;;  %v10863_v21 = vmax.f32 %v4289_v6, %v4294_v47  ;;  %v4196_v52 = vrot.slane %v4184_v2, 2  ;;  %v4130_v42 = vadd.f32 %v9351_v9, %v10831_v48 }
 0x27e   : > { %v4285_v11 = vsel %vm4164_vm4, %v4282_v49, %v4284_v35  ;;  %v4291_v30 = vmax.f32 %v4125_v20, %v4284_v35  ;;  %v10870_v23 = vadd.f32 %v9352_v12, %v10831_v48  ;;  %v9044_v16 = vpop.f32.mrb[12].mxu0 }
 0x27f   : > { %v4306_v27 = vrot.slane %v10863_v21, 1  ;;  %v4290_v15 = vmax.f32 %v10840_v28, %v4285_v11  ;;  %v3961_v44 = vpop.f32.mrb[13].mxu0  ;;  %v9353_v22 = vadd.f32 %v9044_v16, %v10759_v24  ;;  %v4190_v20 = vsel %vm4187_vm6, %v4188_v10, %v4189_v46 }
 0x280   : > { %v4295_v14 = vrot.slane %v10870_v23, 4  ;;  %v9354_v26 = vadd.f32 %v3961_v44, %v10761_v31  ;;  %v4317_v37 = vrot.slane %v10863_v21, 2  ;;  %v4193_v49 = vmax.f32 %v4183_v38, %v4190_v20 }
 0x281   : > { %v4194_v55 = vmax.f32 %v4184_v2, %v4189_v46  ;;  %v4197_v57 = vsel %vm4164_vm4, %v4195_v25, %v4196_v52  ;;  %v10883_v61 = vadd.f32 %v9353_v22, %v10831_v48  ;;  %v4412_v6 = vrot.slane %v4130_v42, 2  ;;  %v5034_v46 = vld [vmem:[%s11380_s1] sm:$0xf] }
 0x282   : > { %v4296_v28 = vsel %vm529_vm0, %v4294_v47, %v4295_v14  ;;  %v4302_v40 = vmax.f32 %v4291_v30, %v4295_v14  ;;  %v4131_v13 = vadd.f32 %v9354_v26, %v10831_v48  ;;  %v9047_v24 = vpop.f32.mrb[14].mxu0  ;;  %v4200_v8 = vmax.f32 %v4193_v49, %v4197_v57 }
 0x283   : > { %v4301_v19 = vmax.f32 %v4290_v15, %v4296_v28  ;;  %v9355_v31 = vadd.f32 %v9047_v24, %v10765_v39  ;;  %v3971_v0 = vpop.f32.mrb[15].mxu0  ;;  %v4201_v7 = vmax.f32 %v4194_v55, %v4196_v52  ;;  %v4415_v9 = vrot.slane %v10883_v61, 2 }
 0x284   : > { %v4309_v38 = vrot.slane %v4302_v40, 1  ;;  %v4320_v2 = vrot.slane %v4302_v40, 2  ;;  %v4413_v35 = vrot.slane %v4131_v13, 2  ;;  %v4423_v10 = vrot.slane %v10883_v61, 4 }
 0x285   : > { %v4307_v32 = vrot.slane %v4301_v19, 1  ;;  %v4318_v47 = vrot.slane %v4301_v19, 2  ;;  %v4134_v12 = vadd.f32 %v9355_v31, %v10831_v48  ;;  %v9356_v52 = vadd.f32 %v3971_v0, %v10767_v41 }
 0x286   : > { %v4316_v39 = vmax.f32 %v4302_v40, %v4309_v38  ;;  %v9050_v11 = vpop.f32.mrb[16].mxu0  ;;  %v9314_v30 = vpack.c.bf16 %v4201_v7, %v4200_v8  ;;  %v4414_v42 = vsel %vm4164_vm4, %v4412_v6, %v4413_v35  ;;  %v4416_v26 = vsel %vm4164_vm4, %v4413_v35, %v4415_v9 }
 0x287   : > { %v4308_v16 = vsel %vm4187_vm6, %v4306_v27, %v4307_v32  ;;  %v4310_v25 = vsel %vm4187_vm6, %v4307_v32, %v4309_v38  ;;  %v4321_v15 = vsel %vm4164_vm4, %v4318_v47, %v4320_v2  ;;  %v3981_v44 = vpop.f32.mrb[17].mxu0  ;;  %v4419_v20 = vmax.f32 %v10855_v62, %v4414_v42 }
 0x288   : > { %v4315_v14 = vmax.f32 %v4301_v19, %v4310_v25  ;;  %v10900_v22 = vmax.f32 %v4316_v39, %v4320_v2  ;;  %9316 = vmatpush3.bf16.msk.msra.mxu1 %vm10890_vm9, %v9314_v30  ;;  %v4420_v41 = vmax.f32 %v10870_v23, %v4416_v26  ;;  %v4426_v27 = vrot.slane %v4134_v12, 4 }
 0x289   : > { %v4523_v49 = vrot.slane %v4134_v12, 2  ;;  %v4133_v55 = vadd.f32 %v9356_v52, %v10831_v48  ;;  %9317 = vmatprep.subr.bf16.mxu1 %v9801_v3  ;;  %v9357_v40 = vadd.f32 %v9050_v11, %v10771_v51  ;;  %v9358_v13 = vadd.f32 %v3981_v44, %v10773_v53 }
 0x28a   : > { %v4326_v57 = vmax.f32 %v4315_v14, %v4321_v15  ;;  %v4334_v28 = vrot.slane %v10900_v22, 4  ;;  %v9053_v24 = vpop.f32.mrb[18].mxu0  ;;  %v4314_v23 = vmax.f32 %v10863_v21, %v4308_v16  ;;  %v4319_v0 = vsel %vm4164_vm4, %v4317_v37, %v4318_v47 }
 0x28b   : > { %v4424_v62 = vrot.slane %v4133_v55, 4  ;;  %v9359_v19 = vadd.f32 %v9053_v24, %v10777_v59  ;;  %v3991_v31 = vpop.f32.mrb[19].mxu0  ;;  %9083 = vmatmul.mubr.msk.f32.vlgmr.msra.gmra.mrb[40].mxu1 %vm4202_vm7, %v10866_v5  ;;  %v4136_v7 = vadd.f32 %v9357_v40, %v10831_v48  ;;  %v4135_v6 = vadd.f32 %v9358_v13, %v10831_v48 }
 0x28c   : > { %v4332_v8 = vrot.slane %v4326_v57, 4  ;;  %v9360_v51 = vadd.f32 %v3991_v31, %v10779_v17  ;;  %9089 = vmatprep.mubr.msk.f32.mxu1 %vm9802_vm3, %v9800_v1  ;;  %v4325_v21 = vmax.f32 %v4314_v23, %v4319_v0 }
 0x28d   : > { %v4425_v53 = vsel %vm529_vm0, %v4423_v10, %v4424_v62  ;;  %v4427_v59 = vsel %vm529_vm0, %v4424_v62, %v4426_v27  ;;  %v10925_v38 = vadd.f32 %v9359_v19, %v10831_v48  ;;  %v4526_v9 = vrot.slane %v4136_v7, 2 }
 0x28e   : > { %v10927_v2 = vmax.f32 %v4419_v20, %v4425_v53  ;;  %v10929_v37 = vmax.f32 %v4420_v41, %v4427_v59  ;;  %v4524_v32 = vrot.slane %v4135_v6, 2  ;;  %v9056_v47 = vpop.f32.mrb[20].mxu0  ;;  %v10933_v35 = vadd.f32 %v9360_v51, %v10831_v48 }
 0x28f   : > { %v4537_v17 = vrot.slane %v10925_v38, 4  ;;  %v9361_v39 = vadd.f32 %v9056_v47, %v10783_v18  ;;  %v4001_v10 = vpop.f32.mrb[21].mxu0  ;;  %v4331_v52 = vrot.slane %v4325_v21, 4  ;;  %v4533_v15 = vmax.f32 %v4134_v12, %v4526_v9 }
 0x290   : > { %v4434_v11 = vrot.slane %v10927_v2, 1  ;;  %v4435_v30 = vrot.slane %v10929_v37, 1  ;;  %v4441_v16 = vrot.slane %v10927_v2, 2  ;;  %v4442_v25 = vrot.slane %v10929_v37, 2 }
 0x291   : > { %v4525_v42 = vsel %vm4164_vm4, %v4523_v49, %v4524_v32  ;;  %v4527_v44 = vsel %vm4164_vm4, %v4524_v32, %v4526_v9  ;;  %v4536_v14 = vrot.slane %v10933_v35, 4  ;;  %v4544_v57 = vmax.f32 %v4533_v15, %v4537_v17 }
 0x292   : > { %v4436_v22 = vsel %vm4187_vm6, %v4434_v11, %v4435_v30  ;;  %v4440_v18 = vmax.f32 %v10929_v37, %v4435_v30  ;;  %v4532_v26 = vmax.f32 %v4133_v55, %v4527_v44  ;;  %v4531_v20 = vmax.f32 %v10883_v61, %v4525_v42  ;;  %v9059_v41 = vpop.f32.mrb[22].mxu0 }
 0x293   : > { %v4439_v27 = vmax.f32 %v10927_v2, %v4436_v22  ;;  %v4538_v40 = vsel %vm529_vm0, %v4536_v14, %v4537_v17  ;;  %v4140_v12 = vadd.f32 %v9361_v39, %v10831_v48  ;;  %v4011_v49 = vpop.f32.mrb[23].mxu0  ;;  %v9362_v62 = vadd.f32 %v4001_v10, %v10785_v63 }
 0x294   : > { %v4542_v13 = vmax.f32 %v4531_v20, %v4536_v14  ;;  %v4543_v24 = vmax.f32 %v4532_v26, %v4538_v40  ;;  %v4333_v19 = vsel %vm529_vm0, %v4331_v52, %v4332_v8  ;;  %v4551_v31 = vrot.slane %v4544_v57, 1 }
 0x295   : > { %v4562_v23 = vrot.slane %v4544_v57, 2  ;;  %v4655_v55 = vrot.slane %v4140_v12, 2  ;;  %v4335_v61 = vsel %vm529_vm0, %v4332_v8, %v4334_v28  ;;  %v4139_v21 = vadd.f32 %v9362_v62, %v10831_v48 }
 0x296   : > { %v4548_v0 = vrot.slane %v4542_v13, 1  ;;  %v4549_v7 = vrot.slane %v4543_v24, 1  ;;  %v4559_v6 = vrot.slane %v4542_v13, 2  ;;  %v4560_v51 = vrot.slane %v4543_v24, 2  ;;  %v9062_v53 = vpop.f32.mrb[24].mxu0 }
 0x297   : > { %v4558_v59 = vmax.f32 %v4544_v57, %v4551_v31  ;;  %v9318_v2 = vpack.c.bf16 %v4335_v61, %v4333_v19  ;;  %v9363_v37 = vadd.f32 %v9059_v41, %v10789_v4  ;;  %v4021_v9 = vpop.f32.mrb[25].mxu0  ;;  %v4654_v10 = vrot.slane %v4139_v21, 2 }
 0x298   : > { %v4550_v63 = vsel %vm4187_vm6, %v4548_v0, %v4549_v7  ;;  %v4552_v32 = vsel %vm4187_vm6, %v4549_v7, %v4551_v31  ;;  %v4561_v47 = vsel %vm4164_vm4, %v4559_v6, %v4560_v51  ;;  %v4563_v28 = vsel %vm4164_vm4, %v4560_v51, %v4562_v23 }
 0x299   : > { %v10958_v8 = vmax.f32 %v4558_v59, %v4562_v23  ;;  %v4556_v17 = vmax.f32 %v4542_v13, %v4550_v63  ;;  %v4557_v39 = vmax.f32 %v4543_v24, %v4552_v32  ;;  %9320 = vmatpush3.bf16.msk.msra.mxu1 %vm10890_vm9, %v9318_v2  ;;  %v10963_v52 = vadd.f32 %v9363_v37, %v10831_v48 }
 0x29a   : > { %v9364_v4 = vadd.f32 %v4011_v49, %v10791_v43  ;;  %9321 = vmatprep.subr.bf16.mxu1 %v9801_v3  ;;  %v9365_v11 = vadd.f32 %v9062_v53, %v10795_v45  ;;  %v4443_v30 = vsel %vm4164_vm4, %v4441_v16, %v4442_v25  ;;  %v9065_v15 = vpop.f32.mrb[26].mxu0  ;;  %v4656_v14 = vsel %vm4164_vm4, %v4654_v10, %v4655_v55 }
 0x29b   : > { %v4567_v42 = vmax.f32 %v4556_v17, %v4561_v47  ;;  %v4568_v44 = vmax.f32 %v4557_v39, %v4563_v28  ;;  %v4031_v22 = vpop.f32.mrb[27].mxu0  ;;  %v4661_v26 = vmax.f32 %v10933_v35, %v4656_v14  ;;  %v4666_v20 = vrot.slane %v10963_v52, 4 }
 0x29c   : > { %v4141_v41 = vadd.f32 %v9364_v4, %v10831_v48  ;;  %v4144_v43 = vadd.f32 %v9365_v11, %v10831_v48  ;;  %9090 = vmatmul.mubr.msk.f32.vlgmr.msra.gmra.mrb[42].mxu1 %vm4202_vm7, %v10866_v5  ;;  %v4576_v45 = vrot.slane %v10958_v8, 4  ;;  %v4446_v57 = vmax.f32 %v4439_v27, %v4443_v30 }
 0x29d   : > { %v4573_v16 = vrot.slane %v4567_v42, 4  ;;  %v4447_v40 = vmax.f32 %v4440_v18, %v4442_v25  ;;  %9096 = vmatprep.mubr.msk.f32.mxu1 %vm9802_vm3, %v9800_v1  ;;  %v9366_v13 = vadd.f32 %v4021_v9, %v10797_v29  ;;  %v9367_v19 = vadd.f32 %v9065_v15, %v10801_v33 }
 0x29e   : > { %v4657_v12 = vrot.slane %v4141_v41, 2  ;;  %v4665_v49 = vrot.slane %v4141_v41, 4  ;;  %v4766_v35 = vrot.slane %v4144_v43, 2  ;;  %v9068_v24 = vpop.f32.mrb[28].mxu0  ;;  %v9368_v31 = vadd.f32 %v4031_v22, %v10803_v34 }
 0x29f   : > { %v9322_v62 = vpack.c.bf16 %v4447_v40, %v4446_v57  ;;  %v9369_v23 = vadd.f32 %v9068_v24, %v10807_v36  ;;  %v4041_v61 = vpop.f32.mrb[29].mxu0  ;;  %v4143_v18 = vadd.f32 %v9366_v13, %v10831_v48  ;;  %v10993_v33 = vadd.f32 %v9367_v19, %v10831_v48 }
 0x2a0   : > { %v4658_v27 = vsel %vm4164_vm4, %v4655_v55, %v4657_v12  ;;  %v4667_v25 = vsel %vm529_vm0, %v4665_v49, %v4666_v20  ;;  %v9370_v0 = vadd.f32 %v4041_v61, %v10809_v50  ;;  %v4145_v34 = vadd.f32 %v9368_v31, %v10831_v48 }
 0x2a1   : > { %v4662_v7 = vmax.f32 %v10925_v38, %v4658_v27  ;;  %v10988_v29 = vmax.f32 %v4661_v26, %v4667_v25  ;;  %9324 = vmatpush3.bf16.msk.msra.mxu1 %vm10890_vm9, %v9322_v62  ;;  %v4574_v36 = vrot.slane %v4568_v44, 4  ;;  %v4668_v55 = vrot.slane %v4143_v18, 4 }
 0x2a2   : > { %v4765_v6 = vrot.slane %v4143_v18, 2  ;;  %v10997_v51 = vadd.f32 %v9370_v0, %v10831_v48  ;;  %9325 = vmatprep.subr.bf16.mxu1 %v9801_v3  ;;  %v9071_v50 = vpop.f32.mrb[30].mxu0  ;;  %v4778_v53 = vrot.slane %v10993_v33, 4  ;;  %v4768_v59 = vrot.slane %v4145_v34, 2 }
 0x2a3   : > { %v4676_v38 = vrot.slane %v10988_v29, 1  ;;  %v4148_v21 = vadd.f32 %v9369_v23, %v10831_v48  ;;  %v4051_v2 = vpop.f32.mrb[31].mxu0  ;;  %v4683_v37 = vrot.slane %v10988_v29, 2  ;;  %v4669_v9 = vsel %vm529_vm0, %v4666_v20, %v4668_v55 }
 0x2a4   : > { %v4767_v63 = vsel %vm4164_vm4, %v4765_v6, %v4766_v35  ;;  %v4779_v32 = vrot.slane %v10997_v51, 4  ;;  %9097 = vmatmul.mubr.msk.f32.vlgmr.msra.gmra.mrb[44].mxu1 %vm4202_vm7, %v10866_v5  ;;  %v11009_v47 = vmax.f32 %v4662_v7, %v4669_v9  ;;  %v4769_v8 = vsel %vm4164_vm4, %v4766_v35, %v4768_v59 }
 0x2a5   : > { %v4773_v28 = vmax.f32 %v4141_v41, %v4767_v63  ;;  %v4775_v17 = vmax.f32 %v4143_v18, %v4768_v59  ;;  %9103 = vmatprep.mubr.msk.f32.mxu1 %vm9802_vm3, %v9800_v1  ;;  %v4774_v39 = vmax.f32 %v10963_v52, %v4769_v8  ;;  %v4575_v4 = vsel %vm529_vm0, %v4573_v16, %v4574_v36 }
 0x2a6   : > { %v4780_v10 = vsel %vm529_vm0, %v4778_v53, %v4779_v32  ;;  %v4577_v11 = vsel %vm529_vm0, %v4574_v36, %v4576_v45  ;;  %v9074_v30 = vpop.f32.mrb[32].mxu0  ;;  %v4677_v15 = vrot.slane %v11009_v47, 1  ;;  %v9371_v20 = vadd.f32 %v9071_v50, %v10812_v54 }
 0x2a7   : > { %v4784_v42 = vmax.f32 %v4773_v28, %v4778_v53  ;;  %v4786_v44 = vmax.f32 %v4775_v17, %v4779_v32  ;;  %v9326_v14 = vpack.c.bf16 %v4577_v11, %v4575_v4  ;;  %v4061_v22 = vpop.f32.mrb[33].mxu0  ;;  %v4785_v26 = vmax.f32 %v4774_v39, %v4780_v10 }
 0x2a8   : > { %v9372_v41 = vadd.f32 %v4051_v2, %v10814_v56  ;;  %v9373_v52 = vadd.f32 %v9074_v30, %v10816_v58  ;;  %v4896_v57 = vrot.slane %v4148_v21, 2  ;;  %v4150_v49 = vadd.f32 %v9371_v20, %v10831_v48 }
 0x2a9   : > { %v4790_v43 = vrot.slane %v4784_v42, 1  ;;  %v4793_v40 = vrot.slane %v4786_v44, 1  ;;  %v4804_v16 = vrot.slane %v4786_v44, 2  ;;  %9328 = vmatpush3.bf16.msk.msra.mxu1 %vm10890_vm9, %v9326_v14  ;;  %v4791_v45 = vrot.slane %v4785_v26, 1 }
 0x2aa   : > { %v4802_v12 = vrot.slane %v4785_v26, 2  ;;  %v4149_v35 = vadd.f32 %v9372_v41, %v10831_v48  ;;  %9329 = vmatprep.subr.bf16.mxu1 %v9801_v3  ;;  %v4152_v56 = vadd.f32 %v9373_v52, %v10831_v48  ;;  %v9374_v58 = vadd.f32 %v4061_v22, %v10818_v60 }
 0x2ab   : > { %v4800_v54 = vmax.f32 %v4786_v44, %v4793_v40  ;;  %v4678_v13 = vsel %vm4187_vm6, %v4676_v38, %v4677_v15  ;;  %v4792_v24 = vsel %vm4187_vm6, %v4790_v43, %v4791_v45  ;;  %v4794_v62 = vsel %vm4187_vm6, %v4791_v45, %v4793_v40  ;;  %v8741_v43 = vpop.f32.mrb[38].mxu1  ;;  %v7970_v40 = vld [vmem:[%s11380_s1 + $0x4] sm:$0xf] }
 0x2ac   : > { %v4805_v19 = vsel %vm4164_vm4, %v4802_v12, %v4804_v16  ;;  %v4899_v31 = vrot.slane %v4150_v49, 2  ;;  %9104 = vmatmul.mubr.msk.f32.vlgmr.msra.gmra.mrb[46].mxu1 %vm4202_vm7, %v10866_v5  ;;  %v4801_v23 = vrot.slane %v4784_v42, 2  ;;  %v4799_v61 = vmax.f32 %v4785_v26, %v4794_v62  ;;  %v11083_v45 = vld [vmem:[#allocation2 + $0x2] sm:$0xff] }
 0x2ad   : > { %v4811_v27 = vmax.f32 %v4800_v54, %v4804_v16  ;;  %v4897_v25 = vrot.slane %v4149_v35, 2  ;;  %9110 = vmatprep.mubr.msk.f32.mxu1 %vm9802_vm3, %v9800_v1  ;;  %v4910_v60 = vrot.slane %v4152_v56, 4  ;;  %v4151_v18 = vadd.f32 %v9374_v58, %v10831_v48  ;;  %v5026_v16 = vld [vmem:[#allocation2] sm:$0xff]  ;;  %v7989_v54 = vld [vmem:[%s11380_s1 + $0x8] sm:$0xf] }
 0x2ae   : > { %v4681_v0 = vmax.f32 %v10988_v29, %v4678_v13  ;;  %v4682_v7 = vmax.f32 %v11009_v47, %v4677_v15  ;;  %v4810_v34 = vmax.f32 %v4799_v61, %v4805_v19  ;;  %v4907_v36 = vrot.slane %v4150_v49, 4 }
 0x2af   : > { %v4898_v55 = vsel %vm4164_vm4, %v4896_v57, %v4897_v25  ;;  %v4900_v6 = vsel %vm4164_vm4, %v4897_v25, %v4899_v31  ;;  %v4908_v53 = vrot.slane %v4151_v18, 4  ;;  %v4684_v59 = vrot.slane %v11009_v47, 2  ;;  %v1515_v57 = vpop.f32.mrb[39].mxu1 }
 0x2b0   : > { %v4903_v50 = vmax.f32 %v10993_v33, %v4898_v55  ;;  %v4904_v38 = vmax.f32 %v10997_v51, %v4900_v6  ;;  %v4816_v21 = vrot.slane %v4810_v34, 4  ;;  %v4818_v2 = vrot.slane %v4811_v27, 4  ;;  %v5911_v57 = vld [vmem:[#allocation2 + $0x4a] sm:$0x7f] }
 0x2b1   : > { %v4798_v48 = vmax.f32 %v4784_v42, %v4792_v24  ;;  %v4803_v9 = vsel %vm4164_vm4, %v4801_v23, %v4802_v12  ;;  %v4909_v63 = vsel %vm529_vm0, %v4907_v36, %v4908_v53  ;;  %v4911_v32 = vsel %vm529_vm0, %v4908_v53, %v4910_v60 }
 0x2b2   : > { %v4685_v28 = vsel %vm4164_vm4, %v4683_v37, %v4684_v59  ;;  %v4689_v8 = vmax.f32 %v4682_v7, %v4684_v59  ;;  %v4914_v33 = vmax.f32 %v4903_v50, %v4909_v63  ;;  %v4915_v17 = vmax.f32 %v4904_v38, %v4911_v32 }
 0x2b3   : > { %v4688_v51 = vmax.f32 %v4681_v0, %v4685_v28  ;;  %v4809_v39 = vmax.f32 %v4798_v48, %v4803_v9  ;;  %v4819_v47 = vsel %vm529_vm0, %v4816_v21, %v4818_v2  ;;  %v7999_v48 = vld [vmem:[%s11380_s1 + $0xc] sm:$0xf] }
 0x2b4   : > { %v4918_v10 = vrot.slane %v4914_v33, 1  ;;  %v4919_v4 = vrot.slane %v4915_v17, 1  ;;  %v4925_v11 = vrot.slane %v4914_v33, 2  ;;  %v4926_v30 = vrot.slane %v4915_v17, 2 }
 0x2b5   : > { %v9330_v15 = vpack.c.bf16 %v4689_v8, %v4688_v51  ;;  %v4815_v42 = vrot.slane %v4809_v39, 4 }
 0x2b6   : > { %v4920_v44 = vsel %vm4187_vm6, %v4918_v10, %v4919_v4  ;;  %v4924_v14 = vmax.f32 %v4915_v17, %v4919_v4  ;;  %v4927_v29 = vsel %vm4164_vm4, %v4925_v11, %v4926_v30  ;;  %v8019_v4 = vld [vmem:[%s11380_s1 + $0x14] sm:$0xf] }
 0x2b7   : > { %v4923_v22 = vmax.f32 %v4914_v33, %v4920_v44  ;;  %9332 = vmatpush3.bf16.msk.msra.mxu1 %vm10890_vm9, %v9330_v15  ;;  %v4817_v37 = vsel %vm529_vm0, %v4815_v42, %v4816_v21  ;;  %v8009_v33 = vld [vmem:[%s11380_s1 + $0x10] sm:$0xf]  ;;  %v8029_v15 = vld [vmem:[%s11380_s1 + $0x18] sm:$0xf] }
 0x2b8   : > { %9333 = vmatprep.subr.bf16.mxu1 %v9801_v3  ;;  %v9334_v26 = vpack.c.bf16 %v4819_v47, %v4817_v37  ;;  %v4931_v20 = vmax.f32 %v4924_v14, %v4926_v30  ;;  %v8039_v14 = vld [vmem:[%s11380_s1 + $0x1c] sm:$0xf] }
 0x2b9   : > { %v4930_v41 = vmax.f32 %v4923_v22, %v4927_v29 }
 0x2ba   : > { %9111 = vmatmul.mubr.msk.f32.vlgmr.msra.gmra.mrb[48].mxu1 %vm4202_vm7, %v10866_v5 }
 0x2bb   : > { %9336 = vmatpush3.bf16.msk.msra.mxu1 %vm10890_vm9, %v9334_v26  ;;  %9117 = vmatprep.mubr.msk.f32.mxu1 %vm9802_vm3, %v9800_v1  ;;  %v9338_v52 = vpack.c.bf16 %v4931_v20, %v4930_v41 }
 0x2bc   : > { %9337 = vmatprep.subr.bf16.mxu1 %v9801_v3  ;;  %v5035_v3 = vld [vmem:[#allocation2 + $0x1] sm:$0xff] }
 0x2bd   : > { %6670 = vst.msk [vmem:[#allocation2] sm:$0xff] %vm269_vm1, %v9800_v1 }
 0x2be   : > { %9118 = vmatmul.mubr.msk.f32.vlgmr.msra.gmra.mrb[50].mxu1 %vm4202_vm7, %v10866_v5 }
 0x2bf   : > { %9340 = vmatpush3.bf16.msk.msra.mxu1 %vm10890_vm9, %v9338_v52  ;;  %9124 = vmatprep.mubr.msk.f32.mxu1 %vm9802_vm3, %v9800_v1  ;;  %v8049_v52 = vld [vmem:[%s11380_s1 + $0x20] sm:$0xf] }
 0x2c0   : > { %9127 = vmatprep.subr.msk.mxu1 %vm529_vm0, %v7970_v40 }
 0x2c2   : > { %9125 = vmatmul.mubr.msk.f32.vlgmr.msra.gmra.mrb[52].mxu1 %vm4202_vm7, %v10866_v5 }
 0x2c3   : > { %9128 = vmatpush3.msk.msra.mxu1 %vm529_vm0, %v7970_v40  ;;  %9129 = vmatprep.mubr.msk.f32.mxu1 %vm269_vm1, %v5035_v3  ;;  %v6060_v3 = vld [vmem:[#allocation2 + $0x4b] sm:$0x7f] }
 0x2c4   : > { %9141 = vmatprep.subr.msk.mxu1 %vm529_vm0, %v5034_v46 }
 0x35e   : > { %v4275_v12 = vpop.f32.mrb[40].mxu1 }
 0x35f   : > { %5019 = vst.msk [vmem:[#allocation2 + $0xa] sm:$0x7f] %vm5018_vm10, %v4275_v12  ;;  %v9084_v49 = vpop.f32.mrb[41].mxu1 }
 0x366   : > { %v11088_v35 = vld [vmem:[#allocation2 + $0x9] sm:$0xff] }
 0x367   : > { %9130 = vmatmul.mubr.msk.f32.vlgmr.msra.gmra.mrb[54].mxu1 %vm269_vm1, %v11088_v35  ;;  %v5027_v56 = vld [vmem:[#allocation2 + $0x8] sm:$0xff] }
 0x368   : > { %v11095_v58 = vld [vmem:[#allocation2 + $0xa] sm:$0xff]  ;;  %9142 = vmatpush3.msk.msra.mxu1 %vm529_vm0, %v5034_v46 }
 0x369   : > { %v11097_v13 = vld [vmem:[#allocation2 + $0xb] sm:$0xff]  ;;  %9155 = vmatprep.subr.msk.mxu1 %vm529_vm0, %v7989_v54 }
 0x36a   : > { %6671 = vst.msk [vmem:[#allocation2 + $0x8] sm:$0xff] %vm269_vm1, %v9800_v1 }
 0x36f   : > { %v4405_v24 = vpop.f32.mrb[42].mxu1 }
 0x370   : > { %5020 = vst.msk [vmem:[#allocation2 + $0x13] sm:$0x7f] %vm5018_vm10, %v4405_v24  ;;  %v9091_v62 = vpop.f32.mrb[43].mxu1 }
 0x377   : > { %v4517_v19 = vpop.f32.mrb[44].mxu1  ;;  %v11104_v31 = vld [vmem:[#allocation2 + $0x11] sm:$0xff] }
 0x378   : > { %v5028_v23 = vld [vmem:[#allocation2 + $0x10] sm:$0xff]  ;;  %5021 = vst.msk [vmem:[#allocation2 + $0x1c] sm:$0x7f] %vm5018_vm10, %v4517_v19  ;;  %v9098_v61 = vpop.f32.mrb[45].mxu1  ;;  %9132 = vmatprep.mubr.msk.f32.mxu1 %vm269_vm1, %v11104_v31 }
 0x379   : > { %v11109_v27 = vld [vmem:[#allocation2 + $0x12] sm:$0xff] }
 0x37a   : > { %v11111_v25 = vld [vmem:[#allocation2 + $0x13] sm:$0xff] }
 0x37b   : > { %v11113_v60 = vld [vmem:[#allocation2 + $0x14] sm:$0xff] }
 0x37c   : > { %6672 = vst.msk [vmem:[#allocation2 + $0x10] sm:$0xff] %vm269_vm1, %v9800_v1 }
 0x37f   : > { %v4647_v18 = vpop.f32.mrb[46].mxu1  ;;  %v5038_v0 = vld [vmem:[#allocation2 + $0x19] sm:$0xff] }
 0x380   : > { %5022 = vst.msk [vmem:[#allocation2 + $0x25] sm:$0x7f] %vm5018_vm10, %v4647_v18  ;;  %v9105_v7 = vpop.f32.mrb[47].mxu1  ;;  %9133 = vmatmul.mubr.msk.f32.gmra.mrb[56].mxu1 %vm269_vm1, %v5038_v0  ;;  %v5029_v9 = vld [vmem:[#allocation2 + $0x18] sm:$0xff] }
 0x381   : > { %v5311_v17 = vld [vmem:[#allocation2 + $0x1a] sm:$0xff] }
 0x382   : > { %v5757_v29 = vld [vmem:[#allocation2 + $0x1b] sm:$0xff] }
 0x383   : > { %v6203_v46 = vld [vmem:[#allocation2 + $0x1c] sm:$0xff] }
 0x384   : > { %6673 = vst.msk [vmem:[#allocation2 + $0x18] sm:$0x3f] %vm312_vm13, %v9800_v1 }
 0x387   : > { %v5039_v34 = vld [vmem:[#allocation2 + $0x21] sm:$0xff] }
 0x388   : > { %9135 = vmatprep.mubr.msk.f32.mxu1 %vm269_vm1, %v5039_v34  ;;  %v5030_v63 = vld [vmem:[#allocation2 + $0x20] sm:$0xff] }
 0x389   : > { %v5312_v51 = vld [vmem:[#allocation2 + $0x22] sm:$0xff] }
 0x38a   : > { %v5758_v22 = vld [vmem:[#allocation2 + $0x23] sm:$0xff] }
 0x38d   : > { %v4759_v36 = vpop.f32.mrb[48].mxu1 }
 0x38e   : > { %5023 = vst.msk [vmem:[#allocation2 + $0x2e] sm:$0x7f] %vm5018_vm10, %v4759_v36  ;;  %v9112_v55 = vpop.f32.mrb[49].mxu1 }
 0x391   : > { %v4889_v6 = vpop.f32.mrb[50].mxu1 }
 0x392   : > { %5024 = vst.msk [vmem:[#allocation2 + $0x37] sm:$0x7f] %vm5018_vm10, %v4889_v6  ;;  %v9119_v50 = vpop.f32.mrb[51].mxu1 }
 0x395   : > { %v5040_v38 = vld [vmem:[#allocation2 + $0x29] sm:$0xff]  ;;  %v5001_v53 = vpop.f32.mrb[52].mxu1 }
 0x396   : > { %9136 = vmatmul.mubr.msk.f32.gmra.mrb[58].mxu1 %vm269_vm1, %v5040_v38  ;;  %5025 = vst.msk [vmem:[#allocation2 + $0x40] sm:$0x7f] %vm5018_vm10, %v5001_v53  ;;  %v9126_v59 = vpop.f32.mrb[53].mxu1  ;;  %v5031_v32 = vld [vmem:[#allocation2 + $0x28] sm:$0xff] }
 0x397   : > { %v5313_v39 = vld [vmem:[#allocation2 + $0x2a] sm:$0xff] }
 0x398   : > { %v5759_v37 = vld [vmem:[#allocation2 + $0x2b] sm:$0xff] }
 0x399   : > { %v5041_v21 = vld [vmem:[#allocation2 + $0x31] sm:$0xff]  ;;  %v5042_v2 = vld [vmem:[#allocation2 + $0x39] sm:$0x7f] }
 0x39a   : > { %9138 = vmatprep.mubr.msk.f32.mxu1 %vm269_vm1, %v5041_v21  ;;  %v5032_v28 = vld [vmem:[#allocation2 + $0x30] sm:$0xff]  ;;  %v5033_v8 = vld [vmem:[#allocation2 + $0x38] sm:$0x7f] }
 0x39b   : > { %9139 = vmatmul.mubr.msk.f32.gmra.mrb[60].mxu1 %vm269_vm1, %v5042_v2  ;;  %v5314_v47 = vld [vmem:[#allocation2 + $0x32] sm:$0xff] }
 0x39c   : > { %9143 = vmatprep.mubr.msk.f32.mxu1 %vm269_vm1, %v5026_v16  ;;  %v5760_v26 = vld [vmem:[#allocation2 + $0x33] sm:$0xff]  ;;  %v6204_v16 = vld [vmem:[#allocation2 + $0x24] sm:$0xff] }
 0x39d   : > { %v5315_v10 = vld [vmem:[#allocation2 + $0x3a] sm:$0x7f]  ;;  %v5464_v30 = vld [vmem:[#allocation2 + $0x41] sm:$0x7f] }
 0x39e   : > { %v5463_v11 = vld [vmem:[#allocation2 + $0x39] sm:$0xff]  ;;  %v5613_v44 = vld [vmem:[#allocation2 + $0x42] sm:$0x7f] }
 0x39f   : > { %9144 = vmatmul.mubr.msk.f32.vlgmr.msra.gmra.mrb[54].mxu1 %vm269_vm1, %v5027_v56  ;;  %v5612_v42 = vld [vmem:[#allocation2 + $0x3a] sm:$0xff]  ;;  %v5762_v41 = vld [vmem:[#allocation2 + $0x43] sm:$0x7f] }
 0x3a0   : > { %9146 = vmatprep.mubr.msk.f32.mxu1 %vm269_vm1, %v5028_v23  ;;  %9156 = vmatpush3.msk.msra.mxu1 %vm529_vm0, %v7989_v54  ;;  %v5761_v20 = vld [vmem:[#allocation2 + $0x3b] sm:$0xff]  ;;  %v6059_v40 = vld [vmem:[#allocation2 + $0x43] sm:$0xff]  ;;  %v6209_v54 = vld [vmem:[#allocation2 + $0x4c] sm:$0x7f] }
 0x3a1   : > { %9169 = vmatprep.subr.msk.mxu1 %vm529_vm0, %v7999_v48  ;;  %v5910_v43 = vld [vmem:[#allocation2 + $0x42] sm:$0xff]  ;;  %v6206_v12 = vld [vmem:[#allocation2 + $0x34] sm:$0xff]  ;;  %v8059_v56 = vld [vmem:[%s11381_s2] ss:$0 sm:$0xff] }
 0x3a2   : > { %v6207_v49 = vld [vmem:[#allocation2 + $0x3c] sm:$0xff] }
 0x3a3   : > { %9147 = vmatmul.mubr.msk.f32.gmra.mrb[56].mxu1 %vm269_vm1, %v5029_v9 }
 0x3a4   : > { %9149 = vmatprep.mubr.msk.f32.mxu1 %vm269_vm1, %v5030_v63 }
 0x3a7   : > { %9150 = vmatmul.mubr.msk.f32.gmra.mrb[58].mxu1 %vm269_vm1, %v5031_v32 }
 0x3a8   : > { %9152 = vmatprep.mubr.msk.f32.mxu1 %vm269_vm1, %v5032_v28 }
 0x3ab   : > { %9153 = vmatmul.mubr.msk.f32.gmra.mrb[60].mxu1 %vm269_vm1, %v5033_v8 }
 0x3ac   : > { %9157 = vmatprep.mubr.msk.f32.mxu1 %vm269_vm1, %v11083_v45  ;;  %v6205_v45 = vld [vmem:[#allocation2 + $0x2c] sm:$0xff] }
 0x3af   : > { %9158 = vmatmul.mubr.msk.f32.vlgmr.msra.gmra.mrb[54].mxu1 %vm269_vm1, %v11095_v58 }
 0x3b0   : > { %9160 = vmatprep.mubr.msk.f32.mxu1 %vm269_vm1, %v11109_v27  ;;  %9170 = vmatpush3.msk.msra.mxu1 %vm529_vm0, %v7999_v48 }
 0x3b1   : > { %9183 = vmatprep.subr.msk.mxu1 %vm529_vm0, %v8009_v33 }
 0x3b3   : > { %9161 = vmatmul.mubr.msk.f32.gmra.mrb[56].mxu1 %vm269_vm1, %v5311_v17 }
 0x3b4   : > { %9163 = vmatprep.mubr.msk.f32.mxu1 %vm269_vm1, %v5312_v51 }
 0x3b7   : > { %9164 = vmatmul.mubr.msk.f32.gmra.mrb[58].mxu1 %vm269_vm1, %v5313_v39 }
 0x3b8   : > { %9166 = vmatprep.mubr.msk.f32.mxu1 %vm269_vm1, %v5314_v47 }
 0x3bb   : > { %9167 = vmatmul.mubr.msk.f32.gmra.mrb[60].mxu1 %vm269_vm1, %v5315_v10 }
 0x3bc   : > { %9171 = vmatprep.mubr.msk.f32.mxu1 %vm269_vm1, %v11088_v35  ;;  %v6208_v35 = vld [vmem:[#allocation2 + $0x44] sm:$0xff] }
 0x3bf   : > { %9172 = vmatmul.mubr.msk.f32.vlgmr.msra.gmra.mrb[54].mxu1 %vm269_vm1, %v11104_v31 }
 0x3c0   : > { %9174 = vmatprep.mubr.msk.f32.mxu1 %vm269_vm1, %v5038_v0  ;;  %9184 = vmatpush3.msk.msra.mxu1 %vm529_vm0, %v8009_v33 }
 0x3c1   : > { %9197 = vmatprep.subr.msk.mxu1 %vm529_vm0, %v8019_v4 }
 0x3c3   : > { %9175 = vmatmul.mubr.msk.f32.gmra.mrb[56].mxu1 %vm269_vm1, %v5039_v34 }
 0x3c4   : > { %9177 = vmatprep.mubr.msk.f32.mxu1 %vm269_vm1, %v5040_v38 }
 0x3c7   : > { %9178 = vmatmul.mubr.msk.f32.gmra.mrb[58].mxu1 %vm269_vm1, %v5041_v21 }
 0x3c8   : > { %9180 = vmatprep.mubr.msk.f32.mxu1 %vm269_vm1, %v5463_v11 }
 0x3cb   : > { %9181 = vmatmul.mubr.msk.f32.gmra.mrb[60].mxu1 %vm269_vm1, %v5464_v30 }
 0x3cc   : > { %9185 = vmatprep.mubr.msk.f32.mxu1 %vm269_vm1, %v11095_v58 }
 0x3cf   : > { %9186 = vmatmul.mubr.msk.f32.vlgmr.msra.gmra.mrb[54].mxu1 %vm269_vm1, %v11109_v27 }
 0x3d0   : > { %9188 = vmatprep.mubr.msk.f32.mxu1 %vm269_vm1, %v5311_v17  ;;  %9198 = vmatpush3.msk.msra.mxu1 %vm529_vm0, %v8019_v4 }
 0x3d1   : > { %9211 = vmatprep.subr.msk.mxu1 %vm529_vm0, %v8029_v15 }
 0x3d3   : > { %9189 = vmatmul.mubr.msk.f32.gmra.mrb[56].mxu1 %vm269_vm1, %v5312_v51 }
 0x3d4   : > { %9191 = vmatprep.mubr.msk.f32.mxu1 %vm269_vm1, %v5313_v39 }
 0x3d7   : > { %9192 = vmatmul.mubr.msk.f32.gmra.mrb[58].mxu1 %vm269_vm1, %v5314_v47 }
 0x3d8   : > { %9194 = vmatprep.mubr.msk.f32.mxu1 %vm269_vm1, %v5612_v42 }
 0x3db   : > { %9195 = vmatmul.mubr.msk.f32.gmra.mrb[60].mxu1 %vm269_vm1, %v5613_v44 }
 0x3dc   : > { %9199 = vmatprep.mubr.msk.f32.mxu1 %vm269_vm1, %v11097_v13 }
 0x3df   : > { %9200 = vmatmul.mubr.msk.f32.vlgmr.msra.gmra.mrb[54].mxu1 %vm269_vm1, %v11111_v25 }
 0x3e0   : > { %9202 = vmatprep.mubr.msk.f32.mxu1 %vm269_vm1, %v5757_v29  ;;  %9212 = vmatpush3.msk.msra.mxu1 %vm529_vm0, %v8029_v15 }
 0x3e1   : > { %9225 = vmatprep.subr.msk.mxu1 %vm529_vm0, %v8039_v14 }
 0x3e3   : > { %9203 = vmatmul.mubr.msk.f32.gmra.mrb[56].mxu1 %vm269_vm1, %v5758_v22 }
 0x3e4   : > { %9205 = vmatprep.mubr.msk.f32.mxu1 %vm269_vm1, %v5759_v37 }
 0x3e7   : > { %9206 = vmatmul.mubr.msk.f32.gmra.mrb[58].mxu1 %vm269_vm1, %v5760_v26 }
 0x3e8   : > { %9208 = vmatprep.mubr.msk.f32.mxu1 %vm269_vm1, %v5761_v20 }
 0x3eb   : > { %9209 = vmatmul.mubr.msk.f32.gmra.mrb[60].mxu1 %vm269_vm1, %v5762_v41 }
 0x3ec   : > { %9213 = vmatprep.mubr.msk.f32.mxu1 %vm269_vm1, %v11109_v27 }
 0x3ef   : > { %9214 = vmatmul.mubr.msk.f32.vlgmr.msra.gmra.mrb[54].mxu1 %vm269_vm1, %v5311_v17 }
 0x3f0   : > { %9216 = vmatprep.mubr.msk.f32.mxu1 %vm269_vm1, %v5312_v51  ;;  %9226 = vmatpush3.msk.msra.mxu1 %vm529_vm0, %v8039_v14 }
 0x3f1   : > { %9239 = vmatprep.subr.msk.mxu1 %vm529_vm0, %v8049_v52 }
 0x3f3   : > { %9217 = vmatmul.mubr.msk.f32.gmra.mrb[56].mxu1 %vm269_vm1, %v5313_v39 }
 0x3f4   : > { %9219 = vmatprep.mubr.msk.f32.mxu1 %vm269_vm1, %v5314_v47 }
 0x3f7   : > { %9220 = vmatmul.mubr.msk.f32.gmra.mrb[58].mxu1 %vm269_vm1, %v5612_v42 }
 0x3f8   : > { %9222 = vmatprep.mubr.msk.f32.mxu1 %vm269_vm1, %v5910_v43 }
 0x3fb   : > { %9223 = vmatmul.mubr.msk.f32.gmra.mrb[60].mxu1 %vm269_vm1, %v5911_v57 }
 0x3fc   : > { %9227 = vmatprep.mubr.msk.f32.mxu1 %vm269_vm1, %v11111_v25 }
 0x3ff   : > { %9228 = vmatmul.mubr.msk.f32.vlgmr.msra.gmra.mrb[54].mxu1 %vm269_vm1, %v5757_v29 }
 0x400   : > { %9230 = vmatprep.mubr.msk.f32.mxu1 %vm269_vm1, %v5758_v22  ;;  %9240 = vmatpush3.msk.msra.mxu1 %vm529_vm0, %v8049_v52 }
 0x401   : > { %9253 = vmatprep.subr.mxu1 %v9800_v1 }
 0x403   : > { %9231 = vmatmul.mubr.msk.f32.gmra.mrb[56].mxu1 %vm269_vm1, %v5759_v37 }
 0x404   : > { %9233 = vmatprep.mubr.msk.f32.mxu1 %vm269_vm1, %v5760_v26 }
 0x407   : > { %9234 = vmatmul.mubr.msk.f32.gmra.mrb[58].mxu1 %vm269_vm1, %v5761_v20 }
 0x408   : > { %9236 = vmatprep.mubr.msk.f32.mxu1 %vm269_vm1, %v6059_v40 }
 0x40b   : > { %9237 = vmatmul.mubr.msk.f32.gmra.mrb[60].mxu1 %vm269_vm1, %v6060_v3 }
 0x40c   : > { %9241 = vmatprep.mubr.msk.f32.mxu1 %vm269_vm1, %v11113_v60 }
 0x40f   : > { %9242 = vmatmul.mubr.msk.f32.vlgmr.msra.gmra.mrb[54].mxu1 %vm269_vm1, %v6203_v46 }
 0x410   : > { %9244 = vmatprep.mubr.msk.f32.mxu1 %vm269_vm1, %v6204_v16 }
 0x413   : > { %9245 = vmatmul.mubr.msk.f32.gmra.mrb[56].mxu1 %vm269_vm1, %v6205_v45 }
 0x414   : > { %9247 = vmatprep.mubr.msk.f32.mxu1 %vm269_vm1, %v6206_v12 }
 0x417   : > { %9248 = vmatmul.mubr.msk.f32.gmra.mrb[58].mxu1 %vm269_vm1, %v6207_v49 }
 0x418   : > { %9250 = vmatprep.mubr.msk.f32.mxu1 %vm269_vm1, %v6208_v35 }
 0x41b   : > { %9251 = vmatmul.mubr.msk.f32.gmra.mrb[60].mxu1 %vm269_vm1, %v6209_v54 }
 0x41c   : > { %9255 = vmatprep.mubr.msk.f32.mxu1 %vm9802_vm3, %v9800_v1 }
 0x4e2   : > { %v9243_v58 = vpop.f32.mrb[54].mxu1 }
 0x4e3   : > { %v6359_v13 = vadd.f32 %v9243_v58, %v8059_v56  ;;  %v6304_v24 = vpop.f32.mrb[55].mxu1 }
 0x4e4   : > { %v6358_v62 = vadd.f32 %v8059_v56, %v6304_v24 }
 0x4e5   : > { %v6367_v19 = vrot.slane %v6359_v13, 1 }
 0x4e6   : > { %v9246_v31 = vpop.f32.mrb[56].mxu1 }
 0x4e7   : > { %v6369_v23 = vmax.f32 %v6358_v62, %v6367_v19  ;;  %v6361_v61 = vadd.f32 %v9246_v31, %v8059_v56  ;;  %v6314_v27 = vpop.f32.mrb[57].mxu1  ;;  %v8066_v19 = vld [vmem:[%s11382_s3 + $0x4] sm:$0xf]  ;;  %v6680_v31 = vld [vmem:[%s11382_s3] sm:$0xf] }
 0x4e8   : > { %v6360_v25 = vadd.f32 %v8059_v56, %v6314_v27 }
 0x4e9   : > { %v6373_v60 = vrot.slane %v6361_v61, 2  ;;  %v6462_v38 = vrot.slane %v6361_v61, 1 }
 0x4ea   : > { %v6372_v18 = vrot.slane %v6360_v25, 2  ;;  %v9249_v0 = vpop.f32.mrb[58].mxu1 }
 0x4eb   : > { %v6363_v7 = vadd.f32 %v9249_v0, %v8059_v56  ;;  %v6324_v34 = vpop.f32.mrb[59].mxu1 }
 0x4ec   : > { %v6374_v36 = vsel %vm4164_vm4, %v6372_v18, %v6373_v60  ;;  %v6362_v55 = vadd.f32 %v8059_v56, %v6324_v34  ;;  %v8073_v34 = vld [vmem:[%s11382_s3 + $0x8] sm:$0xf] }
 0x4ed   : > { %v6376_v6 = vmax.f32 %v6369_v23, %v6374_v36  ;;  %v6471_v50 = vrot.slane %v6363_v7, 2  ;;  %v6562_v47 = vrot.slane %v6363_v7, 1  ;;  %v3720_v23 = vld [vmem:[#allocation2 + $0x136] sm:$0xff] }
 0x4ee   : > { %v6463_v53 = vrot.slane %v6362_v55, 1  ;;  %v6470_v59 = vrot.slane %v6362_v55, 2  ;;  %v9252_v21 = vpop.f32.mrb[60].mxu1  ;;  %9075 = vmatprep.mubr.msk.f32.mxu0 %vm269_vm1, %v3720_v23 }
 0x4ef   : > { %v6378_v2 = vrot.slane %v6376_v6, 1  ;;  %v6365_v48 = vadd.f32 %v9252_v21, %v8059_v56  ;;  %v6334_v9 = vpop.f32.mrb[61].mxu1  ;;  %v6381_v17 = vrot.slane %v6376_v6, 2 }
 0x4f0   : > { %v6464_v63 = vsel %vm4187_vm6, %v6462_v38, %v6463_v53  ;;  %v6468_v32 = vmax.f32 %v6361_v61, %v6463_v53  ;;  %v6472_v28 = vsel %vm4164_vm4, %v6470_v59, %v6471_v50  ;;  %v6364_v8 = vadd.f32 %v8059_v56, %v6334_v9  ;;  %v3721_v61 = vld [vmem:[#allocation2 + $0x13e] sm:$0xff]  ;;  %v8081_v53 = vld [vmem:[%s11382_s3 + $0x10] sm:$0xf] }
 0x4f1   : > { %v6380_v33 = vmax.f32 %v6376_v6, %v6378_v2  ;;  %v6467_v51 = vmax.f32 %v6360_v25, %v6464_v63  ;;  %v6571_v39 = vrot.slane %v6365_v48, 2  ;;  %9076 = vmatmul.mubr.msk.f32.gmra.mrb[44].mxu0 %vm269_vm1, %v3721_v61  ;;  %v8077_v6 = vld [vmem:[%s11382_s3 + $0xc] sm:$0xf]  ;;  %v8085_v2 = vld [vmem:[%s11382_s3 + $0x14] sm:$0xf] }
 0x4f2   : > { %v6476_v10 = vmax.f32 %v6468_v32, %v6471_v50  ;;  %v6563_v4 = vrot.slane %v6364_v8, 1  ;;  %v6570_v11 = vrot.slane %v6364_v8, 2  ;;  %v8089_v63 = vld [vmem:[%s11382_s3 + $0x18] sm:$0xf]  ;;  %v8093_v8 = vld [vmem:[%s11382_s3 + $0x1c] sm:$0xf] }
 0x4f3   : > { %v6475_v30 = vmax.f32 %v6467_v51, %v6472_v28  ;;  %v6383_v15 = vmax.f32 %v6380_v33, %v6381_v17  ;;  %v8097_v51 = vld [vmem:[%s11382_s3 + $0x20] sm:$0xf] }
 0x4f4   : > { %v6483_v42 = vrot.slane %v6476_v10, 2  ;;  %v6564_v44 = vsel %vm4187_vm6, %v6562_v47, %v6563_v4  ;;  %v6568_v14 = vmax.f32 %v6363_v7, %v6563_v4  ;;  %v6572_v29 = vsel %vm4164_vm4, %v6570_v11, %v6571_v39  ;;  %v7304_v47 = vld [vmem:[#allocation2 + $0x13] sm:$0x7f] }
 0x4f5   : > { %v6478_v22 = vrot.slane %v6475_v30, 1  ;;  %v6482_v37 = vrot.slane %v6475_v30, 2  ;;  %v6567_v26 = vmax.f32 %v6362_v55, %v6564_v44  ;;  %9254 = vmatpush3.msk.msra.mxu1 %vm6387_vm11, %v6383_v15  ;;  %v7394_v4 = vld [vmem:[#allocation2 + $0x14] sm:$0x7f]  ;;  %v8101_v15 = vld [vmem:[%s11383_s4] ss:$0 sm:$0xff] }
 0x4f6   : > { %v6576_v20 = vmax.f32 %v6568_v14, %v6571_v39  ;;  %9256 = vmatmul.mubr.msk.f32.vlgmr.msra.gmra.mrb[62].mxu1 %vm6384_vm12, %v10866_v5  ;;  %9258 = vmatprep.subr.mxu1 %v9800_v1 }
 0x4f7   : > { %v6575_v41 = vmax.f32 %v6567_v26, %v6572_v29  ;;  %v6480_v52 = vmax.f32 %v6475_v30, %v6478_v22  ;;  %v6484_v43 = vsel %vm4164_vm4, %v6482_v37, %v6483_v42  ;;  %9260 = vmatprep.mubr.msk.f32.mxu1 %vm9802_vm3, %v9800_v1 }
 0x4f8   : > { %v6580_v57 = vrot.slane %v6576_v20, 1  ;;  %v6587_v40 = vrot.slane %v6576_v20, 2 }
 0x4f9   : > { %v6579_v3 = vrot.slane %v6575_v41, 1  ;;  %v6586_v46 = vrot.slane %v6575_v41, 2  ;;  %v6486_v16 = vmax.f32 %v6480_v52, %v6484_v43 }
 0x4fa   : > { %v6585_v45 = vmax.f32 %v6576_v20, %v6580_v57 }
 0x4fb   : > { %v6581_v12 = vsel %vm4187_vm6, %v6579_v3, %v6580_v57  ;;  %v6488_v49 = vrot.slane %v6486_v16, 2  ;;  %v6588_v35 = vsel %vm4164_vm4, %v6586_v46, %v6587_v40 }
 0x4fc   : > { %v6584_v54 = vmax.f32 %v6575_v41, %v6581_v12  ;;  %v6592_v56 = vmax.f32 %v6585_v45, %v6587_v40 }
 0x4fd   : > { %9259 = vmatpush3.msk.msra.mxu1 %vm6387_vm11, %v6488_v49 }
 0x4fe   : > { %9261 = vmatmul.mubr.msk.f32.vlgmr.msra.gmra.mrb[64].mxu1 %vm6384_vm12, %v10866_v5  ;;  %9263 = vmatprep.subr.mxu1 %v9800_v1  ;;  %v6591_v58 = vmax.f32 %v6584_v54, %v6588_v35  ;;  %v6596_v24 = vrot.slane %v6592_v56, 4 }
 0x4ff   : > { %9265 = vmatprep.mubr.msk.f32.mxu1 %vm9802_vm3, %v9800_v1 }
 0x500   : > { %v6595_v13 = vrot.slane %v6591_v58, 4 }
 0x502   : > { %v6597_v62 = vsel %vm529_vm0, %v6595_v13, %v6596_v24 }
 0x503   : > { %9264 = vmatpush3.msk.msra.mxu1 %vm6387_vm11, %v6597_v62 }
 0x504   : > { %9266 = vmatmul.mubr.msk.f32.vlgmr.msra.gmra.mrb[66].mxu1 %vm6384_vm12, %v10866_v5  ;;  %9268 = vmatprep.subr.msk.mxu1 %vm529_vm0, %v8066_v19 }
 0x505   : > { %9269 = vmatpush3.msk.msra.mxu1 %vm529_vm0, %v8066_v19 }
 0x506   : > { %9273 = vmatprep.subr.msk.mxu1 %vm529_vm0, %v6680_v31 }
 0x5c4   : > { %v9077_v11 = vpop.f32.mrb[44].mxu0 }
 0x5c5   : > { %v4071_v30 = vpop.f32.mrb[45].mxu0 }
 0x5c9   : > { %v6457_v5 = vpop.f32.mrb[62].mxu1 }
 0x5ca   : > { %6675 = vst.msk [vmem:[#allocation2 + $0x6] sm:$0x7] %vm6674_vm14, %v6457_v5  ;;  %v9257_v27 = vpop.f32.mrb[63].mxu1 }
 0x5d1   : > { %v6557_v25 = vpop.f32.mrb[64].mxu1  ;;  %v6681_v60 = vld [vmem:[#allocation2 + $0x1] sm:$0xff] }
 0x5d2   : > { %6676 = vst.msk [vmem:[#allocation2 + $0xb] sm:$0x7] %vm6674_vm14, %v6557_v25  ;;  %9270 = vmatprep.mubr.msk.f32.mxu1 %vm269_vm1, %v6681_v60  ;;  %v9262_v18 = vpop.f32.mrb[65].mxu1  ;;  %v6678_v36 = vld [vmem:[#allocation2] sm:$0xff] }
 0x5d3   : > { %v6853_v50 = vld [vmem:[#allocation2 + $0x2] sm:$0xff] }
 0x5d7   : > { %v6666_v0 = vpop.f32.mrb[66].mxu1 }
 0x5d8   : > { %6677 = vst.msk [vmem:[#allocation2 + $0x10] sm:$0x7] %vm6674_vm14, %v6666_v0  ;;  %v9267_v7 = vpop.f32.mrb[67].mxu1 }
 0x5d9   : > { %v6682_v1 = vld [vmem:[#allocation2 + $0x9] sm:$0x7f] }
 0x5da   : > { %9271 = vmatmul.mubr.msk.f32.vlgmr.msra.gmra.mrb[68].mxu1 %vm269_vm1, %v6682_v1  ;;  %v6679_v55 = vld [vmem:[#allocation2 + $0x8] sm:$0x7f] }
 0x5db   : > { %9274 = vmatpush3.msk.msra.mxu1 %vm529_vm0, %v6680_v31  ;;  %9275 = vmatprep.mubr.msk.f32.mxu1 %vm269_vm1, %v6678_v36  ;;  %v6943_v59 = vld [vmem:[#allocation2 + $0x5] sm:$0xff] }
 0x5dc   : > { %9278 = vmatprep.subr.msk.mxu1 %vm529_vm0, %v8073_v34  ;;  %v7033_v48 = vld [vmem:[#allocation2 + $0x6] sm:$0xff] }
 0x5dd   : > { %v7123_v32 = vld [vmem:[#allocation2 + $0x7] sm:$0xff] }
 0x5df   : > { %v6854_v38 = vld [vmem:[#allocation2 + $0xa] sm:$0x7f]  ;;  %v7214_v17 = vld [vmem:[#allocation2 + $0x12] sm:$0x7f] }
 0x5e0   : > { %v6944_v21 = vld [vmem:[#allocation2 + $0xd] sm:$0x7f] }
 0x5e1   : > { %v7034_v9 = vld [vmem:[#allocation2 + $0xe] sm:$0x7f] }
 0x5e2   : > { %9276 = vmatmul.mubr.msk.f32.vlgmr.msra.gmra.mrb[68].mxu1 %vm269_vm1, %v6679_v55  ;;  %v7124_v28 = vld [vmem:[#allocation2 + $0xf] sm:$0x7f] }
 0x5e3   : > { %9279 = vmatpush3.msk.msra.mxu1 %vm529_vm0, %v8073_v34  ;;  %9280 = vmatprep.mubr.msk.f32.mxu1 %vm269_vm1, %v6853_v50  ;;  %v7213_v33 = vld [vmem:[#allocation2 + $0xa] sm:$0xff] }
 0x5e4   : > { %9283 = vmatprep.subr.msk.mxu1 %vm529_vm0, %v8077_v6  ;;  %v7303_v39 = vld [vmem:[#allocation2 + $0xb] sm:$0xff] }
 0x5e5   : > { %v7393_v10 = vld [vmem:[#allocation2 + $0xc] sm:$0xff] }
 0x5ea   : > { %9281 = vmatmul.mubr.msk.f32.vlgmr.msra.gmra.mrb[68].mxu1 %vm269_vm1, %v6854_v38 }
 0x5eb   : > { %9284 = vmatpush3.msk.msra.mxu1 %vm529_vm0, %v8077_v6  ;;  %9285 = vmatprep.mubr.msk.f32.mxu1 %vm269_vm1, %v6943_v59 }
 0x5ec   : > { %9288 = vmatprep.subr.msk.mxu1 %vm529_vm0, %v8081_v53 }
 0x5f2   : > { %9286 = vmatmul.mubr.msk.f32.vlgmr.msra.gmra.mrb[68].mxu1 %vm269_vm1, %v6944_v21 }
 0x5f3   : > { %9289 = vmatpush3.msk.msra.mxu1 %vm529_vm0, %v8081_v53  ;;  %9290 = vmatprep.mubr.msk.f32.mxu1 %vm269_vm1, %v7033_v48 }
 0x5f4   : > { %9293 = vmatprep.subr.msk.mxu1 %vm529_vm0, %v8085_v2 }
 0x5fa   : > { %9291 = vmatmul.mubr.msk.f32.vlgmr.msra.gmra.mrb[68].mxu1 %vm269_vm1, %v7034_v9 }
 0x5fb   : > { %9295 = vmatprep.mubr.msk.f32.mxu1 %vm269_vm1, %v7123_v32  ;;  %9294 = vmatpush3.msk.msra.mxu1 %vm529_vm0, %v8085_v2 }
 0x5fc   : > { %9298 = vmatprep.subr.msk.mxu1 %vm529_vm0, %v8089_v63 }
 0x602   : > { %9296 = vmatmul.mubr.msk.f32.vlgmr.msra.gmra.mrb[68].mxu1 %vm269_vm1, %v7124_v28 }
 0x603   : > { %9300 = vmatprep.mubr.msk.f32.mxu1 %vm269_vm1, %v7213_v33  ;;  %9299 = vmatpush3.msk.msra.mxu1 %vm529_vm0, %v8089_v63 }
 0x604   : > { %9303 = vmatprep.subr.msk.mxu1 %vm529_vm0, %v8093_v8 }
 0x60a   : > { %9301 = vmatmul.mubr.msk.f32.vlgmr.msra.gmra.mrb[68].mxu1 %vm269_vm1, %v7214_v17 }
 0x60b   : > { %9305 = vmatprep.mubr.msk.f32.mxu1 %vm269_vm1, %v7303_v39  ;;  %9304 = vmatpush3.msk.msra.mxu1 %vm529_vm0, %v8093_v8 }
 0x60c   : > { %9308 = vmatprep.subr.msk.mxu1 %vm529_vm0, %v8097_v51 }
 0x612   : > { %9306 = vmatmul.mubr.msk.f32.vlgmr.msra.gmra.mrb[68].mxu1 %vm269_vm1, %v7304_v47 }
 0x613   : > { %9310 = vmatprep.mubr.msk.f32.mxu1 %vm269_vm1, %v7393_v10  ;;  %9309 = vmatpush3.msk.msra.mxu1 %vm529_vm0, %v8097_v51 }
 0x61a   : > { %9311 = vmatmul.mubr.msk.f32.vlgmr.msra.gmra.mrb[68].mxu1 %vm269_vm1, %v7394_v4 }
 0x6ed   : > { %v9312_v42 = vpop.f32.mrb[68].mxu1 }
 0x6ee   : > { %v7472_v44 = vpop.f32.mrb[69].mxu1  ;;  %v7491_v14 = vadd.f32 %v9312_v42, %v8101_v15 }
 0x6ef   : > { %v7490_v29 = vadd.f32 %v8101_v15, %v7472_v44 }
 0x6f0   : > { %v7497_v37 = vrot.slane %v7491_v14, 2 }
 0x6f1   : > { %v7493_v22 = vrot.slane %v7490_v29, 5 }
 0x6f3   : > { %v7495_v26 = vmax.f32 %v7490_v29, %v7493_v22 }
 0x6f5   : > { %v7499_v20 = vmax.f32 %v7495_v26, %v7497_v37 }
 0x6f7   : > { %v7501_v41 = vrot.slane %v7499_v20, 1  ;;  %v7504_v43 = vrot.slane %v7499_v20, 2 }
 0x6f9   : > { %v7503_v52 = vmax.f32 %v7499_v20, %v7501_v41 }
 0x6fb   : > { %v7506_v57 = vmax.f32 %v7503_v52, %v7504_v43 }
 0x6fd   : > { %7508 = vst.msk [vmem:[%s216_s8] sm:$0x1] %vm7507_vm15, %v7506_v57 }
 0x6fe   : > { %9749 = shalt.err (!%p9746_p3)
}
 0x6ff   : > { %s9750_s17 = scalar_lea.hbm %s11337_s12, 16  ;;  %s9754_s26 = scalar_lea.hbm %s11384_s5, 32 }
 0x700   : > { %p9751_p4 = scmp.ne.s32.totalorder %s11337_s12, %s9750_s17  ;;  %p9755_p9 = scmp.lt.u32.totalorder %s11337_s12, %s11384_s5 }
 0x701   : > { %p9756_p10 = scmp.lt.u32.totalorder %s9754_s26, %s9750_s17  ;;  %p9758_p12 = scmp.lt.u32.totalorder %s9750_s17, %s11337_s12 }
 0x702   : > { %p9752_p7 = pnand %p9751_p4, %p9873_p5 }
 0x703   : > { %p9757_p11 = por %p9756_p10, %p9755_p9 }
 0x704   : > { %p9753_p8 = pneg %p9752_p7 }
 0x705   : > { %p9759_p13 = por %p9758_p12, %p9757_p11 }
 0x707   : > { %p9760_p0 = pnand %p9759_p13, %p9753_p8 }
 0x709   : > { %9763 = shalt.err (!%p9760_p0)
}
 0x70a   : > { %9693 = dma.vmem_to_hbm [thread:$0]  (%p9873_p5), %s11339_s9, 16, %s11337_s12, %s7510_s13  }
 0x70b PF: > { %p9699_p1 = scmp.ge.s32.totalorder %s9798_s21, 2  ;;  %s7534_s7 = sand.u32 1, %s9786_s18  }
 0x70c   : > { %s7535_s8 = scalar_lea.sflag [#allocation4], %s7534_s7 }
 0x70d   : > { %p9696_p2 = pnand %p9699_p1, %p9877_p6 }
 0x70f   : > { %9781 = dma.done.wait (!%p9696_p2), %s7535_s8, 16  }
 0x710   : > { %9783 = vsyncadd (!%p9696_p2), %s7535_s8, 4294967280  ;;  %p15_p3 = scmp.ge.s32.totalorder %s9860_s24, 4   ;;  %s11389_s18 = smov %s9790_s19 }
 0x711   : > { %s11390_s19 = smov %s9794_s20  ;;  %s11391_s20 = smov %s9871_s27 }
 0x712   : > { %s11392_s21 = smov %s9860_s24  ;;  %17 = sbr.rel (!%p15_p3) target bundleno = 3 (0x3), region = 106 }
 0x719   :  { %7539 = vsyncpa [#allocation4], 1 }
 0x71a   :  { %7541 = vsyncpa [#allocation4 + $0x1], 1 }

</bundles_post_ra>
